<compile_context>
chip_gen: v7x
topology: tpu7x:2x2x1
jax: 0.10.0
libtpu: 0.0.40
codegen_flags: <defaults>
</compile_context>

<pallas_src>
import functools

import jax
import jax.numpy as jnp
from jax import lax
from jax.experimental import pallas as pl
from jax.experimental.pallas import tpu as pltpu

HIDDEN = 64
INPUT = 28
T = 28
FC1 = 32
BN_EPS = 1e-5
LANE = 128


def _round_up(n, m):
    return ((n + m - 1) // m) * m


def rnn_kernel(x_ref, wih_ref, whh_ref, b_ref,
               gamma_ref, beta_ref, mean_ref, var_ref,
               w1_ref, b1_ref, w2_ref, b2_ref,
               out_ref, gx_ref):
    """One batch tile, fully in VMEM.

    x_ref:     (T, Bt, 28) f32   time-major input tile
    wih_ref:   (28, 4H)  bf16    LSTM input weights (transposed)
    whh_ref:   (H, 4H)   bf16    LSTM recurrent weights (transposed)
    b_ref:     (1, 4H)   f32     b_ih + b_hh
    gamma/beta/mean/var: (1, H) f32   BatchNorm1d eval-mode params + stats
    w1_ref:    (H, 32) bf16, b1_ref: (1, 32) f32
    w2_ref:    (32, CPAD) bf16 (zero-padded cols), b2_ref: (1, CPAD) f32 (-1e30 pads)
    out_ref:   (Bt, CPAD) f32    log-softmax (padded lanes ~ -1e30)
    gx_ref:    (T*Bt, 4H) f32    VMEM scratch: hoisted input projection
    """
    Bt = x_ref.shape[1]
    H = HIDDEN

    wih = wih_ref[...]
    whh = whh_ref[...]

    # ---- Phase 1: hoisted input projection (off the serial critical path).
    # One large matmul with the (28, 256) RHS resident in the MXU.
    xv = x_ref[...]                                   # (T, Bt, 28) f32
    x2 = xv.reshape(T * Bt, INPUT).astype(jnp.bfloat16)
    gx_ref[...] = (jnp.dot(x2, wih, preferred_element_type=jnp.float32)
                   + b_ref[...])

    # ---- Phase 2: LSTM recurrence, fully unrolled (T = 28, static).
    h = jnp.zeros((Bt, H), jnp.float32)
    c = jnp.zeros((Bt, H), jnp.float32)
    for t in range(T):
        g_x = gx_ref[pl.ds(t * Bt, Bt), :]            # static, sublane-aligned
        gates = g_x + jnp.dot(h.astype(jnp.bfloat16), whh,
                              preferred_element_type=jnp.float32)
        i_g = jax.nn.sigmoid(gates[:, 0:H])
        f_g = jax.nn.sigmoid(gates[:, H:2 * H])
        g_g = jnp.tanh(gates[:, 2 * H:3 * H])
        o_g = jax.nn.sigmoid(gates[:, 3 * H:4 * H])
        c = f_g * c + i_g * g_g
        h = o_g * jnp.tanh(c)

    # ---- BatchNorm1d (eval mode) with explicit running stats.
    scale = gamma_ref[...] * lax.rsqrt(var_ref[...] + BN_EPS)     # (1, H)
    shift = beta_ref[...] - mean_ref[...] * scale
    y = h * scale + shift

    # Dropout(p=0.25) -> identity in eval mode.
    y = jnp.dot(y.astype(jnp.bfloat16), w1_ref[...],
                preferred_element_type=jnp.float32) + b1_ref[...]
    y = jnp.maximum(y, 0.0)

    # Dropout(p=0.5) -> identity in eval mode.
    logits = jnp.dot(y.astype(jnp.bfloat16), w2_ref[...],
                     preferred_element_type=jnp.float32) + b2_ref[...]

    # LogSoftmax over the class dim; padded lanes carry -1e30 -> exp == 0.
    m = jnp.max(logits, axis=1, keepdims=True)
    lse = jnp.log(jnp.sum(jnp.exp(logits - m), axis=1, keepdims=True)) + m
    out_ref[...] = logits - lse


def init_params(key, classes):
    """Deterministic init matching PyTorch default init ranges (f32 master copy)."""
    ks = jax.random.split(key, 8)
    k_lstm = 1.0 / jnp.sqrt(jnp.float32(HIDDEN))
    k_fc1 = 1.0 / jnp.sqrt(jnp.float32(HIDDEN))
    k_fc2 = 1.0 / jnp.sqrt(jnp.float32(FC1))

    u = lambda k, shape, b: jax.random.uniform(k, shape, jnp.float32, -b, b)

    return dict(
        # LSTM weights stored transposed relative to PyTorch (for x @ W).
        w_ih_t=u(ks[0], (INPUT, 4 * HIDDEN), k_lstm),
        w_hh_t=u(ks[1], (HIDDEN, 4 * HIDDEN), k_lstm),
        b_lstm=(u(ks[2], (1, 4 * HIDDEN), k_lstm)
                + u(ks[3], (1, 4 * HIDDEN), k_lstm)),       # b_ih + b_hh
        bn_gamma=jnp.ones((1, HIDDEN), jnp.float32),
        bn_beta=jnp.zeros((1, HIDDEN), jnp.float32),
        bn_mean=jnp.zeros((1, HIDDEN), jnp.float32),
        bn_var=jnp.ones((1, HIDDEN), jnp.float32),
        fc1_w_t=u(ks[4], (HIDDEN, FC1), k_fc1),
        fc1_b=u(ks[5], (1, FC1), k_fc1),
        fc2_w_t=u(ks[6], (FC1, classes), k_fc2),
        fc2_b=u(ks[7], (1, classes), k_fc2),
    )


@functools.partial(jax.jit, static_argnames=("classes",))
def rnn_forward(x, params, classes):
    # x: [B, 1, 28, 28] (NCHW) or anything reshapeable to (-1, 28, 28)
    x = x.reshape(-1, T, INPUT).astype(jnp.float32)
    B = x.shape[0]

    # Batch tiling (real grid): pad B to a multiple of the tile.
    b_tile = min(128, _round_up(B, 8))
    Bp = _round_up(B, b_tile)
    if Bp != B:
        x = jnp.pad(x, ((0, Bp - B), (0, 0), (0, 0)))
    xt = jnp.transpose(x, (1, 0, 2))                 # (T, Bp, 28) time-major

    # Lane-dense padded class dimension (multiple of 128 lanes).
    cpad = _round_up(max(classes, LANE), LANE)
    w2 = jnp.zeros((FC1, cpad), jnp.float32).at[:, :classes].set(params["fc2_w_t"])
    b2 = jnp.full((1, cpad), -1e30, jnp.float32).at[:, :classes].set(params["fc2_b"])

    # bf16 MXU operands (f32 accumulation inside the kernel).
    wih = params["w_ih_t"].astype(jnp.bfloat16)
    whh = params["w_hh_t"].astype(jnp.bfloat16)
    w1 = params["fc1_w_t"].astype(jnp.bfloat16)
    w2 = w2.astype(jnp.bfloat16)

    args = (
        xt, wih, whh, params["b_lstm"],
        params["bn_gamma"], params["bn_beta"],
        params["bn_mean"], params["bn_var"],
        w1, params["fc1_b"], w2, b2,
    )

    def full_spec(a):
        nd = a.ndim
        return pl.BlockSpec(a.shape, lambda i, _nd=nd: (0,) * _nd)

    in_specs = [pl.BlockSpec((T, b_tile, INPUT), lambda i: (0, i, 0))]
    in_specs += [full_spec(a) for a in args[1:]]
    out_spec = pl.BlockSpec((b_tile, cpad), lambda i: (i, 0))

    out = pl.pallas_call(
        rnn_kernel,
        out_shape=jax.ShapeDtypeStruct((Bp, cpad), jnp.float32),
        grid_spec=pltpu.PrefetchScalarGridSpec(
            num_scalar_prefetch=0,
            grid=(Bp // b_tile,),
            in_specs=in_specs,
            out_specs=out_spec,
            scratch_shapes=[pltpu.VMEM((T * b_tile, 4 * HIDDEN), jnp.float32)],
        ),
        compiler_params=pltpu.CompilerParams(
            dimension_semantics=("parallel",)),
    )(*args)

    return out[:B, :classes]


if __name__ == "__main__":
    classes = 10
    key = jax.random.PRNGKey(0)
    k_params, k_x = jax.random.split(key)

    params = init_params(k_params, classes)
    x = jax.random.normal(k_x, (2, 1, 28, 28), jnp.float32)  # NCHW MNIST-like

    out = rnn_forward(x, params, classes)
    out = jax.block_until_ready(out)

    assert out.shape == (2, classes)
    # log-softmax rows should (approximately) exponentiate-sum to 1
    assert jnp.allclose(jnp.sum(jnp.exp(out), axis=1), 1.0, atol=1e-3)
    print("KERNEL_OK")
</pallas_src>

<mosaic_0001>
module attributes {stable_mosaic.version = 11 : i64} {
  func.func @rnn_kernel(%arg0: i32, %arg1: memref<28x8x28xf32, #tpu.memory_space<vmem>>, %arg2: memref<28x256xbf16, #tpu.memory_space<vmem>>, %arg3: memref<64x256xbf16, #tpu.memory_space<vmem>>, %arg4: memref<1x256xf32, #tpu.memory_space<vmem>>, %arg5: memref<1x64xf32, #tpu.memory_space<vmem>>, %arg6: memref<1x64xf32, #tpu.memory_space<vmem>>, %arg7: memref<1x64xf32, #tpu.memory_space<vmem>>, %arg8: memref<1x64xf32, #tpu.memory_space<vmem>>, %arg9: memref<64x32xbf16, #tpu.memory_space<vmem>>, %arg10: memref<1x32xf32, #tpu.memory_space<vmem>>, %arg11: memref<32x128xbf16, #tpu.memory_space<vmem>>, %arg12: memref<1x128xf32, #tpu.memory_space<vmem>>, %arg13: memref<8x128xf32, #tpu.memory_space<vmem>>, %arg14: memref<224x256xf32, #tpu.memory_space<vmem>>) attributes {dimension_semantics = [#tpu.dimension_semantics<parallel>], iteration_bounds = array<i64: 1>, scalar_prefetch = 0 : i64, scratch_operands = 1 : i64, tpu.core_type = #tpu.core_type<tc>, window_params = [{transform_indices = @transform_0, window_bounds = array<i64: 28, 8, 28>}, {pipeline_mode = #tpu.pipeline_mode<synchronous>, transform_indices = @transform_1, window_bounds = array<i64: 28, 256>}, {pipeline_mode = #tpu.pipeline_mode<synchronous>, transform_indices = @transform_2, window_bounds = array<i64: 64, 256>}, {pipeline_mode = #tpu.pipeline_mode<synchronous>, transform_indices = @transform_3, window_bounds = array<i64: 1, 256>}, {pipeline_mode = #tpu.pipeline_mode<synchronous>, transform_indices = @transform_4, window_bounds = array<i64: 1, 64>}, {pipeline_mode = #tpu.pipeline_mode<synchronous>, transform_indices = @transform_5, window_bounds = array<i64: 1, 64>}, {pipeline_mode = #tpu.pipeline_mode<synchronous>, transform_indices = @transform_6, window_bounds = array<i64: 1, 64>}, {pipeline_mode = #tpu.pipeline_mode<synchronous>, transform_indices = @transform_7, window_bounds = array<i64: 1, 64>}, {pipeline_mode = #tpu.pipeline_mode<synchronous>, transform_indices = @transform_8, window_bounds = array<i64: 64, 32>}, {pipeline_mode = #tpu.pipeline_mode<synchronous>, transform_indices = @transform_9, window_bounds = array<i64: 1, 32>}, {pipeline_mode = #tpu.pipeline_mode<synchronous>, transform_indices = @transform_10, window_bounds = array<i64: 32, 128>}, {pipeline_mode = #tpu.pipeline_mode<synchronous>, transform_indices = @transform_11, window_bounds = array<i64: 1, 128>}, {transform_indices = @transform_12, window_bounds = array<i64: 8, 128>}]} {
    %c0 = arith.constant 0 : index
    %c0_0 = arith.constant 0 : index
    %0 = vector.load %arg2[%c0, %c0_0] : memref<28x256xbf16, #tpu.memory_space<vmem>>, vector<28x256xbf16>
    %c0_1 = arith.constant 0 : index
    %c0_2 = arith.constant 0 : index
    %1 = vector.load %arg3[%c0_1, %c0_2] : memref<64x256xbf16, #tpu.memory_space<vmem>>, vector<64x256xbf16>
    %c0_3 = arith.constant 0 : index
    %c0_4 = arith.constant 0 : index
    %c0_5 = arith.constant 0 : index
    %2 = vector.load %arg1[%c0_3, %c0_4, %c0_5] : memref<28x8x28xf32, #tpu.memory_space<vmem>>, vector<28x8x28xf32>
    %3 = vector.shape_cast %2 : vector<28x8x28xf32> to vector<224x28xf32>
    %4 = arith.truncf %3 : vector<224x28xf32> to vector<224x28xbf16>
    %cst = arith.constant dense<0.000000e+00> : vector<224x256xf32>
    %5 = tpu.matmul %4, %0, %cst {dimension_numbers = #tpu.dot_dimension_numbers<[1], [0], [0], [1], [0, 0, 1, 1], [], []>} : vector<224x28xbf16>, vector<28x256xbf16>, vector<224x256xf32> -> vector<224x256xf32>
    %c0_6 = arith.constant 0 : index
    %c0_7 = arith.constant 0 : index
    %6 = vector.load %arg4[%c0_6, %c0_7] : memref<1x256xf32, #tpu.memory_space<vmem>>, vector<1x256xf32>
    %7 = vector.broadcast %6 : vector<1x256xf32> to vector<224x256xf32>
    %8 = arith.addf %5, %7 : vector<224x256xf32>
    %c0_8 = arith.constant 0 : index
    %c0_9 = arith.constant 0 : index
    %9 = vector.load %arg14[%c0_8, %c0_9] : memref<224x256xf32, #tpu.memory_space<vmem>>, vector<224x256xf32>
    tpu.vector_store %arg14[%c0_8, %c0_9], %8 {strides = array<i32>} : memref<224x256xf32, #tpu.memory_space<vmem>>, vector<224x256xf32>,
    %cst_10 = arith.constant 0.000000e+00 : f32
    %10 = vector.broadcast %cst_10 : f32 to vector<8x64xf32>
    %cst_11 = arith.constant 0.000000e+00 : f32
    %11 = vector.broadcast %cst_11 : f32 to vector<8x64xf32>
    %c0_12 = arith.constant 0 : index
    %c0_13 = arith.constant 0 : index
    %12 = vector.load %arg14[%c0_12, %c0_13] : memref<224x256xf32, #tpu.memory_space<vmem>>, vector<8x256xf32>
    %13 = arith.truncf %10 : vector<8x64xf32> to vector<8x64xbf16>
    %cst_14 = arith.constant dense<0.000000e+00> : vector<8x256xf32>
    %14 = tpu.matmul %13, %1, %cst_14 {dimension_numbers = #tpu.dot_dimension_numbers<[1], [0], [0], [1], [0, 0, 1, 1], [], []>} : vector<8x64xbf16>, vector<64x256xbf16>, vector<8x256xf32> -> vector<8x256xf32>
    %15 = arith.addf %12, %14 : vector<8x256xf32>
    %16 = vector.extract_strided_slice %15 {offsets = [0, 0], sizes = [8, 64], strides = [1, 1]} : vector<8x256xf32> to vector<8x64xf32>
    %17 = arith.negf %16 : vector<8x64xf32>
    %18 = math.exp %17 : vector<8x64xf32>
    %cst_15 = arith.constant 1.000000e+00 : f32
    %19 = vector.broadcast %cst_15 : f32 to vector<8x64xf32>
    %20 = arith.addf %19, %18 : vector<8x64xf32>
    %21 = arith.divf %19, %20 : vector<8x64xf32>
    %22 = vector.extract_strided_slice %15 {offsets = [0, 64], sizes = [8, 64], strides = [1, 1]} : vector<8x256xf32> to vector<8x64xf32>
    %23 = arith.negf %22 : vector<8x64xf32>
    %24 = math.exp %23 : vector<8x64xf32>
    %cst_16 = arith.constant 1.000000e+00 : f32
    %25 = vector.broadcast %cst_16 : f32 to vector<8x64xf32>
    %26 = arith.addf %25, %24 : vector<8x64xf32>
    %27 = arith.divf %25, %26 : vector<8x64xf32>
    %28 = vector.extract_strided_slice %15 {offsets = [0, 128], sizes = [8, 64], strides = [1, 1]} : vector<8x256xf32> to vector<8x64xf32>
    %29 = math.tanh %28 : vector<8x64xf32>
    %30 = vector.extract_strided_slice %15 {offsets = [0, 192], sizes = [8, 64], strides = [1, 1]} : vector<8x256xf32> to vector<8x64xf32>
    %31 = arith.negf %30 : vector<8x64xf32>
    %32 = math.exp %31 : vector<8x64xf32>
    %cst_17 = arith.constant 1.000000e+00 : f32
    %33 = vector.broadcast %cst_17 : f32 to vector<8x64xf32>
    %34 = arith.addf %33, %32 : vector<8x64xf32>
    %35 = arith.divf %33, %34 : vector<8x64xf32>
    %36 = arith.mulf %27, %11 : vector<8x64xf32>
    %37 = arith.mulf %21, %29 : vector<8x64xf32>
    %38 = arith.addf %36, %37 : vector<8x64xf32>
    %39 = math.tanh %38 : vector<8x64xf32>
    %40 = arith.mulf %35, %39 : vector<8x64xf32>
    %c8 = arith.constant 8 : index
    %c0_18 = arith.constant 0 : index
    %41 = vector.load %arg14[%c8, %c0_18] : memref<224x256xf32, #tpu.memory_space<vmem>>, vector<8x256xf32>
    %42 = arith.truncf %40 : vector<8x64xf32> to vector<8x64xbf16>
    %cst_19 = arith.constant dense<0.000000e+00> : vector<8x256xf32>
    %43 = tpu.matmul %42, %1, %cst_19 {dimension_numbers = #tpu.dot_dimension_numbers<[1], [0], [0], [1], [0, 0, 1, 1], [], []>} : vector<8x64xbf16>, vector<64x256xbf16>, vector<8x256xf32> -> vector<8x256xf32>
    %44 = arith.addf %41, %43 : vector<8x256xf32>
    %45 = vector.extract_strided_slice %44 {offsets = [0, 0], sizes = [8, 64], strides = [1, 1]} : vector<8x256xf32> to vector<8x64xf32>
    %46 = arith.negf %45 : vector<8x64xf32>
    %47 = math.exp %46 : vector<8x64xf32>
    %cst_20 = arith.constant 1.000000e+00 : f32
    %48 = vector.broadcast %cst_20 : f32 to vector<8x64xf32>
    %49 = arith.addf %48, %47 : vector<8x64xf32>
    %50 = arith.divf %48, %49 : vector<8x64xf32>
    %51 = vector.extract_strided_slice %44 {offsets = [0, 64], sizes = [8, 64], strides = [1, 1]} : vector<8x256xf32> to vector<8x64xf32>
    %52 = arith.negf %51 : vector<8x64xf32>
    %53 = math.exp %52 : vector<8x64xf32>
    %cst_21 = arith.constant 1.000000e+00 : f32
    %54 = vector.broadcast %cst_21 : f32 to vector<8x64xf32>
    %55 = arith.addf %54, %53 : vector<8x64xf32>
    %56 = arith.divf %54, %55 : vector<8x64xf32>
    %57 = vector.extract_strided_slice %44 {offsets = [0, 128], sizes = [8, 64], strides = [1, 1]} : vector<8x256xf32> to vector<8x64xf32>
    %58 = math.tanh %57 : vector<8x64xf32>
    %59 = vector.extract_strided_slice %44 {offsets = [0, 192], sizes = [8, 64], strides = [1, 1]} : vector<8x256xf32> to vector<8x64xf32>
    %60 = arith.negf %59 : vector<8x64xf32>
    %61 = math.exp %60 : vector<8x64xf32>
    %cst_22 = arith.constant 1.000000e+00 : f32
    %62 = vector.broadcast %cst_22 : f32 to vector<8x64xf32>
    %63 = arith.addf %62, %61 : vector<8x64xf32>
    %64 = arith.divf %62, %63 : vector<8x64xf32>
    %65 = arith.mulf %56, %38 : vector<8x64xf32>
    %66 = arith.mulf %50, %58 : vector<8x64xf32>
    %67 = arith.addf %65, %66 : vector<8x64xf32>
    %68 = math.tanh %67 : vector<8x64xf32>
    %69 = arith.mulf %64, %68 : vector<8x64xf32>
    %c16 = arith.constant 16 : index
    %c0_23 = arith.constant 0 : index
    %70 = vector.load %arg14[%c16, %c0_23] : memref<224x256xf32, #tpu.memory_space<vmem>>, vector<8x256xf32>
    %71 = arith.truncf %69 : vector<8x64xf32> to vector<8x64xbf16>
    %cst_24 = arith.constant dense<0.000000e+00> : vector<8x256xf32>
    %72 = tpu.matmul %71, %1, %cst_24 {dimension_numbers = #tpu.dot_dimension_numbers<[1], [0], [0], [1], [0, 0, 1, 1], [], []>} : vector<8x64xbf16>, vector<64x256xbf16>, vector<8x256xf32> -> vector<8x256xf32>
    %73 = arith.addf %70, %72 : vector<8x256xf32>
    %74 = vector.extract_strided_slice %73 {offsets = [0, 0], sizes = [8, 64], strides = [1, 1]} : vector<8x256xf32> to vector<8x64xf32>
    %75 = arith.negf %74 : vector<8x64xf32>
    %76 = math.exp %75 : vector<8x64xf32>
    %cst_25 = arith.constant 1.000000e+00 : f32
    %77 = vector.broadcast %cst_25 : f32 to vector<8x64xf32>
    %78 = arith.addf %77, %76 : vector<8x64xf32>
    %79 = arith.divf %77, %78 : vector<8x64xf32>
    %80 = vector.extract_strided_slice %73 {offsets = [0, 64], sizes = [8, 64], strides = [1, 1]} : vector<8x256xf32> to vector<8x64xf32>
    %81 = arith.negf %80 : vector<8x64xf32>
    %82 = math.exp %81 : vector<8x64xf32>
    %cst_26 = arith.constant 1.000000e+00 : f32
    %83 = vector.broadcast %cst_26 : f32 to vector<8x64xf32>
    %84 = arith.addf %83, %82 : vector<8x64xf32>
    %85 = arith.divf %83, %84 : vector<8x64xf32>
    %86 = vector.extract_strided_slice %73 {offsets = [0, 128], sizes = [8, 64], strides = [1, 1]} : vector<8x256xf32> to vector<8x64xf32>
    %87 = math.tanh %86 : vector<8x64xf32>
    %88 = vector.extract_strided_slice %73 {offsets = [0, 192], sizes = [8, 64], strides = [1, 1]} : vector<8x256xf32> to vector<8x64xf32>
    %89 = arith.negf %88 : vector<8x64xf32>
    %90 = math.exp %89 : vector<8x64xf32>
    %cst_27 = arith.constant 1.000000e+00 : f32
    %91 = vector.broadcast %cst_27 : f32 to vector<8x64xf32>
    %92 = arith.addf %91, %90 : vector<8x64xf32>
    %93 = arith.divf %91, %92 : vector<8x64xf32>
    %94 = arith.mulf %85, %67 : vector<8x64xf32>
    %95 = arith.mulf %79, %87 : vector<8x64xf32>
    %96 = arith.addf %94, %95 : vector<8x64xf32>
    %97 = math.tanh %96 : vector<8x64xf32>
    %98 = arith.mulf %93, %97 : vector<8x64xf32>
    %c24 = arith.constant 24 : index
    %c0_28 = arith.constant 0 : index
    %99 = vector.load %arg14[%c24, %c0_28] : memref<224x256xf32, #tpu.memory_space<vmem>>, vector<8x256xf32>
    %100 = arith.truncf %98 : vector<8x64xf32> to vector<8x64xbf16>
    %cst_29 = arith.constant dense<0.000000e+00> : vector<8x256xf32>
    %101 = tpu.matmul %100, %1, %cst_29 {dimension_numbers = #tpu.dot_dimension_numbers<[1], [0], [0], [1], [0, 0, 1, 1], [], []>} : vector<8x64xbf16>, vector<64x256xbf16>, vector<8x256xf32> -> vector<8x256xf32>
    %102 = arith.addf %99, %101 : vector<8x256xf32>
    %103 = vector.extract_strided_slice %102 {offsets = [0, 0], sizes = [8, 64], strides = [1, 1]} : vector<8x256xf32> to vector<8x64xf32>
    %104 = arith.negf %103 : vector<8x64xf32>
    %105 = math.exp %104 : vector<8x64xf32>
    %cst_30 = arith.constant 1.000000e+00 : f32
    %106 = vector.broadcast %cst_30 : f32 to vector<8x64xf32>
    %107 = arith.addf %106, %105 : vector<8x64xf32>
    %108 = arith.divf %106, %107 : vector<8x64xf32>
    %109 = vector.extract_strided_slice %102 {offsets = [0, 64], sizes = [8, 64], strides = [1, 1]} : vector<8x256xf32> to vector<8x64xf32>
    %110 = arith.negf %109 : vector<8x64xf32>
    %111 = math.exp %110 : vector<8x64xf32>
    %cst_31 = arith.constant 1.000000e+00 : f32
    %112 = vector.broadcast %cst_31 : f32 to vector<8x64xf32>
    %113 = arith.addf %112, %111 : vector<8x64xf32>
    %114 = arith.divf %112, %113 : vector<8x64xf32>
    %115 = vector.extract_strided_slice %102 {offsets = [0, 128], sizes = [8, 64], strides = [1, 1]} : vector<8x256xf32> to vector<8x64xf32>
    %116 = math.tanh %115 : vector<8x64xf32>
    %117 = vector.extract_strided_slice %102 {offsets = [0, 192], sizes = [8, 64], strides = [1, 1]} : vector<8x256xf32> to vector<8x64xf32>
    %118 = arith.negf %117 : vector<8x64xf32>
    %119 = math.exp %118 : vector<8x64xf32>
    %cst_32 = arith.constant 1.000000e+00 : f32
    %120 = vector.broadcast %cst_32 : f32 to vector<8x64xf32>
    %121 = arith.addf %120, %119 : vector<8x64xf32>
    %122 = arith.divf %120, %121 : vector<8x64xf32>
    %123 = arith.mulf %114, %96 : vector<8x64xf32>
    %124 = arith.mulf %108, %116 : vector<8x64xf32>
    %125 = arith.addf %123, %124 : vector<8x64xf32>
    %126 = math.tanh %125 : vector<8x64xf32>
    %127 = arith.mulf %122, %126 : vector<8x64xf32>
    %c32 = arith.constant 32 : index
    %c0_33 = arith.constant 0 : index
    %128 = vector.load %arg14[%c32, %c0_33] : memref<224x256xf32, #tpu.memory_space<vmem>>, vector<8x256xf32>
    %129 = arith.truncf %127 : vector<8x64xf32> to vector<8x64xbf16>
    %cst_34 = arith.constant dense<0.000000e+00> : vector<8x256xf32>
    %130 = tpu.matmul %129, %1, %cst_34 {dimension_numbers = #tpu.dot_dimension_numbers<[1], [0], [0], [1], [0, 0, 1, 1], [], []>} : vector<8x64xbf16>, vector<64x256xbf16>, vector<8x256xf32> -> vector<8x256xf32>
    %131 = arith.addf %128, %130 : vector<8x256xf32>
    %132 = vector.extract_strided_slice %131 {offsets = [0, 0], sizes = [8, 64], strides = [1, 1]} : vector<8x256xf32> to vector<8x64xf32>
    %133 = arith.negf %132 : vector<8x64xf32>
    %134 = math.exp %133 : vector<8x64xf32>
    %cst_35 = arith.constant 1.000000e+00 : f32
    %135 = vector.broadcast %cst_35 : f32 to vector<8x64xf32>
    %136 = arith.addf %135, %134 : vector<8x64xf32>
    %137 = arith.divf %135, %136 : vector<8x64xf32>
    %138 = vector.extract_strided_slice %131 {offsets = [0, 64], sizes = [8, 64], strides = [1, 1]} : vector<8x256xf32> to vector<8x64xf32>
    %139 = arith.negf %138 : vector<8x64xf32>
    %140 = math.exp %139 : vector<8x64xf32>
    %cst_36 = arith.constant 1.000000e+00 : f32
    %141 = vector.broadcast %cst_36 : f32 to vector<8x64xf32>
    %142 = arith.addf %141, %140 : vector<8x64xf32>
    %143 = arith.divf %141, %142 : vector<8x64xf32>
    %144 = vector.extract_strided_slice %131 {offsets = [0, 128], sizes = [8, 64], strides = [1, 1]} : vector<8x256xf32> to vector<8x64xf32>
    %145 = math.tanh %144 : vector<8x64xf32>
    %146 = vector.extract_strided_slice %131 {offsets = [0, 192], sizes = [8, 64], strides = [1, 1]} : vector<8x256xf32> to vector<8x64xf32>
    %147 = arith.negf %146 : vector<8x64xf32>
    %148 = math.exp %147 : vector<8x64xf32>
    %cst_37 = arith.constant 1.000000e+00 : f32
    %149 = vector.broadcast %cst_37 : f32 to vector<8x64xf32>
    %150 = arith.addf %149, %148 : vector<8x64xf32>
    %151 = arith.divf %149, %150 : vector<8x64xf32>
    %152 = arith.mulf %143, %125 : vector<8x64xf32>
    %153 = arith.mulf %137, %145 : vector<8x64xf32>
    %154 = arith.addf %152, %153 : vector<8x64xf32>
    %155 = math.tanh %154 : vector<8x64xf32>
    %156 = arith.mulf %151, %155 : vector<8x64xf32>
    %c40 = arith.constant 40 : index
    %c0_38 = arith.constant 0 : index
    %157 = vector.load %arg14[%c40, %c0_38] : memref<224x256xf32, #tpu.memory_space<vmem>>, vector<8x256xf32>
    %158 = arith.truncf %156 : vector<8x64xf32> to vector<8x64xbf16>
    %cst_39 = arith.constant dense<0.000000e+00> : vector<8x256xf32>
    %159 = tpu.matmul %158, %1, %cst_39 {dimension_numbers = #tpu.dot_dimension_numbers<[1], [0], [0], [1], [0, 0, 1, 1], [], []>} : vector<8x64xbf16>, vector<64x256xbf16>, vector<8x256xf32> -> vector<8x256xf32>
    %160 = arith.addf %157, %159 : vector<8x256xf32>
    %161 = vector.extract_strided_slice %160 {offsets = [0, 0], sizes = [8, 64], strides = [1, 1]} : vector<8x256xf32> to vector<8x64xf32>
    %162 = arith.negf %161 : vector<8x64xf32>
    %163 = math.exp %162 : vector<8x64xf32>
    %cst_40 = arith.constant 1.000000e+00 : f32
    %164 = vector.broadcast %cst_40 : f32 to vector<8x64xf32>
    %165 = arith.addf %164, %163 : vector<8x64xf32>
    %166 = arith.divf %164, %165 : vector<8x64xf32>
    %167 = vector.extract_strided_slice %160 {offsets = [0, 64], sizes = [8, 64], strides = [1, 1]} : vector<8x256xf32> to vector<8x64xf32>
    %168 = arith.negf %167 : vector<8x64xf32>
    %169 = math.exp %168 : vector<8x64xf32>
    %cst_41 = arith.constant 1.000000e+00 : f32
    %170 = vector.broadcast %cst_41 : f32 to vector<8x64xf32>
    %171 = arith.addf %170, %169 : vector<8x64xf32>
    %172 = arith.divf %170, %171 : vector<8x64xf32>
    %173 = vector.extract_strided_slice %160 {offsets = [0, 128], sizes = [8, 64], strides = [1, 1]} : vector<8x256xf32> to vector<8x64xf32>
    %174 = math.tanh %173 : vector<8x64xf32>
    %175 = vector.extract_strided_slice %160 {offsets = [0, 192], sizes = [8, 64], strides = [1, 1]} : vector<8x256xf32> to vector<8x64xf32>
    %176 = arith.negf %175 : vector<8x64xf32>
    %177 = math.exp %176 : vector<8x64xf32>
    %cst_42 = arith.constant 1.000000e+00 : f32
    %178 = vector.broadcast %cst_42 : f32 to vector<8x64xf32>
    %179 = arith.addf %178, %177 : vector<8x64xf32>
    %180 = arith.divf %178, %179 : vector<8x64xf32>
    %181 = arith.mulf %172, %154 : vector<8x64xf32>
    %182 = arith.mulf %166, %174 : vector<8x64xf32>
    %183 = arith.addf %181, %182 : vector<8x64xf32>
    %184 = math.tanh %183 : vector<8x64xf32>
    %185 = arith.mulf %180, %184 : vector<8x64xf32>
    %c48 = arith.constant 48 : index
    %c0_43 = arith.constant 0 : index
    %186 = vector.load %arg14[%c48, %c0_43] : memref<224x256xf32, #tpu.memory_space<vmem>>, vector<8x256xf32>
    %187 = arith.truncf %185 : vector<8x64xf32> to vector<8x64xbf16>
    %cst_44 = arith.constant dense<0.000000e+00> : vector<8x256xf32>
    %188 = tpu.matmul %187, %1, %cst_44 {dimension_numbers = #tpu.dot_dimension_numbers<[1], [0], [0], [1], [0, 0, 1, 1], [], []>} : vector<8x64xbf16>, vector<64x256xbf16>, vector<8x256xf32> -> vector<8x256xf32>
    %189 = arith.addf %186, %188 : vector<8x256xf32>
    %190 = vector.extract_strided_slice %189 {offsets = [0, 0], sizes = [8, 64], strides = [1, 1]} : vector<8x256xf32> to vector<8x64xf32>
    %191 = arith.negf %190 : vector<8x64xf32>
    %192 = math.exp %191 : vector<8x64xf32>
    %cst_45 = arith.constant 1.000000e+00 : f32
    %193 = vector.broadcast %cst_45 : f32 to vector<8x64xf32>
    %194 = arith.addf %193, %192 : vector<8x64xf32>
    %195 = arith.divf %193, %194 : vector<8x64xf32>
    %196 = vector.extract_strided_slice %189 {offsets = [0, 64], sizes = [8, 64], strides = [1, 1]} : vector<8x256xf32> to vector<8x64xf32>
    %197 = arith.negf %196 : vector<8x64xf32>
    %198 = math.exp %197 : vector<8x64xf32>
    %cst_46 = arith.constant 1.000000e+00 : f32
    %199 = vector.broadcast %cst_46 : f32 to vector<8x64xf32>
    %200 = arith.addf %199, %198 : vector<8x64xf32>
    %201 = arith.divf %199, %200 : vector<8x64xf32>
    %202 = vector.extract_strided_slice %189 {offsets = [0, 128], sizes = [8, 64], strides = [1, 1]} : vector<8x256xf32> to vector<8x64xf32>
    %203 = math.tanh %202 : vector<8x64xf32>
    %204 = vector.extract_strided_slice %189 {offsets = [0, 192], sizes = [8, 64], strides = [1, 1]} : vector<8x256xf32> to vector<8x64xf32>
    %205 = arith.negf %204 : vector<8x64xf32>
    %206 = math.exp %205 : vector<8x64xf32>
    %cst_47 = arith.constant 1.000000e+00 : f32
    %207 = vector.broadcast %cst_47 : f32 to vector<8x64xf32>
    %208 = arith.addf %207, %206 : vector<8x64xf32>
    %209 = arith.divf %207, %208 : vector<8x64xf32>
    %210 = arith.mulf %201, %183 : vector<8x64xf32>
    %211 = arith.mulf %195, %203 : vector<8x64xf32>
    %212 = arith.addf %210, %211 : vector<8x64xf32>
    %213 = math.tanh %212 : vector<8x64xf32>
    %214 = arith.mulf %209, %213 : vector<8x64xf32>
    %c56 = arith.constant 56 : index
    %c0_48 = arith.constant 0 : index
    %215 = vector.load %arg14[%c56, %c0_48] : memref<224x256xf32, #tpu.memory_space<vmem>>, vector<8x256xf32>
    %216 = arith.truncf %214 : vector<8x64xf32> to vector<8x64xbf16>
    %cst_49 = arith.constant dense<0.000000e+00> : vector<8x256xf32>
    %217 = tpu.matmul %216, %1, %cst_49 {dimension_numbers = #tpu.dot_dimension_numbers<[1], [0], [0], [1], [0, 0, 1, 1], [], []>} : vector<8x64xbf16>, vector<64x256xbf16>, vector<8x256xf32> -> vector<8x256xf32>
    %218 = arith.addf %215, %217 : vector<8x256xf32>
    %219 = vector.extract_strided_slice %218 {offsets = [0, 0], sizes = [8, 64], strides = [1, 1]} : vector<8x256xf32> to vector<8x64xf32>
    %220 = arith.negf %219 : vector<8x64xf32>
    %221 = math.exp %220 : vector<8x64xf32>
    %cst_50 = arith.constant 1.000000e+00 : f32
    %222 = vector.broadcast %cst_50 : f32 to vector<8x64xf32>
    %223 = arith.addf %222, %221 : vector<8x64xf32>
    %224 = arith.divf %222, %223 : vector<8x64xf32>
    %225 = vector.extract_strided_slice %218 {offsets = [0, 64], sizes = [8, 64], strides = [1, 1]} : vector<8x256xf32> to vector<8x64xf32>
    %226 = arith.negf %225 : vector<8x64xf32>
    %227 = math.exp %226 : vector<8x64xf32>
    %cst_51 = arith.constant 1.000000e+00 : f32
    %228 = vector.broadcast %cst_51 : f32 to vector<8x64xf32>
    %229 = arith.addf %228, %227 : vector<8x64xf32>
    %230 = arith.divf %228, %229 : vector<8x64xf32>
    %231 = vector.extract_strided_slice %218 {offsets = [0, 128], sizes = [8, 64], strides = [1, 1]} : vector<8x256xf32> to vector<8x64xf32>
    %232 = math.tanh %231 : vector<8x64xf32>
    %233 = vector.extract_strided_slice %218 {offsets = [0, 192], sizes = [8, 64], strides = [1, 1]} : vector<8x256xf32> to vector<8x64xf32>
    %234 = arith.negf %233 : vector<8x64xf32>
    %235 = math.exp %234 : vector<8x64xf32>
    %cst_52 = arith.constant 1.000000e+00 : f32
    %236 = vector.broadcast %cst_52 : f32 to vector<8x64xf32>
    %237 = arith.addf %236, %235 : vector<8x64xf32>
    %238 = arith.divf %236, %237 : vector<8x64xf32>
    %239 = arith.mulf %230, %212 : vector<8x64xf32>
    %240 = arith.mulf %224, %232 : vector<8x64xf32>
    %241 = arith.addf %239, %240 : vector<8x64xf32>
    %242 = math.tanh %241 : vector<8x64xf32>
    %243 = arith.mulf %238, %242 : vector<8x64xf32>
    %c64 = arith.constant 64 : index
    %c0_53 = arith.constant 0 : index
    %244 = vector.load %arg14[%c64, %c0_53] : memref<224x256xf32, #tpu.memory_space<vmem>>, vector<8x256xf32>
    %245 = arith.truncf %243 : vector<8x64xf32> to vector<8x64xbf16>
    %cst_54 = arith.constant dense<0.000000e+00> : vector<8x256xf32>
    %246 = tpu.matmul %245, %1, %cst_54 {dimension_numbers = #tpu.dot_dimension_numbers<[1], [0], [0], [1], [0, 0, 1, 1], [], []>} : vector<8x64xbf16>, vector<64x256xbf16>, vector<8x256xf32> -> vector<8x256xf32>
    %247 = arith.addf %244, %246 : vector<8x256xf32>
    %248 = vector.extract_strided_slice %247 {offsets = [0, 0], sizes = [8, 64], strides = [1, 1]} : vector<8x256xf32> to vector<8x64xf32>
    %249 = arith.negf %248 : vector<8x64xf32>
    %250 = math.exp %249 : vector<8x64xf32>
    %cst_55 = arith.constant 1.000000e+00 : f32
    %251 = vector.broadcast %cst_55 : f32 to vector<8x64xf32>
    %252 = arith.addf %251, %250 : vector<8x64xf32>
    %253 = arith.divf %251, %252 : vector<8x64xf32>
    %254 = vector.extract_strided_slice %247 {offsets = [0, 64], sizes = [8, 64], strides = [1, 1]} : vector<8x256xf32> to vector<8x64xf32>
    %255 = arith.negf %254 : vector<8x64xf32>
    %256 = math.exp %255 : vector<8x64xf32>
    %cst_56 = arith.constant 1.000000e+00 : f32
    %257 = vector.broadcast %cst_56 : f32 to vector<8x64xf32>
    %258 = arith.addf %257, %256 : vector<8x64xf32>
    %259 = arith.divf %257, %258 : vector<8x64xf32>
    %260 = vector.extract_strided_slice %247 {offsets = [0, 128], sizes = [8, 64], strides = [1, 1]} : vector<8x256xf32> to vector<8x64xf32>
    %261 = math.tanh %260 : vector<8x64xf32>
    %262 = vector.extract_strided_slice %247 {offsets = [0, 192], sizes = [8, 64], strides = [1, 1]} : vector<8x256xf32> to vector<8x64xf32>
    %263 = arith.negf %262 : vector<8x64xf32>
    %264 = math.exp %263 : vector<8x64xf32>
    %cst_57 = arith.constant 1.000000e+00 : f32
    %265 = vector.broadcast %cst_57 : f32 to vector<8x64xf32>
    %266 = arith.addf %265, %264 : vector<8x64xf32>
    %267 = arith.divf %265, %266 : vector<8x64xf32>
    %268 = arith.mulf %259, %241 : vector<8x64xf32>
    %269 = arith.mulf %253, %261 : vector<8x64xf32>
    %270 = arith.addf %268, %269 : vector<8x64xf32>
    %271 = math.tanh %270 : vector<8x64xf32>
    %272 = arith.mulf %267, %271 : vector<8x64xf32>
    %c72 = arith.constant 72 : index
    %c0_58 = arith.constant 0 : index
    %273 = vector.load %arg14[%c72, %c0_58] : memref<224x256xf32, #tpu.memory_space<vmem>>, vector<8x256xf32>
    %274 = arith.truncf %272 : vector<8x64xf32> to vector<8x64xbf16>
    %cst_59 = arith.constant dense<0.000000e+00> : vector<8x256xf32>
    %275 = tpu.matmul %274, %1, %cst_59 {dimension_numbers = #tpu.dot_dimension_numbers<[1], [0], [0], [1], [0, 0, 1, 1], [], []>} : vector<8x64xbf16>, vector<64x256xbf16>, vector<8x256xf32> -> vector<8x256xf32>
    %276 = arith.addf %273, %275 : vector<8x256xf32>
    %277 = vector.extract_strided_slice %276 {offsets = [0, 0], sizes = [8, 64], strides = [1, 1]} : vector<8x256xf32> to vector<8x64xf32>
    %278 = arith.negf %277 : vector<8x64xf32>
    %279 = math.exp %278 : vector<8x64xf32>
    %cst_60 = arith.constant 1.000000e+00 : f32
    %280 = vector.broadcast %cst_60 : f32 to vector<8x64xf32>
    %281 = arith.addf %280, %279 : vector<8x64xf32>
    %282 = arith.divf %280, %281 : vector<8x64xf32>
    %283 = vector.extract_strided_slice %276 {offsets = [0, 64], sizes = [8, 64], strides = [1, 1]} : vector<8x256xf32> to vector<8x64xf32>
    %284 = arith.negf %283 : vector<8x64xf32>
    %285 = math.exp %284 : vector<8x64xf32>
    %cst_61 = arith.constant 1.000000e+00 : f32
    %286 = vector.broadcast %cst_61 : f32 to vector<8x64xf32>
    %287 = arith.addf %286, %285 : vector<8x64xf32>
    %288 = arith.divf %286, %287 : vector<8x64xf32>
    %289 = vector.extract_strided_slice %276 {offsets = [0, 128], sizes = [8, 64], strides = [1, 1]} : vector<8x256xf32> to vector<8x64xf32>
    %290 = math.tanh %289 : vector<8x64xf32>
    %291 = vector.extract_strided_slice %276 {offsets = [0, 192], sizes = [8, 64], strides = [1, 1]} : vector<8x256xf32> to vector<8x64xf32>
    %292 = arith.negf %291 : vector<8x64xf32>
    %293 = math.exp %292 : vector<8x64xf32>
    %cst_62 = arith.constant 1.000000e+00 : f32
    %294 = vector.broadcast %cst_62 : f32 to vector<8x64xf32>
    %295 = arith.addf %294, %293 : vector<8x64xf32>
    %296 = arith.divf %294, %295 : vector<8x64xf32>
    %297 = arith.mulf %288, %270 : vector<8x64xf32>
    %298 = arith.mulf %282, %290 : vector<8x64xf32>
    %299 = arith.addf %297, %298 : vector<8x64xf32>
    %300 = math.tanh %299 : vector<8x64xf32>
    %301 = arith.mulf %296, %300 : vector<8x64xf32>
    %c80 = arith.constant 80 : index
    %c0_63 = arith.constant 0 : index
    %302 = vector.load %arg14[%c80, %c0_63] : memref<224x256xf32, #tpu.memory_space<vmem>>, vector<8x256xf32>
    %303 = arith.truncf %301 : vector<8x64xf32> to vector<8x64xbf16>
    %cst_64 = arith.constant dense<0.000000e+00> : vector<8x256xf32>
    %304 = tpu.matmul %303, %1, %cst_64 {dimension_numbers = #tpu.dot_dimension_numbers<[1], [0], [0], [1], [0, 0, 1, 1], [], []>} : vector<8x64xbf16>, vector<64x256xbf16>, vector<8x256xf32> -> vector<8x256xf32>
    %305 = arith.addf %302, %304 : vector<8x256xf32>
    %306 = vector.extract_strided_slice %305 {offsets = [0, 0], sizes = [8, 64], strides = [1, 1]} : vector<8x256xf32> to vector<8x64xf32>
    %307 = arith.negf %306 : vector<8x64xf32>
    %308 = math.exp %307 : vector<8x64xf32>
    %cst_65 = arith.constant 1.000000e+00 : f32
    %309 = vector.broadcast %cst_65 : f32 to vector<8x64xf32>
    %310 = arith.addf %309, %308 : vector<8x64xf32>
    %311 = arith.divf %309, %310 : vector<8x64xf32>
    %312 = vector.extract_strided_slice %305 {offsets = [0, 64], sizes = [8, 64], strides = [1, 1]} : vector<8x256xf32> to vector<8x64xf32>
    %313 = arith.negf %312 : vector<8x64xf32>
    %314 = math.exp %313 : vector<8x64xf32>
    %cst_66 = arith.constant 1.000000e+00 : f32
    %315 = vector.broadcast %cst_66 : f32 to vector<8x64xf32>
    %316 = arith.addf %315, %314 : vector<8x64xf32>
    %317 = arith.divf %315, %316 : vector<8x64xf32>
    %318 = vector.extract_strided_slice %305 {offsets = [0, 128], sizes = [8, 64], strides = [1, 1]} : vector<8x256xf32> to vector<8x64xf32>
    %319 = math.tanh %318 : vector<8x64xf32>
    %320 = vector.extract_strided_slice %305 {offsets = [0, 192], sizes = [8, 64], strides = [1, 1]} : vector<8x256xf32> to vector<8x64xf32>
    %321 = arith.negf %320 : vector<8x64xf32>
    %322 = math.exp %321 : vector<8x64xf32>
    %cst_67 = arith.constant 1.000000e+00 : f32
    %323 = vector.broadcast %cst_67 : f32 to vector<8x64xf32>
    %324 = arith.addf %323, %322 : vector<8x64xf32>
    %325 = arith.divf %323, %324 : vector<8x64xf32>
    %326 = arith.mulf %317, %299 : vector<8x64xf32>
    %327 = arith.mulf %311, %319 : vector<8x64xf32>
    %328 = arith.addf %326, %327 : vector<8x64xf32>
    %329 = math.tanh %328 : vector<8x64xf32>
    %330 = arith.mulf %325, %329 : vector<8x64xf32>
    %c88 = arith.constant 88 : index
    %c0_68 = arith.constant 0 : index
    %331 = vector.load %arg14[%c88, %c0_68] : memref<224x256xf32, #tpu.memory_space<vmem>>, vector<8x256xf32>
    %332 = arith.truncf %330 : vector<8x64xf32> to vector<8x64xbf16>
    %cst_69 = arith.constant dense<0.000000e+00> : vector<8x256xf32>
    %333 = tpu.matmul %332, %1, %cst_69 {dimension_numbers = #tpu.dot_dimension_numbers<[1], [0], [0], [1], [0, 0, 1, 1], [], []>} : vector<8x64xbf16>, vector<64x256xbf16>, vector<8x256xf32> -> vector<8x256xf32>
    %334 = arith.addf %331, %333 : vector<8x256xf32>
    %335 = vector.extract_strided_slice %334 {offsets = [0, 0], sizes = [8, 64], strides = [1, 1]} : vector<8x256xf32> to vector<8x64xf32>
    %336 = arith.negf %335 : vector<8x64xf32>
    %337 = math.exp %336 : vector<8x64xf32>
    %cst_70 = arith.constant 1.000000e+00 : f32
    %338 = vector.broadcast %cst_70 : f32 to vector<8x64xf32>
    %339 = arith.addf %338, %337 : vector<8x64xf32>
    %340 = arith.divf %338, %339 : vector<8x64xf32>
    %341 = vector.extract_strided_slice %334 {offsets = [0, 64], sizes = [8, 64], strides = [1, 1]} : vector<8x256xf32> to vector<8x64xf32>
    %342 = arith.negf %341 : vector<8x64xf32>
    %343 = math.exp %342 : vector<8x64xf32>
    %cst_71 = arith.constant 1.000000e+00 : f32
    %344 = vector.broadcast %cst_71 : f32 to vector<8x64xf32>
    %345 = arith.addf %344, %343 : vector<8x64xf32>
    %346 = arith.divf %344, %345 : vector<8x64xf32>
    %347 = vector.extract_strided_slice %334 {offsets = [0, 128], sizes = [8, 64], strides = [1, 1]} : vector<8x256xf32> to vector<8x64xf32>
    %348 = math.tanh %347 : vector<8x64xf32>
    %349 = vector.extract_strided_slice %334 {offsets = [0, 192], sizes = [8, 64], strides = [1, 1]} : vector<8x256xf32> to vector<8x64xf32>
    %350 = arith.negf %349 : vector<8x64xf32>
    %351 = math.exp %350 : vector<8x64xf32>
    %cst_72 = arith.constant 1.000000e+00 : f32
    %352 = vector.broadcast %cst_72 : f32 to vector<8x64xf32>
    %353 = arith.addf %352, %351 : vector<8x64xf32>
    %354 = arith.divf %352, %353 : vector<8x64xf32>
    %355 = arith.mulf %346, %328 : vector<8x64xf32>
    %356 = arith.mulf %340, %348 : vector<8x64xf32>
    %357 = arith.addf %355, %356 : vector<8x64xf32>
    %358 = math.tanh %357 : vector<8x64xf32>
    %359 = arith.mulf %354, %358 : vector<8x64xf32>
    %c96 = arith.constant 96 : index
    %c0_73 = arith.constant 0 : index
    %360 = vector.load %arg14[%c96, %c0_73] : memref<224x256xf32, #tpu.memory_space<vmem>>, vector<8x256xf32>
    %361 = arith.truncf %359 : vector<8x64xf32> to vector<8x64xbf16>
    %cst_74 = arith.constant dense<0.000000e+00> : vector<8x256xf32>
    %362 = tpu.matmul %361, %1, %cst_74 {dimension_numbers = #tpu.dot_dimension_numbers<[1], [0], [0], [1], [0, 0, 1, 1], [], []>} : vector<8x64xbf16>, vector<64x256xbf16>, vector<8x256xf32> -> vector<8x256xf32>
    %363 = arith.addf %360, %362 : vector<8x256xf32>
    %364 = vector.extract_strided_slice %363 {offsets = [0, 0], sizes = [8, 64], strides = [1, 1]} : vector<8x256xf32> to vector<8x64xf32>
    %365 = arith.negf %364 : vector<8x64xf32>
    %366 = math.exp %365 : vector<8x64xf32>
    %cst_75 = arith.constant 1.000000e+00 : f32
    %367 = vector.broadcast %cst_75 : f32 to vector<8x64xf32>
    %368 = arith.addf %367, %366 : vector<8x64xf32>
    %369 = arith.divf %367, %368 : vector<8x64xf32>
    %370 = vector.extract_strided_slice %363 {offsets = [0, 64], sizes = [8, 64], strides = [1, 1]} : vector<8x256xf32> to vector<8x64xf32>
    %371 = arith.negf %370 : vector<8x64xf32>
    %372 = math.exp %371 : vector<8x64xf32>
    %cst_76 = arith.constant 1.000000e+00 : f32
    %373 = vector.broadcast %cst_76 : f32 to vector<8x64xf32>
    %374 = arith.addf %373, %372 : vector<8x64xf32>
    %375 = arith.divf %373, %374 : vector<8x64xf32>
    %376 = vector.extract_strided_slice %363 {offsets = [0, 128], sizes = [8, 64], strides = [1, 1]} : vector<8x256xf32> to vector<8x64xf32>
    %377 = math.tanh %376 : vector<8x64xf32>
    %378 = vector.extract_strided_slice %363 {offsets = [0, 192], sizes = [8, 64], strides = [1, 1]} : vector<8x256xf32> to vector<8x64xf32>
    %379 = arith.negf %378 : vector<8x64xf32>
    %380 = math.exp %379 : vector<8x64xf32>
    %cst_77 = arith.constant 1.000000e+00 : f32
    %381 = vector.broadcast %cst_77 : f32 to vector<8x64xf32>
    %382 = arith.addf %381, %380 : vector<8x64xf32>
    %383 = arith.divf %381, %382 : vector<8x64xf32>
    %384 = arith.mulf %375, %357 : vector<8x64xf32>
    %385 = arith.mulf %369, %377 : vector<8x64xf32>
    %386 = arith.addf %384, %385 : vector<8x64xf32>
    %387 = math.tanh %386 : vector<8x64xf32>
    %388 = arith.mulf %383, %387 : vector<8x64xf32>
    %c104 = arith.constant 104 : index
    %c0_78 = arith.constant 0 : index
    %389 = vector.load %arg14[%c104, %c0_78] : memref<224x256xf32, #tpu.memory_space<vmem>>, vector<8x256xf32>
    %390 = arith.truncf %388 : vector<8x64xf32> to vector<8x64xbf16>
    %cst_79 = arith.constant dense<0.000000e+00> : vector<8x256xf32>
    %391 = tpu.matmul %390, %1, %cst_79 {dimension_numbers = #tpu.dot_dimension_numbers<[1], [0], [0], [1], [0, 0, 1, 1], [], []>} : vector<8x64xbf16>, vector<64x256xbf16>, vector<8x256xf32> -> vector<8x256xf32>
    %392 = arith.addf %389, %391 : vector<8x256xf32>
    %393 = vector.extract_strided_slice %392 {offsets = [0, 0], sizes = [8, 64], strides = [1, 1]} : vector<8x256xf32> to vector<8x64xf32>
    %394 = arith.negf %393 : vector<8x64xf32>
    %395 = math.exp %394 : vector<8x64xf32>
    %cst_80 = arith.constant 1.000000e+00 : f32
    %396 = vector.broadcast %cst_80 : f32 to vector<8x64xf32>
    %397 = arith.addf %396, %395 : vector<8x64xf32>
    %398 = arith.divf %396, %397 : vector<8x64xf32>
    %399 = vector.extract_strided_slice %392 {offsets = [0, 64], sizes = [8, 64], strides = [1, 1]} : vector<8x256xf32> to vector<8x64xf32>
    %400 = arith.negf %399 : vector<8x64xf32>
    %401 = math.exp %400 : vector<8x64xf32>
    %cst_81 = arith.constant 1.000000e+00 : f32
    %402 = vector.broadcast %cst_81 : f32 to vector<8x64xf32>
    %403 = arith.addf %402, %401 : vector<8x64xf32>
    %404 = arith.divf %402, %403 : vector<8x64xf32>
    %405 = vector.extract_strided_slice %392 {offsets = [0, 128], sizes = [8, 64], strides = [1, 1]} : vector<8x256xf32> to vector<8x64xf32>
    %406 = math.tanh %405 : vector<8x64xf32>
    %407 = vector.extract_strided_slice %392 {offsets = [0, 192], sizes = [8, 64], strides = [1, 1]} : vector<8x256xf32> to vector<8x64xf32>
    %408 = arith.negf %407 : vector<8x64xf32>
    %409 = math.exp %408 : vector<8x64xf32>
    %cst_82 = arith.constant 1.000000e+00 : f32
    %410 = vector.broadcast %cst_82 : f32 to vector<8x64xf32>
    %411 = arith.addf %410, %409 : vector<8x64xf32>
    %412 = arith.divf %410, %411 : vector<8x64xf32>
    %413 = arith.mulf %404, %386 : vector<8x64xf32>
    %414 = arith.mulf %398, %406 : vector<8x64xf32>
    %415 = arith.addf %413, %414 : vector<8x64xf32>
    %416 = math.tanh %415 : vector<8x64xf32>
    %417 = arith.mulf %412, %416 : vector<8x64xf32>
    %c112 = arith.constant 112 : index
    %c0_83 = arith.constant 0 : index
    %418 = vector.load %arg14[%c112, %c0_83] : memref<224x256xf32, #tpu.memory_space<vmem>>, vector<8x256xf32>
    %419 = arith.truncf %417 : vector<8x64xf32> to vector<8x64xbf16>
    %cst_84 = arith.constant dense<0.000000e+00> : vector<8x256xf32>
    %420 = tpu.matmul %419, %1, %cst_84 {dimension_numbers = #tpu.dot_dimension_numbers<[1], [0], [0], [1], [0, 0, 1, 1], [], []>} : vector<8x64xbf16>, vector<64x256xbf16>, vector<8x256xf32> -> vector<8x256xf32>
    %421 = arith.addf %418, %420 : vector<8x256xf32>
    %422 = vector.extract_strided_slice %421 {offsets = [0, 0], sizes = [8, 64], strides = [1, 1]} : vector<8x256xf32> to vector<8x64xf32>
    %423 = arith.negf %422 : vector<8x64xf32>
    %424 = math.exp %423 : vector<8x64xf32>
    %cst_85 = arith.constant 1.000000e+00 : f32
    %425 = vector.broadcast %cst_85 : f32 to vector<8x64xf32>
    %426 = arith.addf %425, %424 : vector<8x64xf32>
    %427 = arith.divf %425, %426 : vector<8x64xf32>
    %428 = vector.extract_strided_slice %421 {offsets = [0, 64], sizes = [8, 64], strides = [1, 1]} : vector<8x256xf32> to vector<8x64xf32>
    %429 = arith.negf %428 : vector<8x64xf32>
    %430 = math.exp %429 : vector<8x64xf32>
    %cst_86 = arith.constant 1.000000e+00 : f32
    %431 = vector.broadcast %cst_86 : f32 to vector<8x64xf32>
    %432 = arith.addf %431, %430 : vector<8x64xf32>
    %433 = arith.divf %431, %432 : vector<8x64xf32>
    %434 = vector.extract_strided_slice %421 {offsets = [0, 128], sizes = [8, 64], strides = [1, 1]} : vector<8x256xf32> to vector<8x64xf32>
    %435 = math.tanh %434 : vector<8x64xf32>
    %436 = vector.extract_strided_slice %421 {offsets = [0, 192], sizes = [8, 64], strides = [1, 1]} : vector<8x256xf32> to vector<8x64xf32>
    %437 = arith.negf %436 : vector<8x64xf32>
    %438 = math.exp %437 : vector<8x64xf32>
    %cst_87 = arith.constant 1.000000e+00 : f32
    %439 = vector.broadcast %cst_87 : f32 to vector<8x64xf32>
    %440 = arith.addf %439, %438 : vector<8x64xf32>
    %441 = arith.divf %439, %440 : vector<8x64xf32>
    %442 = arith.mulf %433, %415 : vector<8x64xf32>
    %443 = arith.mulf %427, %435 : vector<8x64xf32>
    %444 = arith.addf %442, %443 : vector<8x64xf32>
    %445 = math.tanh %444 : vector<8x64xf32>
    %446 = arith.mulf %441, %445 : vector<8x64xf32>
    %c120 = arith.constant 120 : index
    %c0_88 = arith.constant 0 : index
    %447 = vector.load %arg14[%c120, %c0_88] : memref<224x256xf32, #tpu.memory_space<vmem>>, vector<8x256xf32>
    %448 = arith.truncf %446 : vector<8x64xf32> to vector<8x64xbf16>
    %cst_89 = arith.constant dense<0.000000e+00> : vector<8x256xf32>
    %449 = tpu.matmul %448, %1, %cst_89 {dimension_numbers = #tpu.dot_dimension_numbers<[1], [0], [0], [1], [0, 0, 1, 1], [], []>} : vector<8x64xbf16>, vector<64x256xbf16>, vector<8x256xf32> -> vector<8x256xf32>
    %450 = arith.addf %447, %449 : vector<8x256xf32>
    %451 = vector.extract_strided_slice %450 {offsets = [0, 0], sizes = [8, 64], strides = [1, 1]} : vector<8x256xf32> to vector<8x64xf32>
    %452 = arith.negf %451 : vector<8x64xf32>
    %453 = math.exp %452 : vector<8x64xf32>
    %cst_90 = arith.constant 1.000000e+00 : f32
    %454 = vector.broadcast %cst_90 : f32 to vector<8x64xf32>
    %455 = arith.addf %454, %453 : vector<8x64xf32>
    %456 = arith.divf %454, %455 : vector<8x64xf32>
    %457 = vector.extract_strided_slice %450 {offsets = [0, 64], sizes = [8, 64], strides = [1, 1]} : vector<8x256xf32> to vector<8x64xf32>
    %458 = arith.negf %457 : vector<8x64xf32>
    %459 = math.exp %458 : vector<8x64xf32>
    %cst_91 = arith.constant 1.000000e+00 : f32
    %460 = vector.broadcast %cst_91 : f32 to vector<8x64xf32>
    %461 = arith.addf %460, %459 : vector<8x64xf32>
    %462 = arith.divf %460, %461 : vector<8x64xf32>
    %463 = vector.extract_strided_slice %450 {offsets = [0, 128], sizes = [8, 64], strides = [1, 1]} : vector<8x256xf32> to vector<8x64xf32>
    %464 = math.tanh %463 : vector<8x64xf32>
    %465 = vector.extract_strided_slice %450 {offsets = [0, 192], sizes = [8, 64], strides = [1, 1]} : vector<8x256xf32> to vector<8x64xf32>
    %466 = arith.negf %465 : vector<8x64xf32>
    %467 = math.exp %466 : vector<8x64xf32>
    %cst_92 = arith.constant 1.000000e+00 : f32
    %468 = vector.broadcast %cst_92 : f32 to vector<8x64xf32>
    %469 = arith.addf %468, %467 : vector<8x64xf32>
    %470 = arith.divf %468, %469 : vector<8x64xf32>
    %471 = arith.mulf %462, %444 : vector<8x64xf32>
    %472 = arith.mulf %456, %464 : vector<8x64xf32>
    %473 = arith.addf %471, %472 : vector<8x64xf32>
    %474 = math.tanh %473 : vector<8x64xf32>
    %475 = arith.mulf %470, %474 : vector<8x64xf32>
    %c128 = arith.constant 128 : index
    %c0_93 = arith.constant 0 : index
    %476 = vector.load %arg14[%c128, %c0_93] : memref<224x256xf32, #tpu.memory_space<vmem>>, vector<8x256xf32>
    %477 = arith.truncf %475 : vector<8x64xf32> to vector<8x64xbf16>
    %cst_94 = arith.constant dense<0.000000e+00> : vector<8x256xf32>
    %478 = tpu.matmul %477, %1, %cst_94 {dimension_numbers = #tpu.dot_dimension_numbers<[1], [0], [0], [1], [0, 0, 1, 1], [], []>} : vector<8x64xbf16>, vector<64x256xbf16>, vector<8x256xf32> -> vector<8x256xf32>
    %479 = arith.addf %476, %478 : vector<8x256xf32>
    %480 = vector.extract_strided_slice %479 {offsets = [0, 0], sizes = [8, 64], strides = [1, 1]} : vector<8x256xf32> to vector<8x64xf32>
    %481 = arith.negf %480 : vector<8x64xf32>
    %482 = math.exp %481 : vector<8x64xf32>
    %cst_95 = arith.constant 1.000000e+00 : f32
    %483 = vector.broadcast %cst_95 : f32 to vector<8x64xf32>
    %484 = arith.addf %483, %482 : vector<8x64xf32>
    %485 = arith.divf %483, %484 : vector<8x64xf32>
    %486 = vector.extract_strided_slice %479 {offsets = [0, 64], sizes = [8, 64], strides = [1, 1]} : vector<8x256xf32> to vector<8x64xf32>
    %487 = arith.negf %486 : vector<8x64xf32>
    %488 = math.exp %487 : vector<8x64xf32>
    %cst_96 = arith.constant 1.000000e+00 : f32
    %489 = vector.broadcast %cst_96 : f32 to vector<8x64xf32>
    %490 = arith.addf %489, %488 : vector<8x64xf32>
    %491 = arith.divf %489, %490 : vector<8x64xf32>
    %492 = vector.extract_strided_slice %479 {offsets = [0, 128], sizes = [8, 64], strides = [1, 1]} : vector<8x256xf32> to vector<8x64xf32>
    %493 = math.tanh %492 : vector<8x64xf32>
    %494 = vector.extract_strided_slice %479 {offsets = [0, 192], sizes = [8, 64], strides = [1, 1]} : vector<8x256xf32> to vector<8x64xf32>
    %495 = arith.negf %494 : vector<8x64xf32>
    %496 = math.exp %495 : vector<8x64xf32>
    %cst_97 = arith.constant 1.000000e+00 : f32
    %497 = vector.broadcast %cst_97 : f32 to vector<8x64xf32>
    %498 = arith.addf %497, %496 : vector<8x64xf32>
    %499 = arith.divf %497, %498 : vector<8x64xf32>
    %500 = arith.mulf %491, %473 : vector<8x64xf32>
    %501 = arith.mulf %485, %493 : vector<8x64xf32>
    %502 = arith.addf %500, %501 : vector<8x64xf32>
    %503 = math.tanh %502 : vector<8x64xf32>
    %504 = arith.mulf %499, %503 : vector<8x64xf32>
    %c136 = arith.constant 136 : index
    %c0_98 = arith.constant 0 : index
    %505 = vector.load %arg14[%c136, %c0_98] : memref<224x256xf32, #tpu.memory_space<vmem>>, vector<8x256xf32>
    %506 = arith.truncf %504 : vector<8x64xf32> to vector<8x64xbf16>
    %cst_99 = arith.constant dense<0.000000e+00> : vector<8x256xf32>
    %507 = tpu.matmul %506, %1, %cst_99 {dimension_numbers = #tpu.dot_dimension_numbers<[1], [0], [0], [1], [0, 0, 1, 1], [], []>} : vector<8x64xbf16>, vector<64x256xbf16>, vector<8x256xf32> -> vector<8x256xf32>
    %508 = arith.addf %505, %507 : vector<8x256xf32>
    %509 = vector.extract_strided_slice %508 {offsets = [0, 0], sizes = [8, 64], strides = [1, 1]} : vector<8x256xf32> to vector<8x64xf32>
    %510 = arith.negf %509 : vector<8x64xf32>
    %511 = math.exp %510 : vector<8x64xf32>
    %cst_100 = arith.constant 1.000000e+00 : f32
    %512 = vector.broadcast %cst_100 : f32 to vector<8x64xf32>
    %513 = arith.addf %512, %511 : vector<8x64xf32>
    %514 = arith.divf %512, %513 : vector<8x64xf32>
    %515 = vector.extract_strided_slice %508 {offsets = [0, 64], sizes = [8, 64], strides = [1, 1]} : vector<8x256xf32> to vector<8x64xf32>
    %516 = arith.negf %515 : vector<8x64xf32>
    %517 = math.exp %516 : vector<8x64xf32>
    %cst_101 = arith.constant 1.000000e+00 : f32
    %518 = vector.broadcast %cst_101 : f32 to vector<8x64xf32>
    %519 = arith.addf %518, %517 : vector<8x64xf32>
    %520 = arith.divf %518, %519 : vector<8x64xf32>
    %521 = vector.extract_strided_slice %508 {offsets = [0, 128], sizes = [8, 64], strides = [1, 1]} : vector<8x256xf32> to vector<8x64xf32>
    %522 = math.tanh %521 : vector<8x64xf32>
    %523 = vector.extract_strided_slice %508 {offsets = [0, 192], sizes = [8, 64], strides = [1, 1]} : vector<8x256xf32> to vector<8x64xf32>
    %524 = arith.negf %523 : vector<8x64xf32>
    %525 = math.exp %524 : vector<8x64xf32>
    %cst_102 = arith.constant 1.000000e+00 : f32
    %526 = vector.broadcast %cst_102 : f32 to vector<8x64xf32>
    %527 = arith.addf %526, %525 : vector<8x64xf32>
    %528 = arith.divf %526, %527 : vector<8x64xf32>
    %529 = arith.mulf %520, %502 : vector<8x64xf32>
    %530 = arith.mulf %514, %522 : vector<8x64xf32>
    %531 = arith.addf %529, %530 : vector<8x64xf32>
    %532 = math.tanh %531 : vector<8x64xf32>
    %533 = arith.mulf %528, %532 : vector<8x64xf32>
    %c144 = arith.constant 144 : index
    %c0_103 = arith.constant 0 : index
    %534 = vector.load %arg14[%c144, %c0_103] : memref<224x256xf32, #tpu.memory_space<vmem>>, vector<8x256xf32>
    %535 = arith.truncf %533 : vector<8x64xf32> to vector<8x64xbf16>
    %cst_104 = arith.constant dense<0.000000e+00> : vector<8x256xf32>
    %536 = tpu.matmul %535, %1, %cst_104 {dimension_numbers = #tpu.dot_dimension_numbers<[1], [0], [0], [1], [0, 0, 1, 1], [], []>} : vector<8x64xbf16>, vector<64x256xbf16>, vector<8x256xf32> -> vector<8x256xf32>
    %537 = arith.addf %534, %536 : vector<8x256xf32>
    %538 = vector.extract_strided_slice %537 {offsets = [0, 0], sizes = [8, 64], strides = [1, 1]} : vector<8x256xf32> to vector<8x64xf32>
    %539 = arith.negf %538 : vector<8x64xf32>
    %540 = math.exp %539 : vector<8x64xf32>
    %cst_105 = arith.constant 1.000000e+00 : f32
    %541 = vector.broadcast %cst_105 : f32 to vector<8x64xf32>
    %542 = arith.addf %541, %540 : vector<8x64xf32>
    %543 = arith.divf %541, %542 : vector<8x64xf32>
    %544 = vector.extract_strided_slice %537 {offsets = [0, 64], sizes = [8, 64], strides = [1, 1]} : vector<8x256xf32> to vector<8x64xf32>
    %545 = arith.negf %544 : vector<8x64xf32>
    %546 = math.exp %545 : vector<8x64xf32>
    %cst_106 = arith.constant 1.000000e+00 : f32
    %547 = vector.broadcast %cst_106 : f32 to vector<8x64xf32>
    %548 = arith.addf %547, %546 : vector<8x64xf32>
    %549 = arith.divf %547, %548 : vector<8x64xf32>
    %550 = vector.extract_strided_slice %537 {offsets = [0, 128], sizes = [8, 64], strides = [1, 1]} : vector<8x256xf32> to vector<8x64xf32>
    %551 = math.tanh %550 : vector<8x64xf32>
    %552 = vector.extract_strided_slice %537 {offsets = [0, 192], sizes = [8, 64], strides = [1, 1]} : vector<8x256xf32> to vector<8x64xf32>
    %553 = arith.negf %552 : vector<8x64xf32>
    %554 = math.exp %553 : vector<8x64xf32>
    %cst_107 = arith.constant 1.000000e+00 : f32
    %555 = vector.broadcast %cst_107 : f32 to vector<8x64xf32>
    %556 = arith.addf %555, %554 : vector<8x64xf32>
    %557 = arith.divf %555, %556 : vector<8x64xf32>
    %558 = arith.mulf %549, %531 : vector<8x64xf32>
    %559 = arith.mulf %543, %551 : vector<8x64xf32>
    %560 = arith.addf %558, %559 : vector<8x64xf32>
    %561 = math.tanh %560 : vector<8x64xf32>
    %562 = arith.mulf %557, %561 : vector<8x64xf32>
    %c152 = arith.constant 152 : index
    %c0_108 = arith.constant 0 : index
    %563 = vector.load %arg14[%c152, %c0_108] : memref<224x256xf32, #tpu.memory_space<vmem>>, vector<8x256xf32>
    %564 = arith.truncf %562 : vector<8x64xf32> to vector<8x64xbf16>
    %cst_109 = arith.constant dense<0.000000e+00> : vector<8x256xf32>
    %565 = tpu.matmul %564, %1, %cst_109 {dimension_numbers = #tpu.dot_dimension_numbers<[1], [0], [0], [1], [0, 0, 1, 1], [], []>} : vector<8x64xbf16>, vector<64x256xbf16>, vector<8x256xf32> -> vector<8x256xf32>
    %566 = arith.addf %563, %565 : vector<8x256xf32>
    %567 = vector.extract_strided_slice %566 {offsets = [0, 0], sizes = [8, 64], strides = [1, 1]} : vector<8x256xf32> to vector<8x64xf32>
    %568 = arith.negf %567 : vector<8x64xf32>
    %569 = math.exp %568 : vector<8x64xf32>
    %cst_110 = arith.constant 1.000000e+00 : f32
    %570 = vector.broadcast %cst_110 : f32 to vector<8x64xf32>
    %571 = arith.addf %570, %569 : vector<8x64xf32>
    %572 = arith.divf %570, %571 : vector<8x64xf32>
    %573 = vector.extract_strided_slice %566 {offsets = [0, 64], sizes = [8, 64], strides = [1, 1]} : vector<8x256xf32> to vector<8x64xf32>
    %574 = arith.negf %573 : vector<8x64xf32>
    %575 = math.exp %574 : vector<8x64xf32>
    %cst_111 = arith.constant 1.000000e+00 : f32
    %576 = vector.broadcast %cst_111 : f32 to vector<8x64xf32>
    %577 = arith.addf %576, %575 : vector<8x64xf32>
    %578 = arith.divf %576, %577 : vector<8x64xf32>
    %579 = vector.extract_strided_slice %566 {offsets = [0, 128], sizes = [8, 64], strides = [1, 1]} : vector<8x256xf32> to vector<8x64xf32>
    %580 = math.tanh %579 : vector<8x64xf32>
    %581 = vector.extract_strided_slice %566 {offsets = [0, 192], sizes = [8, 64], strides = [1, 1]} : vector<8x256xf32> to vector<8x64xf32>
    %582 = arith.negf %581 : vector<8x64xf32>
    %583 = math.exp %582 : vector<8x64xf32>
    %cst_112 = arith.constant 1.000000e+00 : f32
    %584 = vector.broadcast %cst_112 : f32 to vector<8x64xf32>
    %585 = arith.addf %584, %583 : vector<8x64xf32>
    %586 = arith.divf %584, %585 : vector<8x64xf32>
    %587 = arith.mulf %578, %560 : vector<8x64xf32>
    %588 = arith.mulf %572, %580 : vector<8x64xf32>
    %589 = arith.addf %587, %588 : vector<8x64xf32>
    %590 = math.tanh %589 : vector<8x64xf32>
    %591 = arith.mulf %586, %590 : vector<8x64xf32>
    %c160 = arith.constant 160 : index
    %c0_113 = arith.constant 0 : index
    %592 = vector.load %arg14[%c160, %c0_113] : memref<224x256xf32, #tpu.memory_space<vmem>>, vector<8x256xf32>
    %593 = arith.truncf %591 : vector<8x64xf32> to vector<8x64xbf16>
    %cst_114 = arith.constant dense<0.000000e+00> : vector<8x256xf32>
    %594 = tpu.matmul %593, %1, %cst_114 {dimension_numbers = #tpu.dot_dimension_numbers<[1], [0], [0], [1], [0, 0, 1, 1], [], []>} : vector<8x64xbf16>, vector<64x256xbf16>, vector<8x256xf32> -> vector<8x256xf32>
    %595 = arith.addf %592, %594 : vector<8x256xf32>
    %596 = vector.extract_strided_slice %595 {offsets = [0, 0], sizes = [8, 64], strides = [1, 1]} : vector<8x256xf32> to vector<8x64xf32>
    %597 = arith.negf %596 : vector<8x64xf32>
    %598 = math.exp %597 : vector<8x64xf32>
    %cst_115 = arith.constant 1.000000e+00 : f32
    %599 = vector.broadcast %cst_115 : f32 to vector<8x64xf32>
    %600 = arith.addf %599, %598 : vector<8x64xf32>
    %601 = arith.divf %599, %600 : vector<8x64xf32>
    %602 = vector.extract_strided_slice %595 {offsets = [0, 64], sizes = [8, 64], strides = [1, 1]} : vector<8x256xf32> to vector<8x64xf32>
    %603 = arith.negf %602 : vector<8x64xf32>
    %604 = math.exp %603 : vector<8x64xf32>
    %cst_116 = arith.constant 1.000000e+00 : f32
    %605 = vector.broadcast %cst_116 : f32 to vector<8x64xf32>
    %606 = arith.addf %605, %604 : vector<8x64xf32>
    %607 = arith.divf %605, %606 : vector<8x64xf32>
    %608 = vector.extract_strided_slice %595 {offsets = [0, 128], sizes = [8, 64], strides = [1, 1]} : vector<8x256xf32> to vector<8x64xf32>
    %609 = math.tanh %608 : vector<8x64xf32>
    %610 = vector.extract_strided_slice %595 {offsets = [0, 192], sizes = [8, 64], strides = [1, 1]} : vector<8x256xf32> to vector<8x64xf32>
    %611 = arith.negf %610 : vector<8x64xf32>
    %612 = math.exp %611 : vector<8x64xf32>
    %cst_117 = arith.constant 1.000000e+00 : f32
    %613 = vector.broadcast %cst_117 : f32 to vector<8x64xf32>
    %614 = arith.addf %613, %612 : vector<8x64xf32>
    %615 = arith.divf %613, %614 : vector<8x64xf32>
    %616 = arith.mulf %607, %589 : vector<8x64xf32>
    %617 = arith.mulf %601, %609 : vector<8x64xf32>
    %618 = arith.addf %616, %617 : vector<8x64xf32>
    %619 = math.tanh %618 : vector<8x64xf32>
    %620 = arith.mulf %615, %619 : vector<8x64xf32>
    %c168 = arith.constant 168 : index
    %c0_118 = arith.constant 0 : index
    %621 = vector.load %arg14[%c168, %c0_118] : memref<224x256xf32, #tpu.memory_space<vmem>>, vector<8x256xf32>
    %622 = arith.truncf %620 : vector<8x64xf32> to vector<8x64xbf16>
    %cst_119 = arith.constant dense<0.000000e+00> : vector<8x256xf32>
    %623 = tpu.matmul %622, %1, %cst_119 {dimension_numbers = #tpu.dot_dimension_numbers<[1], [0], [0], [1], [0, 0, 1, 1], [], []>} : vector<8x64xbf16>, vector<64x256xbf16>, vector<8x256xf32> -> vector<8x256xf32>
    %624 = arith.addf %621, %623 : vector<8x256xf32>
    %625 = vector.extract_strided_slice %624 {offsets = [0, 0], sizes = [8, 64], strides = [1, 1]} : vector<8x256xf32> to vector<8x64xf32>
    %626 = arith.negf %625 : vector<8x64xf32>
    %627 = math.exp %626 : vector<8x64xf32>
    %cst_120 = arith.constant 1.000000e+00 : f32
    %628 = vector.broadcast %cst_120 : f32 to vector<8x64xf32>
    %629 = arith.addf %628, %627 : vector<8x64xf32>
    %630 = arith.divf %628, %629 : vector<8x64xf32>
    %631 = vector.extract_strided_slice %624 {offsets = [0, 64], sizes = [8, 64], strides = [1, 1]} : vector<8x256xf32> to vector<8x64xf32>
    %632 = arith.negf %631 : vector<8x64xf32>
    %633 = math.exp %632 : vector<8x64xf32>
    %cst_121 = arith.constant 1.000000e+00 : f32
    %634 = vector.broadcast %cst_121 : f32 to vector<8x64xf32>
    %635 = arith.addf %634, %633 : vector<8x64xf32>
    %636 = arith.divf %634, %635 : vector<8x64xf32>
    %637 = vector.extract_strided_slice %624 {offsets = [0, 128], sizes = [8, 64], strides = [1, 1]} : vector<8x256xf32> to vector<8x64xf32>
    %638 = math.tanh %637 : vector<8x64xf32>
    %639 = vector.extract_strided_slice %624 {offsets = [0, 192], sizes = [8, 64], strides = [1, 1]} : vector<8x256xf32> to vector<8x64xf32>
    %640 = arith.negf %639 : vector<8x64xf32>
    %641 = math.exp %640 : vector<8x64xf32>
    %cst_122 = arith.constant 1.000000e+00 : f32
    %642 = vector.broadcast %cst_122 : f32 to vector<8x64xf32>
    %643 = arith.addf %642, %641 : vector<8x64xf32>
    %644 = arith.divf %642, %643 : vector<8x64xf32>
    %645 = arith.mulf %636, %618 : vector<8x64xf32>
    %646 = arith.mulf %630, %638 : vector<8x64xf32>
    %647 = arith.addf %645, %646 : vector<8x64xf32>
    %648 = math.tanh %647 : vector<8x64xf32>
    %649 = arith.mulf %644, %648 : vector<8x64xf32>
    %c176 = arith.constant 176 : index
    %c0_123 = arith.constant 0 : index
    %650 = vector.load %arg14[%c176, %c0_123] : memref<224x256xf32, #tpu.memory_space<vmem>>, vector<8x256xf32>
    %651 = arith.truncf %649 : vector<8x64xf32> to vector<8x64xbf16>
    %cst_124 = arith.constant dense<0.000000e+00> : vector<8x256xf32>
    %652 = tpu.matmul %651, %1, %cst_124 {dimension_numbers = #tpu.dot_dimension_numbers<[1], [0], [0], [1], [0, 0, 1, 1], [], []>} : vector<8x64xbf16>, vector<64x256xbf16>, vector<8x256xf32> -> vector<8x256xf32>
    %653 = arith.addf %650, %652 : vector<8x256xf32>
    %654 = vector.extract_strided_slice %653 {offsets = [0, 0], sizes = [8, 64], strides = [1, 1]} : vector<8x256xf32> to vector<8x64xf32>
    %655 = arith.negf %654 : vector<8x64xf32>
    %656 = math.exp %655 : vector<8x64xf32>
    %cst_125 = arith.constant 1.000000e+00 : f32
    %657 = vector.broadcast %cst_125 : f32 to vector<8x64xf32>
    %658 = arith.addf %657, %656 : vector<8x64xf32>
    %659 = arith.divf %657, %658 : vector<8x64xf32>
    %660 = vector.extract_strided_slice %653 {offsets = [0, 64], sizes = [8, 64], strides = [1, 1]} : vector<8x256xf32> to vector<8x64xf32>
    %661 = arith.negf %660 : vector<8x64xf32>
    %662 = math.exp %661 : vector<8x64xf32>
    %cst_126 = arith.constant 1.000000e+00 : f32
    %663 = vector.broadcast %cst_126 : f32 to vector<8x64xf32>
    %664 = arith.addf %663, %662 : vector<8x64xf32>
    %665 = arith.divf %663, %664 : vector<8x64xf32>
    %666 = vector.extract_strided_slice %653 {offsets = [0, 128], sizes = [8, 64], strides = [1, 1]} : vector<8x256xf32> to vector<8x64xf32>
    %667 = math.tanh %666 : vector<8x64xf32>
    %668 = vector.extract_strided_slice %653 {offsets = [0, 192], sizes = [8, 64], strides = [1, 1]} : vector<8x256xf32> to vector<8x64xf32>
    %669 = arith.negf %668 : vector<8x64xf32>
    %670 = math.exp %669 : vector<8x64xf32>
    %cst_127 = arith.constant 1.000000e+00 : f32
    %671 = vector.broadcast %cst_127 : f32 to vector<8x64xf32>
    %672 = arith.addf %671, %670 : vector<8x64xf32>
    %673 = arith.divf %671, %672 : vector<8x64xf32>
    %674 = arith.mulf %665, %647 : vector<8x64xf32>
    %675 = arith.mulf %659, %667 : vector<8x64xf32>
    %676 = arith.addf %674, %675 : vector<8x64xf32>
    %677 = math.tanh %676 : vector<8x64xf32>
    %678 = arith.mulf %673, %677 : vector<8x64xf32>
    %c184 = arith.constant 184 : index
    %c0_128 = arith.constant 0 : index
    %679 = vector.load %arg14[%c184, %c0_128] : memref<224x256xf32, #tpu.memory_space<vmem>>, vector<8x256xf32>
    %680 = arith.truncf %678 : vector<8x64xf32> to vector<8x64xbf16>
    %cst_129 = arith.constant dense<0.000000e+00> : vector<8x256xf32>
    %681 = tpu.matmul %680, %1, %cst_129 {dimension_numbers = #tpu.dot_dimension_numbers<[1], [0], [0], [1], [0, 0, 1, 1], [], []>} : vector<8x64xbf16>, vector<64x256xbf16>, vector<8x256xf32> -> vector<8x256xf32>
    %682 = arith.addf %679, %681 : vector<8x256xf32>
    %683 = vector.extract_strided_slice %682 {offsets = [0, 0], sizes = [8, 64], strides = [1, 1]} : vector<8x256xf32> to vector<8x64xf32>
    %684 = arith.negf %683 : vector<8x64xf32>
    %685 = math.exp %684 : vector<8x64xf32>
    %cst_130 = arith.constant 1.000000e+00 : f32
    %686 = vector.broadcast %cst_130 : f32 to vector<8x64xf32>
    %687 = arith.addf %686, %685 : vector<8x64xf32>
    %688 = arith.divf %686, %687 : vector<8x64xf32>
    %689 = vector.extract_strided_slice %682 {offsets = [0, 64], sizes = [8, 64], strides = [1, 1]} : vector<8x256xf32> to vector<8x64xf32>
    %690 = arith.negf %689 : vector<8x64xf32>
    %691 = math.exp %690 : vector<8x64xf32>
    %cst_131 = arith.constant 1.000000e+00 : f32
    %692 = vector.broadcast %cst_131 : f32 to vector<8x64xf32>
    %693 = arith.addf %692, %691 : vector<8x64xf32>
    %694 = arith.divf %692, %693 : vector<8x64xf32>
    %695 = vector.extract_strided_slice %682 {offsets = [0, 128], sizes = [8, 64], strides = [1, 1]} : vector<8x256xf32> to vector<8x64xf32>
    %696 = math.tanh %695 : vector<8x64xf32>
    %697 = vector.extract_strided_slice %682 {offsets = [0, 192], sizes = [8, 64], strides = [1, 1]} : vector<8x256xf32> to vector<8x64xf32>
    %698 = arith.negf %697 : vector<8x64xf32>
    %699 = math.exp %698 : vector<8x64xf32>
    %cst_132 = arith.constant 1.000000e+00 : f32
    %700 = vector.broadcast %cst_132 : f32 to vector<8x64xf32>
    %701 = arith.addf %700, %699 : vector<8x64xf32>
    %702 = arith.divf %700, %701 : vector<8x64xf32>
    %703 = arith.mulf %694, %676 : vector<8x64xf32>
    %704 = arith.mulf %688, %696 : vector<8x64xf32>
    %705 = arith.addf %703, %704 : vector<8x64xf32>
    %706 = math.tanh %705 : vector<8x64xf32>
    %707 = arith.mulf %702, %706 : vector<8x64xf32>
    %c192 = arith.constant 192 : index
    %c0_133 = arith.constant 0 : index
    %708 = vector.load %arg14[%c192, %c0_133] : memref<224x256xf32, #tpu.memory_space<vmem>>, vector<8x256xf32>
    %709 = arith.truncf %707 : vector<8x64xf32> to vector<8x64xbf16>
    %cst_134 = arith.constant dense<0.000000e+00> : vector<8x256xf32>
    %710 = tpu.matmul %709, %1, %cst_134 {dimension_numbers = #tpu.dot_dimension_numbers<[1], [0], [0], [1], [0, 0, 1, 1], [], []>} : vector<8x64xbf16>, vector<64x256xbf16>, vector<8x256xf32> -> vector<8x256xf32>
    %711 = arith.addf %708, %710 : vector<8x256xf32>
    %712 = vector.extract_strided_slice %711 {offsets = [0, 0], sizes = [8, 64], strides = [1, 1]} : vector<8x256xf32> to vector<8x64xf32>
    %713 = arith.negf %712 : vector<8x64xf32>
    %714 = math.exp %713 : vector<8x64xf32>
    %cst_135 = arith.constant 1.000000e+00 : f32
    %715 = vector.broadcast %cst_135 : f32 to vector<8x64xf32>
    %716 = arith.addf %715, %714 : vector<8x64xf32>
    %717 = arith.divf %715, %716 : vector<8x64xf32>
    %718 = vector.extract_strided_slice %711 {offsets = [0, 64], sizes = [8, 64], strides = [1, 1]} : vector<8x256xf32> to vector<8x64xf32>
    %719 = arith.negf %718 : vector<8x64xf32>
    %720 = math.exp %719 : vector<8x64xf32>
    %cst_136 = arith.constant 1.000000e+00 : f32
    %721 = vector.broadcast %cst_136 : f32 to vector<8x64xf32>
    %722 = arith.addf %721, %720 : vector<8x64xf32>
    %723 = arith.divf %721, %722 : vector<8x64xf32>
    %724 = vector.extract_strided_slice %711 {offsets = [0, 128], sizes = [8, 64], strides = [1, 1]} : vector<8x256xf32> to vector<8x64xf32>
    %725 = math.tanh %724 : vector<8x64xf32>
    %726 = vector.extract_strided_slice %711 {offsets = [0, 192], sizes = [8, 64], strides = [1, 1]} : vector<8x256xf32> to vector<8x64xf32>
    %727 = arith.negf %726 : vector<8x64xf32>
    %728 = math.exp %727 : vector<8x64xf32>
    %cst_137 = arith.constant 1.000000e+00 : f32
    %729 = vector.broadcast %cst_137 : f32 to vector<8x64xf32>
    %730 = arith.addf %729, %728 : vector<8x64xf32>
    %731 = arith.divf %729, %730 : vector<8x64xf32>
    %732 = arith.mulf %723, %705 : vector<8x64xf32>
    %733 = arith.mulf %717, %725 : vector<8x64xf32>
    %734 = arith.addf %732, %733 : vector<8x64xf32>
    %735 = math.tanh %734 : vector<8x64xf32>
    %736 = arith.mulf %731, %735 : vector<8x64xf32>
    %c200 = arith.constant 200 : index
    %c0_138 = arith.constant 0 : index
    %737 = vector.load %arg14[%c200, %c0_138] : memref<224x256xf32, #tpu.memory_space<vmem>>, vector<8x256xf32>
    %738 = arith.truncf %736 : vector<8x64xf32> to vector<8x64xbf16>
    %cst_139 = arith.constant dense<0.000000e+00> : vector<8x256xf32>
    %739 = tpu.matmul %738, %1, %cst_139 {dimension_numbers = #tpu.dot_dimension_numbers<[1], [0], [0], [1], [0, 0, 1, 1], [], []>} : vector<8x64xbf16>, vector<64x256xbf16>, vector<8x256xf32> -> vector<8x256xf32>
    %740 = arith.addf %737, %739 : vector<8x256xf32>
    %741 = vector.extract_strided_slice %740 {offsets = [0, 0], sizes = [8, 64], strides = [1, 1]} : vector<8x256xf32> to vector<8x64xf32>
    %742 = arith.negf %741 : vector<8x64xf32>
    %743 = math.exp %742 : vector<8x64xf32>
    %cst_140 = arith.constant 1.000000e+00 : f32
    %744 = vector.broadcast %cst_140 : f32 to vector<8x64xf32>
    %745 = arith.addf %744, %743 : vector<8x64xf32>
    %746 = arith.divf %744, %745 : vector<8x64xf32>
    %747 = vector.extract_strided_slice %740 {offsets = [0, 64], sizes = [8, 64], strides = [1, 1]} : vector<8x256xf32> to vector<8x64xf32>
    %748 = arith.negf %747 : vector<8x64xf32>
    %749 = math.exp %748 : vector<8x64xf32>
    %cst_141 = arith.constant 1.000000e+00 : f32
    %750 = vector.broadcast %cst_141 : f32 to vector<8x64xf32>
    %751 = arith.addf %750, %749 : vector<8x64xf32>
    %752 = arith.divf %750, %751 : vector<8x64xf32>
    %753 = vector.extract_strided_slice %740 {offsets = [0, 128], sizes = [8, 64], strides = [1, 1]} : vector<8x256xf32> to vector<8x64xf32>
    %754 = math.tanh %753 : vector<8x64xf32>
    %755 = vector.extract_strided_slice %740 {offsets = [0, 192], sizes = [8, 64], strides = [1, 1]} : vector<8x256xf32> to vector<8x64xf32>
    %756 = arith.negf %755 : vector<8x64xf32>
    %757 = math.exp %756 : vector<8x64xf32>
    %cst_142 = arith.constant 1.000000e+00 : f32
    %758 = vector.broadcast %cst_142 : f32 to vector<8x64xf32>
    %759 = arith.addf %758, %757 : vector<8x64xf32>
    %760 = arith.divf %758, %759 : vector<8x64xf32>
    %761 = arith.mulf %752, %734 : vector<8x64xf32>
    %762 = arith.mulf %746, %754 : vector<8x64xf32>
    %763 = arith.addf %761, %762 : vector<8x64xf32>
    %764 = math.tanh %763 : vector<8x64xf32>
    %765 = arith.mulf %760, %764 : vector<8x64xf32>
    %c208 = arith.constant 208 : index
    %c0_143 = arith.constant 0 : index
    %766 = vector.load %arg14[%c208, %c0_143] : memref<224x256xf32, #tpu.memory_space<vmem>>, vector<8x256xf32>
    %767 = arith.truncf %765 : vector<8x64xf32> to vector<8x64xbf16>
    %cst_144 = arith.constant dense<0.000000e+00> : vector<8x256xf32>
    %768 = tpu.matmul %767, %1, %cst_144 {dimension_numbers = #tpu.dot_dimension_numbers<[1], [0], [0], [1], [0, 0, 1, 1], [], []>} : vector<8x64xbf16>, vector<64x256xbf16>, vector<8x256xf32> -> vector<8x256xf32>
    %769 = arith.addf %766, %768 : vector<8x256xf32>
    %770 = vector.extract_strided_slice %769 {offsets = [0, 0], sizes = [8, 64], strides = [1, 1]} : vector<8x256xf32> to vector<8x64xf32>
    %771 = arith.negf %770 : vector<8x64xf32>
    %772 = math.exp %771 : vector<8x64xf32>
    %cst_145 = arith.constant 1.000000e+00 : f32
    %773 = vector.broadcast %cst_145 : f32 to vector<8x64xf32>
    %774 = arith.addf %773, %772 : vector<8x64xf32>
    %775 = arith.divf %773, %774 : vector<8x64xf32>
    %776 = vector.extract_strided_slice %769 {offsets = [0, 64], sizes = [8, 64], strides = [1, 1]} : vector<8x256xf32> to vector<8x64xf32>
    %777 = arith.negf %776 : vector<8x64xf32>
    %778 = math.exp %777 : vector<8x64xf32>
    %cst_146 = arith.constant 1.000000e+00 : f32
    %779 = vector.broadcast %cst_146 : f32 to vector<8x64xf32>
    %780 = arith.addf %779, %778 : vector<8x64xf32>
    %781 = arith.divf %779, %780 : vector<8x64xf32>
    %782 = vector.extract_strided_slice %769 {offsets = [0, 128], sizes = [8, 64], strides = [1, 1]} : vector<8x256xf32> to vector<8x64xf32>
    %783 = math.tanh %782 : vector<8x64xf32>
    %784 = vector.extract_strided_slice %769 {offsets = [0, 192], sizes = [8, 64], strides = [1, 1]} : vector<8x256xf32> to vector<8x64xf32>
    %785 = arith.negf %784 : vector<8x64xf32>
    %786 = math.exp %785 : vector<8x64xf32>
    %cst_147 = arith.constant 1.000000e+00 : f32
    %787 = vector.broadcast %cst_147 : f32 to vector<8x64xf32>
    %788 = arith.addf %787, %786 : vector<8x64xf32>
    %789 = arith.divf %787, %788 : vector<8x64xf32>
    %790 = arith.mulf %781, %763 : vector<8x64xf32>
    %791 = arith.mulf %775, %783 : vector<8x64xf32>
    %792 = arith.addf %790, %791 : vector<8x64xf32>
    %793 = math.tanh %792 : vector<8x64xf32>
    %794 = arith.mulf %789, %793 : vector<8x64xf32>
    %c216 = arith.constant 216 : index
    %c0_148 = arith.constant 0 : index
    %795 = vector.load %arg14[%c216, %c0_148] : memref<224x256xf32, #tpu.memory_space<vmem>>, vector<8x256xf32>
    %796 = arith.truncf %794 : vector<8x64xf32> to vector<8x64xbf16>
    %cst_149 = arith.constant dense<0.000000e+00> : vector<8x256xf32>
    %797 = tpu.matmul %796, %1, %cst_149 {dimension_numbers = #tpu.dot_dimension_numbers<[1], [0], [0], [1], [0, 0, 1, 1], [], []>} : vector<8x64xbf16>, vector<64x256xbf16>, vector<8x256xf32> -> vector<8x256xf32>
    %798 = arith.addf %795, %797 : vector<8x256xf32>
    %799 = vector.extract_strided_slice %798 {offsets = [0, 0], sizes = [8, 64], strides = [1, 1]} : vector<8x256xf32> to vector<8x64xf32>
    %800 = arith.negf %799 : vector<8x64xf32>
    %801 = math.exp %800 : vector<8x64xf32>
    %cst_150 = arith.constant 1.000000e+00 : f32
    %802 = vector.broadcast %cst_150 : f32 to vector<8x64xf32>
    %803 = arith.addf %802, %801 : vector<8x64xf32>
    %804 = arith.divf %802, %803 : vector<8x64xf32>
    %805 = vector.extract_strided_slice %798 {offsets = [0, 64], sizes = [8, 64], strides = [1, 1]} : vector<8x256xf32> to vector<8x64xf32>
    %806 = arith.negf %805 : vector<8x64xf32>
    %807 = math.exp %806 : vector<8x64xf32>
    %cst_151 = arith.constant 1.000000e+00 : f32
    %808 = vector.broadcast %cst_151 : f32 to vector<8x64xf32>
    %809 = arith.addf %808, %807 : vector<8x64xf32>
    %810 = arith.divf %808, %809 : vector<8x64xf32>
    %811 = vector.extract_strided_slice %798 {offsets = [0, 128], sizes = [8, 64], strides = [1, 1]} : vector<8x256xf32> to vector<8x64xf32>
    %812 = math.tanh %811 : vector<8x64xf32>
    %813 = vector.extract_strided_slice %798 {offsets = [0, 192], sizes = [8, 64], strides = [1, 1]} : vector<8x256xf32> to vector<8x64xf32>
    %814 = arith.negf %813 : vector<8x64xf32>
    %815 = math.exp %814 : vector<8x64xf32>
    %cst_152 = arith.constant 1.000000e+00 : f32
    %816 = vector.broadcast %cst_152 : f32 to vector<8x64xf32>
    %817 = arith.addf %816, %815 : vector<8x64xf32>
    %818 = arith.divf %816, %817 : vector<8x64xf32>
    %819 = arith.mulf %810, %792 : vector<8x64xf32>
    %820 = arith.mulf %804, %812 : vector<8x64xf32>
    %821 = arith.addf %819, %820 : vector<8x64xf32>
    %822 = math.tanh %821 : vector<8x64xf32>
    %823 = arith.mulf %818, %822 : vector<8x64xf32>
    %c0_153 = arith.constant 0 : index
    %c0_154 = arith.constant 0 : index
    %824 = vector.load %arg5[%c0_153, %c0_154] : memref<1x64xf32, #tpu.memory_space<vmem>>, vector<1x64xf32>
    %c0_155 = arith.constant 0 : index
    %c0_156 = arith.constant 0 : index
    %825 = vector.load %arg8[%c0_155, %c0_156] : memref<1x64xf32, #tpu.memory_space<vmem>>, vector<1x64xf32>
    %cst_157 = arith.constant 9.99999974E-6 : f32
    %826 = vector.broadcast %cst_157 : f32 to vector<1x64xf32>
    %827 = arith.addf %825, %826 : vector<1x64xf32>
    %828 = math.rsqrt %827 : vector<1x64xf32>
    %829 = arith.mulf %824, %828 : vector<1x64xf32>
    %c0_158 = arith.constant 0 : index
    %c0_159 = arith.constant 0 : index
    %830 = vector.load %arg6[%c0_158, %c0_159] : memref<1x64xf32, #tpu.memory_space<vmem>>, vector<1x64xf32>
    %c0_160 = arith.constant 0 : index
    %c0_161 = arith.constant 0 : index
    %831 = vector.load %arg7[%c0_160, %c0_161] : memref<1x64xf32, #tpu.memory_space<vmem>>, vector<1x64xf32>
    %832 = arith.mulf %831, %829 : vector<1x64xf32>
    %833 = arith.subf %830, %832 : vector<1x64xf32>
    %834 = vector.broadcast %829 : vector<1x64xf32> to vector<8x64xf32>
    %835 = arith.mulf %823, %834 : vector<8x64xf32>
    %836 = vector.broadcast %833 : vector<1x64xf32> to vector<8x64xf32>
    %837 = arith.addf %835, %836 : vector<8x64xf32>
    %838 = arith.truncf %837 : vector<8x64xf32> to vector<8x64xbf16>
    %c0_162 = arith.constant 0 : index
    %c0_163 = arith.constant 0 : index
    %839 = vector.load %arg9[%c0_162, %c0_163] : memref<64x32xbf16, #tpu.memory_space<vmem>>, vector<64x32xbf16>
    %cst_164 = arith.constant dense<0.000000e+00> : vector<8x32xf32>
    %840 = tpu.matmul %838, %839, %cst_164 {dimension_numbers = #tpu.dot_dimension_numbers<[1], [0], [0], [1], [0, 0, 1, 1], [], []>} : vector<8x64xbf16>, vector<64x32xbf16>, vector<8x32xf32> -> vector<8x32xf32>
    %c0_165 = arith.constant 0 : index
    %c0_166 = arith.constant 0 : index
    %841 = vector.load %arg10[%c0_165, %c0_166] : memref<1x32xf32, #tpu.memory_space<vmem>>, vector<1x32xf32>
    %842 = vector.broadcast %841 : vector<1x32xf32> to vector<8x32xf32>
    %843 = arith.addf %840, %842 : vector<8x32xf32>
    %cst_167 = arith.constant 0.000000e+00 : f32
    %844 = vector.broadcast %cst_167 : f32 to vector<8x32xf32>
    %845 = arith.maximumf %843, %844 : vector<8x32xf32>
    %846 = arith.truncf %845 : vector<8x32xf32> to vector<8x32xbf16>
    %c0_168 = arith.constant 0 : index
    %c0_169 = arith.constant 0 : index
    %847 = vector.load %arg11[%c0_168, %c0_169] : memref<32x128xbf16, #tpu.memory_space<vmem>>, vector<32x128xbf16>
    %cst_170 = arith.constant dense<0.000000e+00> : vector<8x128xf32>
    %848 = tpu.matmul %846, %847, %cst_170 {dimension_numbers = #tpu.dot_dimension_numbers<[1], [0], [0], [1], [0, 0, 1, 1], [], []>} : vector<8x32xbf16>, vector<32x128xbf16>, vector<8x128xf32> -> vector<8x128xf32>
    %c0_171 = arith.constant 0 : index
    %c0_172 = arith.constant 0 : index
    %849 = vector.load %arg12[%c0_171, %c0_172] : memref<1x128xf32, #tpu.memory_space<vmem>>, vector<1x128xf32>
    %850 = vector.broadcast %849 : vector<1x128xf32> to vector<8x128xf32>
    %851 = arith.addf %848, %850 : vector<8x128xf32>
    %cst_173 = arith.constant dense<0xFF800000> : vector<8xf32>
    %852 = vector.multi_reduction <maximumf>, %851, %cst_173 [1] : vector<8x128xf32> to vector<8xf32>
    %853 = vector.shape_cast %852 : vector<8xf32> to vector<8x1xf32>
    %854 = vector.broadcast %853 : vector<8x1xf32> to vector<8x128xf32>
    %855 = arith.subf %851, %854 : vector<8x128xf32>
    %856 = math.exp %855 : vector<8x128xf32>
    %cst_174 = arith.constant dense<0.000000e+00> : vector<8xf32>
    %857 = vector.multi_reduction <add>, %856, %cst_174 [1] : vector<8x128xf32> to vector<8xf32>
    %858 = vector.shape_cast %857 : vector<8xf32> to vector<8x1xf32>
    %859 = math.log %858 : vector<8x1xf32>
    %860 = arith.addf %859, %853 : vector<8x1xf32>
    %861 = vector.broadcast %860 : vector<8x1xf32> to vector<8x128xf32>
    %862 = arith.subf %851, %861 : vector<8x128xf32>
    %c0_175 = arith.constant 0 : index
    %c0_176 = arith.constant 0 : index
    %863 = vector.load %arg13[%c0_175, %c0_176] : memref<8x128xf32, #tpu.memory_space<vmem>>, vector<8x128xf32>
    tpu.vector_store %arg13[%c0_175, %c0_176], %862 {strides = array<i32>} : memref<8x128xf32, #tpu.memory_space<vmem>>, vector<8x128xf32>,
    return
  }
  func.func @transform_0(%arg0: i32) -> (i32, i32, i32) {
    %c0_i32 = arith.constant 0 : i32
    %c0_i32_0 = arith.constant 0 : i32
    %c0_i32_1 = arith.constant 0 : i32
    return %c0_i32, %arg0, %c0_i32_0 : i32, i32, i32
  }
  func.func @transform_1(%arg0: i32) -> (i32, i32) {
    %c0_i32 = arith.constant 0 : i32
    %c0_i32_0 = arith.constant 0 : i32
    %c0_i32_1 = arith.constant 0 : i32
    return %c0_i32, %c0_i32_0 : i32, i32
  }
  func.func @transform_2(%arg0: i32) -> (i32, i32) {
    %c0_i32 = arith.constant 0 : i32
    %c0_i32_0 = arith.constant 0 : i32
    %c0_i32_1 = arith.constant 0 : i32
    return %c0_i32, %c0_i32_0 : i32, i32
  }
  func.func @transform_3(%arg0: i32) -> (i32, i32) {
    %c0_i32 = arith.constant 0 : i32
    %c0_i32_0 = arith.constant 0 : i32
    %c0_i32_1 = arith.constant 0 : i32
    return %c0_i32, %c0_i32_0 : i32, i32
  }
  func.func @transform_4(%arg0: i32) -> (i32, i32) {
    %c0_i32 = arith.constant 0 : i32
    %c0_i32_0 = arith.constant 0 : i32
    %c0_i32_1 = arith.constant 0 : i32
    return %c0_i32, %c0_i32_0 : i32, i32
  }
  func.func @transform_5(%arg0: i32) -> (i32, i32) {
    %c0_i32 = arith.constant 0 : i32
    %c0_i32_0 = arith.constant 0 : i32
    %c0_i32_1 = arith.constant 0 : i32
    return %c0_i32, %c0_i32_0 : i32, i32
  }
  func.func @transform_6(%arg0: i32) -> (i32, i32) {
    %c0_i32 = arith.constant 0 : i32
    %c0_i32_0 = arith.constant 0 : i32
    %c0_i32_1 = arith.constant 0 : i32
    return %c0_i32, %c0_i32_0 : i32, i32
  }
  func.func @transform_7(%arg0: i32) -> (i32, i32) {
    %c0_i32 = arith.constant 0 : i32
    %c0_i32_0 = arith.constant 0 : i32
    %c0_i32_1 = arith.constant 0 : i32
    return %c0_i32, %c0_i32_0 : i32, i32
  }
  func.func @transform_8(%arg0: i32) -> (i32, i32) {
    %c0_i32 = arith.constant 0 : i32
    %c0_i32_0 = arith.constant 0 : i32
    %c0_i32_1 = arith.constant 0 : i32
    return %c0_i32, %c0_i32_0 : i32, i32
  }
  func.func @transform_9(%arg0: i32) -> (i32, i32) {
    %c0_i32 = arith.constant 0 : i32
    %c0_i32_0 = arith.constant 0 : i32
    %c0_i32_1 = arith.constant 0 : i32
    return %c0_i32, %c0_i32_0 : i32, i32
  }
  func.func @transform_10(%arg0: i32) -> (i32, i32) {
    %c0_i32 = arith.constant 0 : i32
    %c0_i32_0 = arith.constant 0 : i32
    %c0_i32_1 = arith.constant 0 : i32
    return %c0_i32, %c0_i32_0 : i32, i32
  }
  func.func @transform_11(%arg0: i32) -> (i32, i32) {
    %c0_i32 = arith.constant 0 : i32
    %c0_i32_0 = arith.constant 0 : i32
    %c0_i32_1 = arith.constant 0 : i32
    return %c0_i32, %c0_i32_0 : i32, i32
  }
  func.func @transform_12(%arg0: i32) -> (i32, i32) {
    %c0_i32 = arith.constant 0 : i32
    %c0_i32_0 = arith.constant 0 : i32
    return %arg0, %c0_i32 : i32, i32
  }
}

</mosaic_0001>

<bundles_post_ra>
// kernel: rnn_forward.1
= control target key start
LH: loop header
LB: loop body
LE: loop exit
PB: predicated region body
PF: predicated region fallthrough
CT: control target
= control target key end

     0   :  { %v4156_v1 = vmov 0   ;;  %vm169_vm0 = vcmask 1045504   ;;  %vm126_vm1 = vcmask 228352   ;;  %v98_v17 = vlaneseq  ;;  %s4143_s2 = inlined_call_operand.vmem [shape: bf16[64,256], index: 2, kind: input, shape index: {}]   ;;  %s4144_s1 = inlined_call_operand.vmem [shape: bf16[28,256], index: 1, kind: input, shape index: {}]   ;;  %s4145_s0 = inlined_call_operand.vmem [shape: f32[28,8,28], index: 0, kind: input, shape index: {}]   ;;  %s4146_s3 = inlined_call_operand.vmem [shape: f32[1,256], index: 3, kind: input, shape index: {}]   ;;  %s4147_s7 = inlined_call_operand.vmem [shape: f32[1,64], index: 7, kind: input, shape index: {}]   ;;  %s4148_s4 = inlined_call_operand.vmem [shape: f32[1,64], index: 4, kind: input, shape index: {}]   ;;  %s4149_s6 = inlined_call_operand.vmem [shape: f32[1,64], index: 6, kind: input, shape index: {}]   ;;  %s4150_s5 = inlined_call_operand.vmem [shape: f32[1,64], index: 5, kind: input, shape index: {}]   ;;  %s4151_s8 = inlined_call_operand.vmem [shape: bf16[64,32], index: 8, kind: input, shape index: {}]   ;;  %s4152_s10 = inlined_call_operand.vmem [shape: bf16[32,128], index: 10, kind: input, shape index: {}]   ;;  %s4153_s9 = inlined_call_operand.vmem [shape: f32[1,32], index: 9, kind: input, shape index: {}]   ;;  %s4154_s11 = inlined_call_operand.vmem [shape: f32[1,128], index: 11, kind: input, shape index: {}]   ;;  %s4155_s12 = inlined_call_operand.vmem [shape: f32[8,128], index: 12, kind: output, shape index: {}]  }
   0x1   :  { %v3318_v0 = vld [vmem:[%s4143_s2 + $0x4] ss:$8 sps:$4 sm:$0xff]   ;;  %208 = vmatprep.mubr.bf16.mxu0 %v4156_v1  ;;  %483 = vmatprep.mubr.bf16.mxu1 %v4156_v1  ;;  %v3325_v2 = vld [vmem:[%s4143_s2] ss:$8 sps:$4 sm:$0xff]   ;;  %v3338_v5 = vld [vmem:[%s4143_s2 + $0x14] ss:$8 sps:$4 sm:$0xff]  }
   0x2   :  { %451 = vmatprep.subr.bf16.mxu1 %v3318_v0  ;;  %v2867_v3 = vld [vmem:[%s4144_s1 + $0x4] ss:$8 sps:$4 sm:$0xff]   ;;  %v2869_v4 = vld [vmem:[%s4144_s1] ss:$8 sps:$4 sm:$0xff]   ;;  %v3343_v6 = vld [vmem:[%s4143_s2 + $0x10] ss:$8 sps:$4 sm:$0xff]  }
   0x3   :  { %452 = vmatpush1.bf16.msra.mxu1 %v3325_v2  ;;  %176 = vmatprep.subr.bf16.mxu0 %v2867_v3  ;;  %v2873_v7 = vld [vmem:[%s4144_s1 + $0x14] ss:$8 sps:$4 sm:$0x3f]   ;;  %v2875_v8 = vld [vmem:[%s4144_s1 + $0x10] ss:$8 sps:$4 sm:$0x3f]  }
   0x4   :  { %177 = vmatpush1.bf16.msra.mxu0 %v2869_v4  ;;  %453 = vmatprep.subr.bf16.mxu1 %v3338_v5  ;;  %v3355_v9 = vld [vmem:[%s4143_s2 + $0x24] ss:$8 sps:$4 sm:$0xff]   ;;  %v3360_v10 = vld [vmem:[%s4143_s2 + $0x20] ss:$8 sps:$4 sm:$0xff]   ;;  %v171_v12 = vsel %vm169_vm0, %v2875_v8, 0  ;;  %v99_v18 = vshrl.u32 %v98_v17, 7 }
   0x5   :  { %2716 = vmatprep.subr.msk.bf16.mxu0 %vm169_vm0, %v2873_v7  ;;  %v54_v11 = vld [vmem:[%s4145_s0] sm:$0xff]  ;;  %v55_v13 = vld [vmem:[%s4145_s0 + $0x8] sm:$0xff]  ;;  %v3373_v15 = vld [vmem:[%s4143_s2 + $0x34] ss:$8 sps:$4 sm:$0xff]   ;;  %vm447_vm2 = vcmask 523264   ;;  %vm3249_vm3 = vmmov 0  }
   0x6   :  { %v82_v14 = vpack.c.bf16 %v55_v13, %v54_v11  ;;  %v3380_v16 = vld [vmem:[%s4143_s2 + $0x30] ss:$8 sps:$4 sm:$0xff]   ;;  %v3405_v19 = vsub.s32 0, %v99_v18  ;;  %v96_v20 = vld [vmem:[%s4146_s3] sm:$0x3]  ;;  %v104_v21 = vsub.s32 1, %v99_v18 }
   0x7   :  { %454 = vmatpush1.bf16.msra.mxu1 %v3343_v6  ;;  %s3247_s3 = smov 64   ;;  %v56_v8 = vld [vmem:[%s4145_s0 + $0x10] sm:$0xff]  ;;  %v57_v11 = vld [vmem:[%s4145_s0 + $0x18] sm:$0xff]  ;;  %vm2652_vm4 = vcmask 261120  }
   0x8   :  { %455 = vmatprep.subr.bf16.mxu1 %v3355_v9  ;;  %179 = vmatpush1.bf16.msra.mxu0 %v171_v12  ;;  %v3411_v22 = vrot.slane %v96_v20, %v3405_v19  ;;  %v3413_v24 = vrot.slane %v96_v20, %v104_v21  ;;  %v83_v12 = vpack.c.bf16 %v57_v11, %v56_v8 }
   0x9   :  { %969 = vmatprep.subr.bf16.mxu0 %v3318_v0 }
   0xb   :  { %456 = vmatpush1.bf16.msra.mxu1 %v3360_v10  ;;  %2717 = vmatmul.mubr.msk.bf16.vlgmr.msra.gmra.mrb[0].mxu0 %vm126_vm1, %v82_v14 }
   0xc   :  { %457 = vmatprep.subr.bf16.mxu1 %v3373_v15  ;;  %218 = vmatprep.mubr.bf16.mxu0 %v4156_v1 }
   0xd   :  { %970 = vmatpush1.bf16.msra.mxu0 %v3325_v2 }
   0xe   :  { %971 = vmatprep.subr.bf16.mxu0 %v3338_v5 }
   0xf   :  { %458 = vmatpush1.bf16.msra.mxu1 %v3380_v16 }
  0x10   :  { %525 = vmatprep.subr.bf16.mxu1 %v3318_v0 }
  0x11   :  { %972 = vmatpush1.bf16.msra.mxu0 %v3343_v6 }
  0x12   :  { %484 = vmatmul.mubr.bf16.vlgmr.msra.gmra.mrb[0].mxu1 %v4156_v1  ;;  %973 = vmatprep.subr.bf16.mxu0 %v3355_v9 }
  0x13   :  { %526 = vmatpush1.bf16.msra.mxu1 %v3325_v2  ;;  %557 = vmatprep.mubr.bf16.mxu1 %v4156_v1 }
  0x14   :  { %527 = vmatprep.subr.bf16.mxu1 %v3338_v5  ;;  %2718 = vmatmul.mubr.msk.bf16.gmra.mrb[4].mxu0 %vm126_vm1, %v83_v12 }
  0x15   :  { %974 = vmatpush1.bf16.msra.mxu0 %v3360_v10  ;;  %228 = vmatprep.mubr.bf16.mxu0 %v4156_v1 }
  0x16   :  { %975 = vmatprep.subr.bf16.mxu0 %v3373_v15 }
  0x17   :  { %528 = vmatpush1.bf16.msra.mxu1 %v3343_v6 }
  0x18   :  { %529 = vmatprep.subr.bf16.mxu1 %v3355_v9 }
  0x19   :  { %976 = vmatpush1.bf16.msra.mxu0 %v3380_v16 }
  0x1a   :  { %1117 = vmatprep.subr.bf16.mxu0 %v3318_v0 }
  0x1b   :  { %530 = vmatpush1.bf16.msra.mxu1 %v3360_v10 }
  0x1c   :  { %531 = vmatprep.subr.bf16.mxu1 %v3373_v15 }
  0x1f   :  { %532 = vmatpush1.bf16.msra.mxu1 %v3380_v16 }
  0x20   :  { %599 = vmatprep.subr.bf16.mxu1 %v3318_v0 }
  0xde   :  { %v210_v23 = vpop.f32.mrb[0].mxu0 }
  0xdf   :  { %v212_v25 = vpop.f32.mrb[1].mxu0  ;;  %v211_v27 = vadd.f32 %v210_v23, %v3411_v22 }
  0xe0   :  { %v214_v26 = vpop.f32.mrb[2].mxu0  ;;  %v213_v29 = vadd.f32 %v212_v25, %v3413_v24 }
  0xe1   :  { %v216_v28 = vpop.f32.mrb[3].mxu0  ;;  %v215_v53 = vadd.f32 %v214_v26, %v3411_v22 }
  0xe2   :  { %v217_v54 = vadd.f32 %v216_v28, %v3413_v24 }
  0xe5   :  { %v485_v30 = vpop.f32.mrb[0].mxu1 }
  0xe6   :  { %v492_v31 = vadd.f32 %v485_v30, %v211_v27  ;;  %v487_v32 = vpop.f32.mrb[1].mxu1 }
  0xe7   :  { %v493_v33 = vadd.f32 %v487_v32, %v213_v29  ;;  %v489_v34 = vpop.f32.mrb[2].mxu1  ;;  %v220_v28 = vpop.f32.mrb[4].mxu0 }
  0xe8   :  { %v2739_v35 = vmul.f32 -1.442695, %v492_v31  ;;  %v490_v36 = vpop.f32.mrb[3].mxu1  ;;  %v222_v29 = vpop.f32.mrb[5].mxu0 }
  0xe9   :  { %v2740_v42 = vmul.f32 -1.442695, %v493_v33  ;;  %v224_v30 = vpop.f32.mrb[6].mxu0  ;;  %v223_v34 = vadd.f32 %v222_v29, %v3413_v24 }
  0xea   :  { %2888 = vpow2.f32 %v2739_v35  ;;  %v226_v31 = vpop.f32.mrb[7].mxu0 }
  0xeb   :  { %2890 = vtanh.f32 %v493_v33  ;;  %v221_v33 = vadd.f32 %v220_v28, %v3411_v22 }
  0xf4   :  { %v2889_v37 = vpop.eup %2888 }
  0xf5   :  { %v497_v38 = vadd.f32 1.0, %v2889_v37  ;;  %v2891_v39 = vpop.eup %2890 }
  0xf7   :  { %2892 = vrcp.f32 %v497_v38 }
  0xf8   :  { %2894 = vpow2.f32 %v2740_v42 }
 0x101   :  { %v2893_v40 = vpop.eup %2892 }
 0x102   :  { %v508_v41 = vmul.f32 %v2893_v40, %v2891_v39  ;;  %v2895_v43 = vpop.eup %2894  ;;  %v507_v45 = vmul.f32 0.0, %v2893_v40 }
 0x103   :  { %v504_v44 = vadd.f32 1.0, %v2895_v43 }
 0x104   :  { %510 = vrot.lane.b32.xlu0 %v508_v41, %s3247_s3 }
 0x105   :  { %2896 = vrcp.f32 %v504_v44 }
 0x10f   :  { %v2897_v48 = vpop.eup %2896 }
 0x176   :  { %v511_v46 = vpop.permute.xlu0 %510 }
 0x177   :  { %v513_v47 = vadd.f32 %v511_v46, %v507_v45 }
 0x179   :  { %2898 = vtanh.f32 %v513_v47 }
 0x183   :  { %v2899_v49 = vpop.eup %2898 }
 0x184   :  { %v515_v50 = vmul.f32 %v2899_v49, %v2897_v48 }
 0x186   :  { %v518_v51 = vpack.c.bf16 %v515_v50, %v515_v50 }
 0x188   :  { %520 = vrot.lane.b32.xlu0 %v518_v51, %s3247_s3 }
 0x1fa   :  { %v521_v52 = vpop.permute.xlu0 %520 }
 0x1fb   :  { %2741 = vmatmul.mubr.msk.bf16.vlgmr.msra.gmra.mrb[4].mxu1 %vm447_vm2, %v521_v52 }
 0x1fc   :  { %600 = vmatpush1.bf16.msra.mxu1 %v3325_v2  ;;  %631 = vmatprep.mubr.bf16.mxu1 %v4156_v1 }
 0x1fd   :  { %601 = vmatprep.subr.bf16.mxu1 %v3338_v5 }
 0x200   :  { %602 = vmatpush1.bf16.msra.mxu1 %v3343_v6 }
 0x201   :  { %603 = vmatprep.subr.bf16.mxu1 %v3355_v9 }
 0x204   :  { %604 = vmatpush1.bf16.msra.mxu1 %v3360_v10 }
 0x205   :  { %605 = vmatprep.subr.bf16.mxu1 %v3373_v15 }
 0x208   :  { %606 = vmatpush1.bf16.msra.mxu1 %v3380_v16 }
 0x209   :  { %673 = vmatprep.subr.bf16.mxu1 %v3318_v0 }
 0x2ce   :  { %v559_v55 = vpop.f32.mrb[4].mxu1 }
 0x2cf   :  { %v566_v56 = vadd.f32 %v559_v55, %v215_v53  ;;  %v561_v57 = vpop.f32.mrb[5].mxu1 }
 0x2d0   :  { %v567_v58 = vadd.f32 %v561_v57, %v217_v54  ;;  %v563_v59 = vpop.f32.mrb[6].mxu1 }
 0x2d1   :  { %v2742_v60 = vmul.f32 -1.442695, %v566_v56  ;;  %v564_v61 = vpop.f32.mrb[7].mxu1  ;;  %v227_v59 = vadd.f32 %v226_v31, %v3413_v24 }
 0x2d2   :  { %v2743_v13 = vmul.f32 -1.442695, %v567_v58 }
 0x2d3   :  { %2900 = vpow2.f32 %v2742_v60 }
 0x2d4   :  { %2902 = vtanh.f32 %v567_v58  ;;  %v225_v58 = vadd.f32 %v224_v30, %v3411_v22 }
 0x2dd   :  { %v2901_v62 = vpop.eup %2900 }
 0x2de   :  { %v571_v63 = vadd.f32 1.0, %v2901_v62  ;;  %v2903_v3 = vpop.eup %2902 }
 0x2e0   :  { %2904 = vrcp.f32 %v571_v63 }
 0x2e1   :  { %2906 = vpow2.f32 %v2743_v13 }
 0x2ea   :  { %v2905_v4 = vpop.eup %2904 }
 0x2eb   :  { %v582_v7 = vmul.f32 %v2905_v4, %v2903_v3  ;;  %v2907_v14 = vpop.eup %2906  ;;  %v581_v18 = vmul.f32 %v2905_v4, %v513_v47 }
 0x2ec   :  { %v578_v17 = vadd.f32 1.0, %v2907_v14 }
 0x2ed   :  { %584 = vrot.lane.b32.xlu1 %v582_v7, %s3247_s3 }
 0x2ee   :  { %2908 = vrcp.f32 %v578_v17  ;;  %v58_v17 = vld [vmem:[%s4145_s0 + $0x20] sm:$0xff] }
 0x2f8   :  { %v2909_v23 = vpop.eup %2908 }
 0x35f   :  { %v585_v20 = vpop.permute.xlu1 %584 }
 0x360   :  { %v587_v21 = vadd.f32 %v585_v20, %v581_v18  ;;  %v59_v18 = vld [vmem:[%s4145_s0 + $0x28] sm:$0xff] }
 0x361   :  { %v84_v20 = vpack.c.bf16 %v59_v18, %v58_v17 }
 0x362   :  { %2910 = vtanh.f32 %v587_v21 }
 0x363   :  { %2719 = vmatmul.mubr.msk.bf16.gmra.mrb[8].mxu0 %vm126_vm1, %v84_v20 }
 0x364   :  { %238 = vmatprep.mubr.bf16.mxu0 %v4156_v1 }
 0x36c   :  { %v2911_v25 = vpop.eup %2910 }
 0x36d   :  { %v589_v26 = vmul.f32 %v2911_v25, %v2909_v23 }
 0x36f   :  { %v592_v27 = vpack.c.bf16 %v589_v26, %v589_v26 }
 0x371   :  { %594 = vrot.lane.b32.xlu1 %v592_v27, %s3247_s3 }
 0x3e3   :  { %v595_v32 = vpop.permute.xlu1 %594 }
 0x3e4   :  { %2744 = vmatmul.mubr.msk.bf16.vlgmr.msra.gmra.mrb[8].mxu1 %vm447_vm2, %v595_v32 }
 0x3e5   :  { %674 = vmatpush1.bf16.msra.mxu1 %v3325_v2  ;;  %705 = vmatprep.mubr.bf16.mxu1 %v4156_v1 }
 0x3e6   :  { %675 = vmatprep.subr.bf16.mxu1 %v3338_v5 }
 0x3e9   :  { %676 = vmatpush1.bf16.msra.mxu1 %v3343_v6 }
 0x3ea   :  { %677 = vmatprep.subr.bf16.mxu1 %v3355_v9 }
 0x3ed   :  { %678 = vmatpush1.bf16.msra.mxu1 %v3360_v10 }
 0x3ee   :  { %679 = vmatprep.subr.bf16.mxu1 %v3373_v15 }
 0x3f1   :  { %680 = vmatpush1.bf16.msra.mxu1 %v3380_v16 }
 0x3f2   :  { %747 = vmatprep.subr.bf16.mxu1 %v3318_v0 }
 0x4b7   :  { %v633_v35 = vpop.f32.mrb[8].mxu1 }
 0x4b8   :  { %v640_v36 = vadd.f32 %v633_v35, %v221_v33  ;;  %v635_v37 = vpop.f32.mrb[9].mxu1  ;;  %v230_v33 = vpop.f32.mrb[8].mxu0 }
 0x4b9   :  { %v641_v38 = vadd.f32 %v635_v37, %v223_v34  ;;  %v637_v39 = vpop.f32.mrb[10].mxu1  ;;  %v232_v34 = vpop.f32.mrb[9].mxu0 }
 0x4ba   :  { %v2745_v40 = vmul.f32 -1.442695, %v640_v36  ;;  %v638_v41 = vpop.f32.mrb[11].mxu1  ;;  %v234_v35 = vpop.f32.mrb[10].mxu0  ;;  %v233_v39 = vadd.f32 %v232_v34, %v3413_v24 }
 0x4bb   :  { %v2746_v47 = vmul.f32 -1.442695, %v641_v38  ;;  %v236_v36 = vpop.f32.mrb[11].mxu0 }
 0x4bc   :  { %2912 = vpow2.f32 %v2745_v40 }
 0x4bd   :  { %2914 = vtanh.f32 %v641_v38  ;;  %v231_v38 = vadd.f32 %v230_v33, %v3411_v22 }
 0x4c6   :  { %v2913_v42 = vpop.eup %2912 }
 0x4c7   :  { %v645_v43 = vadd.f32 1.0, %v2913_v42  ;;  %v2915_v44 = vpop.eup %2914 }
 0x4c9   :  { %2916 = vrcp.f32 %v645_v43 }
 0x4ca   :  { %2918 = vpow2.f32 %v2746_v47 }
 0x4d3   :  { %v2917_v45 = vpop.eup %2916 }
 0x4d4   :  { %v656_v46 = vmul.f32 %v2917_v45, %v2915_v44  ;;  %v2919_v48 = vpop.eup %2918  ;;  %v655_v50 = vmul.f32 %v2917_v45, %v587_v21 }
 0x4d5   :  { %v652_v49 = vadd.f32 1.0, %v2919_v48 }
 0x4d6   :  { %658 = vrot.lane.b32.xlu0 %v656_v46, %s3247_s3 }
 0x4d7   :  { %2920 = vrcp.f32 %v652_v49 }
 0x4e1   :  { %v2921_v53 = vpop.eup %2920 }
 0x548   :  { %v659_v51 = vpop.permute.xlu0 %658 }
 0x549   :  { %v661_v52 = vadd.f32 %v659_v51, %v655_v50 }
 0x54b   :  { %2922 = vtanh.f32 %v661_v52 }
 0x555   :  { %v2923_v54 = vpop.eup %2922 }
 0x556   :  { %v663_v55 = vmul.f32 %v2923_v54, %v2921_v53 }
 0x558   :  { %v666_v56 = vpack.c.bf16 %v663_v55, %v663_v55 }
 0x55a   :  { %668 = vrot.lane.b32.xlu1 %v666_v56, %s3247_s3 }
 0x5cc   :  { %v669_v57 = vpop.permute.xlu1 %668 }
 0x5cd   :  { %2747 = vmatmul.mubr.msk.bf16.vlgmr.msra.gmra.mrb[12].mxu1 %vm447_vm2, %v669_v57 }
 0x5ce   :  { %748 = vmatpush1.bf16.msra.mxu1 %v3325_v2  ;;  %779 = vmatprep.mubr.bf16.mxu1 %v4156_v1 }
 0x5cf   :  { %749 = vmatprep.subr.bf16.mxu1 %v3338_v5 }
 0x5d2   :  { %750 = vmatpush1.bf16.msra.mxu1 %v3343_v6 }
 0x5d3   :  { %751 = vmatprep.subr.bf16.mxu1 %v3355_v9 }
 0x5d6   :  { %752 = vmatpush1.bf16.msra.mxu1 %v3360_v10 }
 0x5d7   :  { %753 = vmatprep.subr.bf16.mxu1 %v3373_v15 }
 0x5da   :  { %754 = vmatpush1.bf16.msra.mxu1 %v3380_v16 }
 0x5db   :  { %821 = vmatprep.subr.bf16.mxu1 %v3318_v0 }
 0x6a0   :  { %v707_v60 = vpop.f32.mrb[12].mxu1 }
 0x6a1   :  { %v714_v61 = vadd.f32 %v707_v60, %v225_v58  ;;  %v709_v62 = vpop.f32.mrb[13].mxu1 }
 0x6a2   :  { %v715_v63 = vadd.f32 %v709_v62, %v227_v59  ;;  %v711_v3 = vpop.f32.mrb[14].mxu1 }
 0x6a3   :  { %v2748_v4 = vmul.f32 -1.442695, %v714_v61  ;;  %v712_v7 = vpop.f32.mrb[15].mxu1  ;;  %v237_v3 = vadd.f32 %v236_v36, %v3413_v24 }
 0x6a4   :  { %v2749_v21 = vmul.f32 -1.442695, %v715_v63 }
 0x6a5   :  { %2924 = vpow2.f32 %v2748_v4 }
 0x6a6   :  { %2926 = vtanh.f32 %v715_v63  ;;  %v235_v63 = vadd.f32 %v234_v35, %v3411_v22 }
 0x6af   :  { %v2925_v8 = vpop.eup %2924 }
 0x6b0   :  { %v719_v11 = vadd.f32 1.0, %v2925_v8  ;;  %v2927_v12 = vpop.eup %2926 }
 0x6b2   :  { %2928 = vrcp.f32 %v719_v11 }
 0x6b3   :  { %2930 = vpow2.f32 %v2749_v21 }
 0x6bc   :  { %v2929_v13 = vpop.eup %2928 }
 0x6bd   :  { %v730_v14 = vmul.f32 %v2929_v13, %v2927_v12  ;;  %v2931_v23 = vpop.eup %2930  ;;  %v729_v26 = vmul.f32 %v2929_v13, %v661_v52 }
 0x6be   :  { %v726_v25 = vadd.f32 1.0, %v2931_v23 }
 0x6bf   :  { %732 = vrot.lane.b32.xlu0 %v730_v14, %s3247_s3 }
 0x6c0   :  { %2932 = vrcp.f32 %v726_v25  ;;  %v60_v25 = vld [vmem:[%s4145_s0 + $0x30] sm:$0xff] }
 0x6ca   :  { %v2933_v29 = vpop.eup %2932 }
 0x731   :  { %v733_v27 = vpop.permute.xlu0 %732 }
 0x732   :  { %v735_v28 = vadd.f32 %v733_v27, %v729_v26  ;;  %v61_v26 = vld [vmem:[%s4145_s0 + $0x38] sm:$0xff] }
 0x733   :  { %v85_v27 = vpack.c.bf16 %v61_v26, %v60_v25  ;;  %v76_v26 = vld [vmem:[%s4145_s0 + $0xb0] sm:$0xff] }
 0x734   :  { %2934 = vtanh.f32 %v735_v28 }
 0x735   :  { %2720 = vmatmul.mubr.msk.bf16.gmra.mrb[12].mxu0 %vm126_vm1, %v85_v27  ;;  %v77_v27 = vld [vmem:[%s4145_s0 + $0xb8] sm:$0xff] }
 0x736   :  { %248 = vmatprep.mubr.bf16.mxu0 %v4156_v1 }
 0x73e   :  { %v2935_v30 = vpop.eup %2934 }
 0x73f   :  { %v737_v31 = vmul.f32 %v2935_v30, %v2933_v29 }
 0x741   :  { %v740_v32 = vpack.c.bf16 %v737_v31, %v737_v31 }
 0x743   :  { %742 = vrot.lane.b32.xlu1 %v740_v32, %s3247_s3 }
 0x7b5   :  { %v743_v37 = vpop.permute.xlu1 %742 }
 0x7b6   :  { %2750 = vmatmul.mubr.msk.bf16.vlgmr.msra.gmra.mrb[16].mxu1 %vm447_vm2, %v743_v37 }
 0x7b7   :  { %822 = vmatpush1.bf16.msra.mxu1 %v3325_v2  ;;  %853 = vmatprep.mubr.bf16.mxu1 %v4156_v1 }
 0x7b8   :  { %823 = vmatprep.subr.bf16.mxu1 %v3338_v5 }
 0x7bb   :  { %824 = vmatpush1.bf16.msra.mxu1 %v3343_v6 }
 0x7bc   :  { %825 = vmatprep.subr.bf16.mxu1 %v3355_v9 }
 0x7bf   :  { %826 = vmatpush1.bf16.msra.mxu1 %v3360_v10 }
 0x7c0   :  { %827 = vmatprep.subr.bf16.mxu1 %v3373_v15 }
 0x7c3   :  { %828 = vmatpush1.bf16.msra.mxu1 %v3380_v16 }
 0x7c4   :  { %895 = vmatprep.subr.bf16.mxu1 %v3318_v0 }
 0x889   :  { %v781_v40 = vpop.f32.mrb[16].mxu1 }
 0x88a   :  { %v788_v41 = vadd.f32 %v781_v40, %v231_v38  ;;  %v783_v42 = vpop.f32.mrb[17].mxu1  ;;  %v240_v38 = vpop.f32.mrb[12].mxu0 }
 0x88b   :  { %v789_v43 = vadd.f32 %v783_v42, %v233_v39  ;;  %v785_v44 = vpop.f32.mrb[18].mxu1  ;;  %v242_v39 = vpop.f32.mrb[13].mxu0 }
 0x88c   :  { %v2751_v45 = vmul.f32 -1.442695, %v788_v41  ;;  %v786_v46 = vpop.f32.mrb[19].mxu1  ;;  %v3516_v40 = vpop.f32.mrb[14].mxu0  ;;  %v243_v44 = vadd.f32 %v242_v39, %v3413_v24 }
 0x88d   :  { %v2752_v52 = vmul.f32 -1.442695, %v789_v43  ;;  %v3518_v41 = vpop.f32.mrb[15].mxu0 }
 0x88e   :  { %2936 = vpow2.f32 %v2751_v45 }
 0x88f   :  { %2938 = vtanh.f32 %v789_v43  ;;  %v241_v43 = vadd.f32 %v240_v38, %v3411_v22 }
 0x898   :  { %v2937_v47 = vpop.eup %2936 }
 0x899   :  { %v793_v48 = vadd.f32 1.0, %v2937_v47  ;;  %v2939_v49 = vpop.eup %2938 }
 0x89b   :  { %2940 = vrcp.f32 %v793_v48 }
 0x89c   :  { %2942 = vpow2.f32 %v2752_v52 }
 0x8a5   :  { %v2941_v50 = vpop.eup %2940 }
 0x8a6   :  { %v804_v51 = vmul.f32 %v2941_v50, %v2939_v49  ;;  %v2943_v53 = vpop.eup %2942  ;;  %v803_v55 = vmul.f32 %v2941_v50, %v735_v28 }
 0x8a7   :  { %v800_v54 = vadd.f32 1.0, %v2943_v53 }
 0x8a8   :  { %806 = vrot.lane.b32.xlu0 %v804_v51, %s3247_s3 }
 0x8a9   :  { %2944 = vrcp.f32 %v800_v54 }
 0x8b3   :  { %v2945_v58 = vpop.eup %2944 }
 0x91a   :  { %v807_v56 = vpop.permute.xlu0 %806 }
 0x91b   :  { %v809_v57 = vadd.f32 %v807_v56, %v803_v55 }
 0x91d   :  { %2946 = vtanh.f32 %v809_v57 }
 0x927   :  { %v2947_v59 = vpop.eup %2946 }
 0x928   :  { %v811_v60 = vmul.f32 %v2947_v59, %v2945_v58  ;;  %v63_v58 = vld [vmem:[%s4145_s0 + $0x48] sm:$0xff] }
 0x92a   :  { %v814_v61 = vpack.c.bf16 %v811_v60, %v811_v60  ;;  %v64_v60 = vld [vmem:[%s4145_s0 + $0x50] sm:$0xff] }
 0x92c   :  { %816 = vrot.lane.b32.xlu1 %v814_v61, %s3247_s3  ;;  %v65_v61 = vld [vmem:[%s4145_s0 + $0x58] sm:$0xff] }
 0x99e   :  { %v817_v62 = vpop.permute.xlu1 %816 }
 0x99f   :  { %2753 = vmatmul.mubr.msk.bf16.vlgmr.msra.gmra.mrb[20].mxu1 %vm447_vm2, %v817_v62  ;;  %v87_v62 = vpack.c.bf16 %v65_v61, %v64_v60 }
 0x9a0   :  { %896 = vmatpush1.bf16.msra.mxu1 %v3325_v2  ;;  %927 = vmatprep.mubr.bf16.mxu1 %v4156_v1 }
 0x9a1   :  { %897 = vmatprep.subr.bf16.mxu1 %v3338_v5 }
 0x9a4   :  { %898 = vmatpush1.bf16.msra.mxu1 %v3343_v6 }
 0x9a5   :  { %899 = vmatprep.subr.bf16.mxu1 %v3355_v9 }
 0x9a8   :  { %900 = vmatpush1.bf16.msra.mxu1 %v3360_v10 }
 0x9a9   :  { %901 = vmatprep.subr.bf16.mxu1 %v3373_v15 }
 0x9ac   :  { %902 = vmatpush1.bf16.msra.mxu1 %v3380_v16 }
 0x9ad   :  { %1043 = vmatprep.subr.bf16.mxu1 %v3318_v0 }
 0xa72   :  { %v855_v4 = vpop.f32.mrb[20].mxu1 }
 0xa73   :  { %v862_v7 = vadd.f32 %v855_v4, %v235_v63  ;;  %v857_v8 = vpop.f32.mrb[21].mxu1  ;;  %v66_v63 = vld [vmem:[%s4145_s0 + $0x60] sm:$0xff] }
 0xa74   :  { %v863_v11 = vadd.f32 %v857_v8, %v237_v3  ;;  %v859_v12 = vpop.f32.mrb[22].mxu1  ;;  %v67_v3 = vld [vmem:[%s4145_s0 + $0x68] sm:$0xff]  ;;  %v69_v8 = vld [vmem:[%s4145_s0 + $0x78] sm:$0xff] }
 0xa75   :  { %v2754_v13 = vmul.f32 -1.442695, %v862_v7  ;;  %v860_v14 = vpop.f32.mrb[23].mxu1  ;;  %v88_v4 = vpack.c.bf16 %v67_v3, %v66_v63  ;;  %v68_v7 = vld [vmem:[%s4145_s0 + $0x70] sm:$0xff]  ;;  %v70_v12 = vld [vmem:[%s4145_s0 + $0x80] sm:$0xff] }
 0xa76   :  { %v2755_v28 = vmul.f32 -1.442695, %v863_v11 }
 0xa77   :  { %2948 = vpow2.f32 %v2754_v13  ;;  %v71_v13 = vld [vmem:[%s4145_s0 + $0x88] sm:$0xff] }
 0xa78   :  { %2950 = vtanh.f32 %v863_v11  ;;  %v89_v11 = vpack.c.bf16 %v69_v8, %v68_v7  ;;  %v90_v14 = vpack.c.bf16 %v71_v13, %v70_v12 }
 0xa81   :  { %v2949_v17 = vpop.eup %2948 }
 0xa82   :  { %v867_v18 = vadd.f32 1.0, %v2949_v17  ;;  %v2951_v20 = vpop.eup %2950  ;;  %v72_v17 = vld [vmem:[%s4145_s0 + $0x90] sm:$0xff] }
 0xa84   :  { %2952 = vrcp.f32 %v867_v18  ;;  %v73_v18 = vld [vmem:[%s4145_s0 + $0x98] sm:$0xff] }
 0xa85   :  { %2954 = vpow2.f32 %v2755_v28  ;;  %v93_v28 = vpack.c.bf16 %v77_v27, %v76_v26 }
 0xa8e   :  { %v2953_v21 = vpop.eup %2952 }
 0xa8f   :  { %v878_v23 = vmul.f32 %v2953_v21, %v2951_v20  ;;  %v2955_v29 = vpop.eup %2954  ;;  %v877_v31 = vmul.f32 %v2953_v21, %v809_v57  ;;  %v62_v57 = vld [vmem:[%s4145_s0 + $0x40] sm:$0xff]  ;;  %v91_v20 = vpack.c.bf16 %v73_v18, %v72_v17 }
 0xa90   :  { %v874_v30 = vadd.f32 1.0, %v2955_v29  ;;  %v86_v59 = vpack.c.bf16 %v63_v58, %v62_v57  ;;  %v74_v21 = vld [vmem:[%s4145_s0 + $0xa0] sm:$0xff] }
 0xa91   :  { %880 = vrot.lane.b32.xlu0 %v878_v23, %s3247_s3  ;;  %v75_v23 = vld [vmem:[%s4145_s0 + $0xa8] sm:$0xff]  ;;  %v78_v29 = vld [vmem:[%s4145_s0 + $0xc0] sm:$0xff] }
 0xa92   :  { %2956 = vrcp.f32 %v874_v30  ;;  %2721 = vmatmul.mubr.msk.bf16.gmra.mrb[16].mxu0 %vm126_vm1, %v86_v59  ;;  %v92_v25 = vpack.c.bf16 %v75_v23, %v74_v21  ;;  %v79_v30 = vld [vmem:[%s4145_s0 + $0xc8] sm:$0xff] }
 0xa93   :  { %258 = vmatprep.mubr.bf16.mxu0 %v4156_v1 }
 0xa9a   :  { %2722 = vmatmul.mubr.msk.bf16.gmra.mrb[20].mxu0 %vm126_vm1, %v87_v62 }
 0xa9b   :  { %268 = vmatprep.mubr.bf16.mxu0 %v4156_v1 }
 0xa9c   :  { %v2957_v34 = vpop.eup %2956 }
 0xaa2   :  { %2723 = vmatmul.mubr.msk.bf16.gmra.mrb[24].mxu0 %vm126_vm1, %v88_v4 }
 0xaa3   :  { %278 = vmatprep.mubr.bf16.mxu0 %v4156_v1 }
 0xaaa   :  { %2724 = vmatmul.mubr.msk.bf16.gmra.mrb[28].mxu0 %vm126_vm1, %v89_v11 }
 0xaab   :  { %288 = vmatprep.mubr.bf16.mxu0 %v4156_v1 }
 0xab2   :  { %2725 = vmatmul.mubr.msk.bf16.gmra.mrb[32].mxu0 %vm126_vm1, %v90_v14 }
 0xab3   :  { %298 = vmatprep.mubr.bf16.mxu0 %v4156_v1 }
 0xaba   :  { %2726 = vmatmul.mubr.msk.bf16.gmra.mrb[36].mxu0 %vm126_vm1, %v91_v20 }
 0xabb   :  { %308 = vmatprep.mubr.bf16.mxu0 %v4156_v1 }
 0xac2   :  { %2727 = vmatmul.mubr.msk.bf16.gmra.mrb[40].mxu0 %vm126_vm1, %v92_v25 }
 0xac3   :  { %318 = vmatprep.mubr.bf16.mxu0 %v4156_v1 }
 0xaca   :  { %2728 = vmatmul.mubr.msk.bf16.gmra.mrb[44].mxu0 %vm126_vm1, %v93_v28 }
 0xacb   :  { %328 = vmatprep.mubr.bf16.mxu0 %v4156_v1 }
 0xb03   :  { %v881_v32 = vpop.permute.xlu0 %880 }
 0xb04   :  { %v3512_v33 = vadd.f32 %v881_v32, %v877_v31  ;;  %v94_v31 = vpack.c.bf16 %v79_v30, %v78_v29  ;;  %v80_v32 = vld [vmem:[%s4145_s0 + $0xd0] sm:$0xff] }
 0xb06   :  { %2958 = vtanh.f32 %v3512_v33  ;;  %2729 = vmatmul.mubr.msk.bf16.gmra.mrb[48].mxu0 %vm126_vm1, %v94_v31 }
 0xb07   :  { %338 = vmatprep.mubr.bf16.mxu0 %v4156_v1 }
 0xb10   :  { %v2959_v35 = vpop.eup %2958 }
 0xb11   :  { %v885_v36 = vmul.f32 %v2959_v35, %v2957_v34  ;;  %v81_v34 = vld [vmem:[%s4145_s0 + $0xd8] sm:$0xff] }
 0xb12   :  { %v95_v35 = vpack.c.bf16 %v81_v34, %v80_v32  ;;  %v245_v32 = vadd.f32 %v3516_v40, %v3411_v22  ;;  %v247_v34 = vadd.f32 %v3518_v41, %v3413_v24 }
 0xb13   :  { %v888_v37 = vpack.c.bf16 %v885_v36, %v885_v36 }
 0xb14   :  { %2730 = vmatmul.mubr.msk.bf16.gmra.mrb[52].mxu0 %vm126_vm1, %v95_v35 }
 0xb15   :  { %890 = vrot.lane.b32.xlu1 %v888_v37, %s3247_s3  ;;  %1001 = vmatprep.mubr.bf16.mxu0 %v4156_v1 }
 0xb87   :  { %v891_v42 = vpop.permute.xlu1 %890 }
 0xb88   :  { %2756 = vmatmul.mubr.msk.bf16.vlgmr.msra.gmra.mrb[24].mxu1 %vm447_vm2, %v891_v42 }
 0xb89   :  { %1044 = vmatpush1.bf16.msra.mxu1 %v3325_v2  ;;  %1075 = vmatprep.mubr.bf16.mxu1 %v4156_v1 }
 0xb8a   :  { %1045 = vmatprep.subr.bf16.mxu1 %v3338_v5 }
 0xb8d   :  { %1046 = vmatpush1.bf16.msra.mxu1 %v3343_v6 }
 0xb8e   :  { %1047 = vmatprep.subr.bf16.mxu1 %v3355_v9 }
 0xb91   :  { %1048 = vmatpush1.bf16.msra.mxu1 %v3360_v10 }
 0xb92   :  { %1049 = vmatprep.subr.bf16.mxu1 %v3373_v15 }
 0xb95   :  { %1050 = vmatpush1.bf16.msra.mxu1 %v3380_v16 }
 0xb96   :  { %1191 = vmatprep.subr.bf16.mxu1 %v3318_v0 }
 0xc5b   :  { %v929_v45 = vpop.f32.mrb[24].mxu1 }
 0xc5c   :  { %v936_v46 = vadd.f32 %v929_v45, %v241_v43  ;;  %v931_v47 = vpop.f32.mrb[25].mxu1 }
 0xc5d   :  { %v937_v48 = vadd.f32 %v931_v47, %v243_v44  ;;  %v933_v49 = vpop.f32.mrb[26].mxu1 }
 0xc5e   :  { %v2757_v50 = vmul.f32 -1.442695, %v936_v46  ;;  %v934_v51 = vpop.f32.mrb[27].mxu1  ;;  %v3618_v49 = vpop.f32.mrb[16].mxu0 }
 0xc5f   :  { %v2758_v36 = vmul.f32 -1.442695, %v937_v48 }
 0xc60   :  { %2960 = vpow2.f32 %v2757_v50 }
 0xc61   :  { %2962 = vtanh.f32 %v937_v48  ;;  %v3620_v48 = vpop.f32.mrb[17].mxu0 }
 0xc62   :  { %v3622_v50 = vpop.f32.mrb[18].mxu0 }
 0xc63   :  { %v3624_v51 = vpop.f32.mrb[19].mxu0 }
 0xc6a   :  { %v2961_v52 = vpop.eup %2960 }
 0xc6b   :  { %v941_v53 = vadd.f32 1.0, %v2961_v52  ;;  %v2963_v54 = vpop.eup %2962 }
 0xc6d   :  { %2964 = vrcp.f32 %v941_v53 }
 0xc6e   :  { %2966 = vpow2.f32 %v2758_v36 }
 0xc77   :  { %v2965_v55 = vpop.eup %2964 }
 0xc78   :  { %v952_v56 = vmul.f32 %v2965_v55, %v2963_v54  ;;  %v2967_v37 = vpop.eup %2966  ;;  %v951_v39 = vmul.f32 %v2965_v55, %v3512_v33  ;;  %v3626_v33 = vpop.f32.mrb[20].mxu0 }
 0xc79   :  { %v948_v38 = vadd.f32 1.0, %v2967_v37  ;;  %v3628_v52 = vpop.f32.mrb[21].mxu0 }
 0xc7a   :  { %954 = vrot.lane.b32.xlu0 %v952_v56, %s3247_s3  ;;  %v3630_v53 = vpop.f32.mrb[22].mxu0 }
 0xc7b   :  { %2968 = vrcp.f32 %v948_v38  ;;  %v3632_v54 = vpop.f32.mrb[23].mxu0 }
 0xc7c   :  { %v3634_v55 = vpop.f32.mrb[24].mxu0 }
 0xc7d   :  { %v3636_v56 = vpop.f32.mrb[25].mxu0 }
 0xc7e   :  { %v3638_v57 = vpop.f32.mrb[26].mxu0 }
 0xc7f   :  { %v3640_v58 = vpop.f32.mrb[27].mxu0 }
 0xc80   :  { %v3642_v59 = vpop.f32.mrb[28].mxu0 }
 0xc81   :  { %v3644_v60 = vpop.f32.mrb[29].mxu0 }
 0xc82   :  { %v3646_v61 = vpop.f32.mrb[30].mxu0 }
 0xc83   :  { %v3648_v62 = vpop.f32.mrb[31].mxu0 }
 0xc84   :  { %v3654_v3 = vpop.f32.mrb[32].mxu0 }
 0xc85   :  { %v2969_v44 = vpop.eup %2968  ;;  %v3656_v4 = vpop.f32.mrb[33].mxu0 }
 0xc86   :  { %v3658_v7 = vpop.f32.mrb[34].mxu0 }
 0xc87   :  { %v3661_v8 = vpop.f32.mrb[35].mxu0 }
 0xcec   :  { %v955_v42 = vpop.permute.xlu0 %954 }
 0xced   :  { %v3614_v43 = vadd.f32 %v955_v42, %v951_v39 }
 0xcef   :  { %2970 = vtanh.f32 %v3614_v43 }
 0xcf9   :  { %v2971_v45 = vpop.eup %2970 }
 0xcfa   :  { %v959_v46 = vmul.f32 %v2971_v45, %v2969_v44 }
 0xcfc   :  { %v962_v47 = vpack.c.bf16 %v959_v46, %v959_v46 }
 0xcfe   :  { %964 = vrot.lane.b32.xlu1 %v962_v47, %s3247_s3 }
 0xd70   :  { %v965_v63 = vpop.permute.xlu1 %964 }
 0xd71   :  { %2759 = vmatmul.mubr.msk.bf16.vlgmr.msra.gmra.mrb[56].mxu0 %vm447_vm2, %v965_v63 }
 0xd72   :  { %1118 = vmatpush1.bf16.msra.mxu0 %v3325_v2  ;;  %1149 = vmatprep.mubr.bf16.mxu0 %v4156_v1  ;;  %v3666_v2 = vpop.f32.mrb[36].mxu0 }
 0xd73   :  { %1119 = vmatprep.subr.bf16.mxu0 %v3338_v5  ;;  %v3668_v11 = vpop.f32.mrb[37].mxu0 }
 0xd74   :  { %v3670_v5 = vpop.f32.mrb[38].mxu0 }
 0xd75   :  { %v3673_v12 = vpop.f32.mrb[39].mxu0 }
 0xd76   :  { %1120 = vmatpush1.bf16.msra.mxu0 %v3343_v6  ;;  %v3676_v6 = vpop.f32.mrb[40].mxu0 }
 0xd77   :  { %1121 = vmatprep.subr.bf16.mxu0 %v3355_v9  ;;  %v3678_v13 = vpop.f32.mrb[41].mxu0 }
 0xd78   :  { %v3680_v14 = vpop.f32.mrb[42].mxu0 }
 0xd79   :  { %v3682_v17 = vpop.f32.mrb[43].mxu0 }
 0xd7a   :  { %1122 = vmatpush1.bf16.msra.mxu0 %v3360_v10  ;;  %v3684_v18 = vpop.f32.mrb[44].mxu0 }
 0xd7b   :  { %1123 = vmatprep.subr.bf16.mxu0 %v3373_v15  ;;  %v3686_v20 = vpop.f32.mrb[45].mxu0 }
 0xd7c   :  { %v3688_v21 = vpop.f32.mrb[46].mxu0 }
 0xd7d   :  { %v3690_v23 = vpop.f32.mrb[47].mxu0 }
 0xd7e   :  { %1124 = vmatpush1.bf16.msra.mxu0 %v3380_v16  ;;  %v3692_v25 = vpop.f32.mrb[48].mxu0 }
 0xd7f   :  { %1265 = vmatprep.subr.bf16.mxu0 %v3318_v0  ;;  %v3694_v26 = vpop.f32.mrb[49].mxu0 }
 0xd80   :  { %v3696_v0 = vpop.f32.mrb[50].mxu0 }
 0xd81   :  { %v3698_v27 = vpop.f32.mrb[51].mxu0 }
 0xd82   :  { %v3700_v28 = vpop.f32.mrb[52].mxu0 }
 0xd83   :  { %v3702_v29 = vpop.f32.mrb[53].mxu0 }
 0xd84   :  { %v3704_v30 = vpop.f32.mrb[54].mxu0 }
 0xd85   :  { %4158 = vst [vmem:[#allocation3_spill] sm:$0xff] %v3704_v30  ;;  %v3706_v31 = vpop.f32.mrb[55].mxu0 }
 0xd86   :  { %4159 = vst [vmem:[#allocation4_spill] sm:$0xff] %v3706_v31 }
 0xe44   :  { %v1003_v35 = vpop.f32.mrb[56].mxu0 }
 0xe45   :  { %v1010_v36 = vadd.f32 %v1003_v35, %v245_v32  ;;  %v1005_v37 = vpop.f32.mrb[57].mxu0 }
 0xe46   :  { %v1011_v38 = vadd.f32 %v1005_v37, %v247_v34  ;;  %v1007_v39 = vpop.f32.mrb[58].mxu0 }
 0xe47   :  { %v2760_v42 = vmul.f32 -1.442695, %v1010_v36  ;;  %v1008_v44 = vpop.f32.mrb[59].mxu0 }
 0xe48   :  { %v2761_v40 = vmul.f32 -1.442695, %v1011_v38 }
 0xe49   :  { %2972 = vpow2.f32 %v2760_v42 }
 0xe4a   :  { %2974 = vtanh.f32 %v1011_v38  ;;  %v3732_v38 = vld [vmem:[%s4143_s2 + $0x10] ss:$8 sps:$4 sm:$0xff]  }
 0xe53   :  { %v2973_v45 = vpop.eup %2972 }
 0xe54   :  { %v1015_v46 = vadd.f32 1.0, %v2973_v45  ;;  %v2975_v47 = vpop.eup %2974  ;;  %v3742_v45 = vld [vmem:[%s4143_s2 + $0x4] ss:$8 sps:$4 sm:$0xff]  }
 0xe56   :  { %2976 = vrcp.f32 %v1015_v46  ;;  %v251_v46 = vadd.f32 %v3618_v49, %v3411_v22 }
 0xe57   :  { %2978 = vpow2.f32 %v2761_v40 }
 0xe60   :  { %v2977_v63 = vpop.eup %2976 }
 0xe61   :  { %v1026_v1 = vmul.f32 %v2977_v63, %v2975_v47  ;;  %v2979_v41 = vpop.eup %2978  ;;  %v1025_v32 = vmul.f32 %v2977_v63, %v3614_v43  ;;  %v4160_v43 = vmov 0   ;;  %v253_v47 = vadd.f32 %v3620_v48, %v3413_v24 }
 0xe62   :  { %v1022_v31 = vadd.f32 1.0, %v2979_v41 }
 0xe63   :  { %1028 = vrot.lane.b32.xlu0 %v1026_v1, %s3247_s3  ;;  %v3719_v1 = vld [vmem:[%s4143_s2] ss:$8 sps:$4 sm:$0xff]  }
 0xe64   :  { %2980 = vrcp.f32 %v1022_v31  ;;  %v3726_v31 = vld [vmem:[%s4143_s2 + $0x14] ss:$8 sps:$4 sm:$0xff]  }
 0xe6e   :  { %v2981_v36 = vpop.eup %2980 }
 0xed5   :  { %v1029_v34 = vpop.permute.xlu0 %1028 }
 0xed6   :  { %v1031_v35 = vadd.f32 %v1029_v34, %v1025_v32 }
 0xed8   :  { %2982 = vtanh.f32 %v1031_v35 }
 0xee2   :  { %v2983_v37 = vpop.eup %2982 }
 0xee3   :  { %v1033_v39 = vmul.f32 %v2983_v37, %v2981_v36 }
 0xee5   :  { %v1036_v42 = vpack.c.bf16 %v1033_v39, %v1033_v39 }
 0xee7   :  { %1038 = vrot.lane.b32.xlu1 %v1036_v42, %s3247_s3 }
 0xf59   :  { %v1039_v44 = vpop.permute.xlu1 %1038 }
 0xf5a   :  { %2762 = vmatmul.mubr.msk.bf16.vlgmr.msra.gmra.mrb[28].mxu1 %vm447_vm2, %v1039_v44 }
 0xf5b   :  { %1192 = vmatpush1.bf16.msra.mxu1 %v3719_v1  ;;  %1223 = vmatprep.mubr.bf16.mxu1 %v4160_v43 }
 0xf5c   :  { %1193 = vmatprep.subr.bf16.mxu1 %v3726_v31 }
 0xf5f   :  { %1194 = vmatpush1.bf16.msra.mxu1 %v3732_v38 }
 0xf60   :  { %1195 = vmatprep.subr.bf16.mxu1 %v3355_v9 }
 0xf63   :  { %1196 = vmatpush1.bf16.msra.mxu1 %v3360_v10 }
 0xf64   :  { %1197 = vmatprep.subr.bf16.mxu1 %v3373_v15 }
 0xf67   :  { %1198 = vmatpush1.bf16.msra.mxu1 %v3380_v16 }
 0xf68   :  { %1339 = vmatprep.subr.bf16.mxu1 %v3742_v45 }
0x102d   :  { %v1077_v9 = vpop.f32.mrb[28].mxu1 }
0x102e   :  { %v1084_v63 = vadd.f32 %v1077_v9, %v251_v46  ;;  %v1079_v10 = vpop.f32.mrb[29].mxu1 }
0x102f   :  { %v1085_v40 = vadd.f32 %v1079_v10, %v253_v47  ;;  %v1081_v15 = vpop.f32.mrb[30].mxu1 }
0x1030   :  { %v2763_v41 = vmul.f32 -1.442695, %v1084_v63  ;;  %v1082_v16 = vpop.f32.mrb[31].mxu1 }
0x1031   :  { %v2764_v49 = vmul.f32 -1.442695, %v1085_v40  ;;  %v3771_v16 = vld [vmem:[%s4143_s2 + $0x34] ss:$8 sps:$4 sm:$0xff]  }
0x1032   :  { %2984 = vpow2.f32 %v2763_v41 }
0x1033   :  { %2986 = vtanh.f32 %v1085_v40  ;;  %v3765_v40 = vld [vmem:[%s4143_s2 + $0x20] ss:$8 sps:$4 sm:$0xff]  }
0x103c   :  { %v2985_v32 = vpop.eup %2984 }
0x103d   :  { %v1089_v34 = vadd.f32 1.0, %v2985_v32  ;;  %v2987_v36 = vpop.eup %2986  ;;  %v3777_v32 = vld [vmem:[%s4143_s2 + $0x30] ss:$8 sps:$4 sm:$0xff]  }
0x103f   :  { %2988 = vrcp.f32 %v1089_v34  ;;  %v255_v34 = vadd.f32 %v3622_v50, %v3411_v22 }
0x1040   :  { %2990 = vpow2.f32 %v2764_v49 }
0x1049   :  { %v2989_v37 = vpop.eup %2988 }
0x104a   :  { %v1100_v39 = vmul.f32 %v2989_v37, %v2987_v36  ;;  %v2991_v48 = vpop.eup %2990  ;;  %v1099_v44 = vmul.f32 %v2989_v37, %v1031_v35  ;;  %v3759_v35 = vld [vmem:[%s4143_s2 + $0x24] ss:$8 sps:$4 sm:$0xff]   ;;  %v257_v36 = vadd.f32 %v3624_v51, %v3413_v24 }
0x104b   :  { %v1096_v42 = vadd.f32 1.0, %v2991_v48 }
0x104c   :  { %1102 = vrot.lane.b32.xlu0 %v1100_v39, %s3247_s3 }
0x104d   :  { %2992 = vrcp.f32 %v1096_v42 }
0x1057   :  { %v2993_v9 = vpop.eup %2992 }
0x10be   :  { %v1103_v46 = vpop.permute.xlu0 %1102 }
0x10bf   :  { %v1105_v47 = vadd.f32 %v1103_v46, %v1099_v44 }
0x10c1   :  { %2994 = vtanh.f32 %v1105_v47 }
0x10cb   :  { %v2995_v63 = vpop.eup %2994 }
0x10cc   :  { %v1107_v10 = vmul.f32 %v2995_v63, %v2993_v9 }
0x10ce   :  { %v1110_v15 = vpack.c.bf16 %v1107_v10, %v1107_v10 }
0x10d0   :  { %1112 = vrot.lane.b32.xlu1 %v1110_v15, %s3247_s3 }
0x1142   :  { %v1113_v41 = vpop.permute.xlu1 %1112 }
0x1143   :  { %2765 = vmatmul.mubr.msk.bf16.vlgmr.msra.gmra.mrb[60].mxu0 %vm447_vm2, %v1113_v41 }
0x1144   :  { %1266 = vmatpush1.bf16.msra.mxu0 %v3719_v1  ;;  %1297 = vmatprep.mubr.bf16.mxu0 %v4160_v43 }
0x1145   :  { %1267 = vmatprep.subr.bf16.mxu0 %v3726_v31 }
0x1148   :  { %1268 = vmatpush1.bf16.msra.mxu0 %v3732_v38 }
0x1149   :  { %1269 = vmatprep.subr.bf16.mxu0 %v3759_v35 }
0x114c   :  { %1270 = vmatpush1.bf16.msra.mxu0 %v3765_v40 }
0x114d   :  { %1271 = vmatprep.subr.bf16.mxu0 %v3771_v16 }
0x1150   :  { %1272 = vmatpush1.bf16.msra.mxu0 %v3777_v32 }
0x1151   :  { %1413 = vmatprep.subr.bf16.mxu0 %v3742_v45 }
0x1216   :  { %v1151_v37 = vpop.f32.mrb[60].mxu0 }
0x1217   :  { %v1158_v39 = vadd.f32 %v1151_v37, %v255_v34  ;;  %v1153_v49 = vpop.f32.mrb[61].mxu0 }
0x1218   :  { %v1159_v48 = vadd.f32 %v1153_v49, %v257_v36  ;;  %v1155_v42 = vpop.f32.mrb[62].mxu0 }
0x1219   :  { %v2766_v44 = vmul.f32 -1.442695, %v1158_v39  ;;  %v1156_v46 = vpop.f32.mrb[63].mxu0 }
0x121a   :  { %v2767_v50 = vmul.f32 -1.442695, %v1159_v48 }
0x121b   :  { %2996 = vpow2.f32 %v2766_v44 }
0x121c   :  { %2998 = vtanh.f32 %v1159_v48 }
0x1225   :  { %v2997_v9 = vpop.eup %2996 }
0x1226   :  { %v1163_v63 = vadd.f32 1.0, %v2997_v9  ;;  %v2999_v10 = vpop.eup %2998 }
0x1228   :  { %3000 = vrcp.f32 %v1163_v63 }
0x1229   :  { %3002 = vpow2.f32 %v2767_v50 }
0x1232   :  { %v3001_v15 = vpop.eup %3000 }
0x1233   :  { %v1174_v41 = vmul.f32 %v3001_v15, %v2999_v10  ;;  %v3003_v51 = vpop.eup %3002  ;;  %v1173_v34 = vmul.f32 %v3001_v15, %v1105_v47  ;;  %v263_v47 = vadd.f32 %v3628_v52, %v3413_v24 }
0x1234   :  { %v1170_v30 = vadd.f32 1.0, %v3003_v51 }
0x1235   :  { %1176 = vrot.lane.b32.xlu0 %v1174_v41, %s3247_s3 }
0x1236   :  { %3004 = vrcp.f32 %v1170_v30  ;;  %v261_v30 = vadd.f32 %v3626_v33, %v3411_v22 }
0x1240   :  { %v3005_v39 = vpop.eup %3004 }
0x12a7   :  { %v1177_v37 = vpop.permute.xlu0 %1176 }
0x12a8   :  { %v1179_v36 = vadd.f32 %v1177_v37, %v1173_v34 }
0x12aa   :  { %3006 = vtanh.f32 %v1179_v36 }
0x12b4   :  { %v3007_v49 = vpop.eup %3006 }
0x12b5   :  { %v1181_v42 = vmul.f32 %v3007_v49, %v3005_v39 }
0x12b7   :  { %v1184_v44 = vpack.c.bf16 %v1181_v42, %v1181_v42 }
0x12b9   :  { %1186 = vrot.lane.b32.xlu1 %v1184_v44, %s3247_s3 }
0x132b   :  { %v1187_v46 = vpop.permute.xlu1 %1186 }
0x132c   :  { %2768 = vmatmul.mubr.msk.bf16.vlgmr.msra.gmra.mrb[32].mxu1 %vm447_vm2, %v1187_v46 }
0x132d   :  { %1340 = vmatpush1.bf16.msra.mxu1 %v3719_v1  ;;  %1371 = vmatprep.mubr.bf16.mxu1 %v4160_v43 }
0x132e   :  { %1341 = vmatprep.subr.bf16.mxu1 %v3726_v31 }
0x1331   :  { %1342 = vmatpush1.bf16.msra.mxu1 %v3732_v38 }
0x1332   :  { %1343 = vmatprep.subr.bf16.mxu1 %v3759_v35 }
0x1335   :  { %1344 = vmatpush1.bf16.msra.mxu1 %v3765_v40 }
0x1336   :  { %1345 = vmatprep.subr.bf16.mxu1 %v3771_v16 }
0x1339   :  { %1346 = vmatpush1.bf16.msra.mxu1 %v3777_v32 }
0x133a   :  { %1487 = vmatprep.subr.bf16.mxu1 %v3742_v45 }
0x13ff   :  { %v1225_v48 = vpop.f32.mrb[32].mxu1 }
0x1400   :  { %v1232_v9 = vadd.f32 %v1225_v48, %v261_v30  ;;  %v1227_v63 = vpop.f32.mrb[33].mxu1 }
0x1401   :  { %v1233_v10 = vadd.f32 %v1227_v63, %v263_v47  ;;  %v1229_v15 = vpop.f32.mrb[34].mxu1 }
0x1402   :  { %v2769_v41 = vmul.f32 -1.442695, %v1232_v9  ;;  %v1230_v50 = vpop.f32.mrb[35].mxu1 }
0x1403   :  { %v2770_v33 = vmul.f32 -1.442695, %v1233_v10 }
0x1404   :  { %3008 = vpow2.f32 %v2769_v41 }
0x1405   :  { %3010 = vtanh.f32 %v1233_v10  ;;  %v267_v10 = vadd.f32 %v3632_v54, %v3413_v24 }
0x140e   :  { %v3009_v51 = vpop.eup %3008 }
0x140f   :  { %v1237_v34 = vadd.f32 1.0, %v3009_v51  ;;  %v3011_v37 = vpop.eup %3010 }
0x1411   :  { %3012 = vrcp.f32 %v1237_v34 }
0x1412   :  { %3014 = vpow2.f32 %v2770_v33 }
0x141b   :  { %v3013_v39 = vpop.eup %3012 }
0x141c   :  { %v1248_v49 = vmul.f32 %v3013_v39, %v3011_v37  ;;  %v3015_v52 = vpop.eup %3014  ;;  %v1247_v44 = vmul.f32 %v3013_v39, %v1179_v36  ;;  %v265_v36 = vadd.f32 %v3630_v53, %v3411_v22 }
0x141d   :  { %v1244_v42 = vadd.f32 1.0, %v3015_v52 }
0x141e   :  { %1250 = vrot.lane.b32.xlu0 %v1248_v49, %s3247_s3 }
0x141f   :  { %3016 = vrcp.f32 %v1244_v42 }
0x1429   :  { %v3017_v47 = vpop.eup %3016 }
0x1490   :  { %v1251_v46 = vpop.permute.xlu0 %1250 }
0x1491   :  { %v1253_v30 = vadd.f32 %v1251_v46, %v1247_v44 }
0x1493   :  { %3018 = vtanh.f32 %v1253_v30 }
0x149d   :  { %v3019_v48 = vpop.eup %3018 }
0x149e   :  { %v1255_v9 = vmul.f32 %v3019_v48, %v3017_v47 }
0x14a0   :  { %v1258_v63 = vpack.c.bf16 %v1255_v9, %v1255_v9 }
0x14a2   :  { %1260 = vrot.lane.b32.xlu1 %v1258_v63, %s3247_s3 }
0x1514   :  { %v1261_v15 = vpop.permute.xlu1 %1260 }
0x1515   :  { %2771 = vmatmul.mubr.msk.bf16.vlgmr.msra.gmra.mrb[64].mxu0 %vm447_vm2, %v1261_v15 }
0x1516   :  { %1414 = vmatpush1.bf16.msra.mxu0 %v3719_v1  ;;  %1445 = vmatprep.mubr.bf16.mxu0 %v4160_v43 }
0x1517   :  { %1415 = vmatprep.subr.bf16.mxu0 %v3726_v31 }
0x151a   :  { %1416 = vmatpush1.bf16.msra.mxu0 %v3732_v38 }
0x151b   :  { %1417 = vmatprep.subr.bf16.mxu0 %v3759_v35 }
0x151e   :  { %1418 = vmatpush1.bf16.msra.mxu0 %v3765_v40 }
0x151f   :  { %1419 = vmatprep.subr.bf16.mxu0 %v3771_v16 }
0x1522   :  { %1420 = vmatpush1.bf16.msra.mxu0 %v3777_v32 }
0x1523   :  { %1561 = vmatprep.subr.bf16.mxu0 %v3742_v45 }
0x15e8   :  { %v1299_v41 = vpop.f32.mrb[64].mxu0 }
0x15e9   :  { %v1306_v50 = vadd.f32 %v1299_v41, %v265_v36  ;;  %v1301_v51 = vpop.f32.mrb[65].mxu0 }
0x15ea   :  { %v1307_v34 = vadd.f32 %v1301_v51, %v267_v10  ;;  %v1303_v37 = vpop.f32.mrb[66].mxu0  ;;  %v273_v51 = vadd.f32 %v3636_v56, %v3413_v24 }
0x15eb   :  { %v2772_v39 = vmul.f32 -1.442695, %v1306_v50  ;;  %v1304_v49 = vpop.f32.mrb[67].mxu0 }
0x15ec   :  { %v2773_v53 = vmul.f32 -1.442695, %v1307_v34 }
0x15ed   :  { %3020 = vpow2.f32 %v2772_v39 }
0x15ee   :  { %3022 = vtanh.f32 %v1307_v34 }
0x15f7   :  { %v3021_v33 = vpop.eup %3020 }
0x15f8   :  { %v1311_v52 = vadd.f32 1.0, %v3021_v33  ;;  %v3023_v42 = vpop.eup %3022 }
0x15fa   :  { %3024 = vrcp.f32 %v1311_v52 }
0x15fb   :  { %3026 = vpow2.f32 %v2773_v53 }
0x1604   :  { %v3025_v44 = vpop.eup %3024 }
0x1605   :  { %v1322_v46 = vmul.f32 %v3025_v44, %v3023_v42  ;;  %v3027_v54 = vpop.eup %3026  ;;  %v1321_v48 = vmul.f32 %v3025_v44, %v1253_v30  ;;  %v271_v30 = vadd.f32 %v3634_v55, %v3411_v22 }
0x1606   :  { %v1318_v47 = vadd.f32 1.0, %v3027_v54 }
0x1607   :  { %1324 = vrot.lane.b32.xlu0 %v1322_v46, %s3247_s3 }
0x1608   :  { %3028 = vrcp.f32 %v1318_v47 }
0x1612   :  { %v3029_v15 = vpop.eup %3028 }
0x1679   :  { %v1325_v9 = vpop.permute.xlu0 %1324 }
0x167a   :  { %v1327_v63 = vadd.f32 %v1325_v9, %v1321_v48 }
0x167c   :  { %3030 = vtanh.f32 %v1327_v63 }
0x1686   :  { %v3031_v36 = vpop.eup %3030 }
0x1687   :  { %v1329_v10 = vmul.f32 %v3031_v36, %v3029_v15 }
0x1689   :  { %v1332_v41 = vpack.c.bf16 %v1329_v10, %v1329_v10 }
0x168b   :  { %1334 = vrot.lane.b32.xlu1 %v1332_v41, %s3247_s3 }
0x16fd   :  { %v1335_v50 = vpop.permute.xlu1 %1334 }
0x16fe   :  { %2774 = vmatmul.mubr.msk.bf16.vlgmr.msra.gmra.mrb[36].mxu1 %vm447_vm2, %v1335_v50 }
0x16ff   :  { %1488 = vmatpush1.bf16.msra.mxu1 %v3719_v1  ;;  %1519 = vmatprep.mubr.bf16.mxu1 %v4160_v43 }
0x1700   :  { %1489 = vmatprep.subr.bf16.mxu1 %v3726_v31 }
0x1703   :  { %1490 = vmatpush1.bf16.msra.mxu1 %v3732_v38 }
0x1704   :  { %1491 = vmatprep.subr.bf16.mxu1 %v3759_v35 }
0x1707   :  { %1492 = vmatpush1.bf16.msra.mxu1 %v3765_v40 }
0x1708   :  { %1493 = vmatprep.subr.bf16.mxu1 %v3771_v16 }
0x170b   :  { %1494 = vmatpush1.bf16.msra.mxu1 %v3777_v32 }
0x170c   :  { %1635 = vmatprep.subr.bf16.mxu1 %v3742_v45 }
0x17d1   :  { %v1373_v34 = vpop.f32.mrb[36].mxu1 }
0x17d2   :  { %v1380_v37 = vadd.f32 %v1373_v34, %v271_v30  ;;  %v1375_v39 = vpop.f32.mrb[37].mxu1  ;;  %v277_v34 = vadd.f32 %v3640_v58, %v3413_v24 }
0x17d3   :  { %v1381_v49 = vadd.f32 %v1375_v39, %v273_v51  ;;  %v1377_v33 = vpop.f32.mrb[38].mxu1 }
0x17d4   :  { %v2775_v52 = vmul.f32 -1.442695, %v1380_v37  ;;  %v1378_v42 = vpop.f32.mrb[39].mxu1 }
0x17d5   :  { %v2776_v55 = vmul.f32 -1.442695, %v1381_v49 }
0x17d6   :  { %3032 = vpow2.f32 %v2775_v52 }
0x17d7   :  { %3034 = vtanh.f32 %v1381_v49 }
0x17e0   :  { %v3033_v44 = vpop.eup %3032 }
0x17e1   :  { %v1385_v46 = vadd.f32 1.0, %v3033_v44  ;;  %v3035_v53 = vpop.eup %3034 }
0x17e3   :  { %3036 = vrcp.f32 %v1385_v46 }
0x17e4   :  { %3038 = vpow2.f32 %v2776_v55 }
0x17ed   :  { %v3037_v54 = vpop.eup %3036 }
0x17ee   :  { %v1396_v47 = vmul.f32 %v3037_v54, %v3035_v53  ;;  %v3039_v56 = vpop.eup %3038  ;;  %v1395_v9 = vmul.f32 %v3037_v54, %v1327_v63  ;;  %v275_v63 = vadd.f32 %v3638_v57, %v3411_v22 }
0x17ef   :  { %v1392_v48 = vadd.f32 1.0, %v3039_v56 }
0x17f0   :  { %1398 = vrot.lane.b32.xlu0 %v1396_v47, %s3247_s3 }
0x17f1   :  { %3040 = vrcp.f32 %v1392_v48 }
0x17fb   :  { %v3041_v10 = vpop.eup %3040 }
0x1862   :  { %v1399_v15 = vpop.permute.xlu0 %1398 }
0x1863   :  { %v1401_v36 = vadd.f32 %v1399_v15, %v1395_v9 }
0x1865   :  { %3042 = vtanh.f32 %v1401_v36 }
0x186f   :  { %v3043_v41 = vpop.eup %3042 }
0x1870   :  { %v1403_v50 = vmul.f32 %v3043_v41, %v3041_v10 }
0x1872   :  { %v1406_v30 = vpack.c.bf16 %v1403_v50, %v1403_v50 }
0x1874   :  { %1408 = vrot.lane.b32.xlu1 %v1406_v30, %s3247_s3 }
0x18e6   :  { %v1409_v51 = vpop.permute.xlu1 %1408 }
0x18e7   :  { %2777 = vmatmul.mubr.msk.bf16.vlgmr.msra.gmra.mrb[68].mxu0 %vm447_vm2, %v1409_v51 }
0x18e8   :  { %1562 = vmatpush1.bf16.msra.mxu0 %v3719_v1  ;;  %1593 = vmatprep.mubr.bf16.mxu0 %v4160_v43 }
0x18e9   :  { %1563 = vmatprep.subr.bf16.mxu0 %v3726_v31 }
0x18ec   :  { %1564 = vmatpush1.bf16.msra.mxu0 %v3732_v38 }
0x18ed   :  { %1565 = vmatprep.subr.bf16.mxu0 %v3759_v35 }
0x18f0   :  { %1566 = vmatpush1.bf16.msra.mxu0 %v3765_v40 }
0x18f1   :  { %1567 = vmatprep.subr.bf16.mxu0 %v3771_v16 }
0x18f4   :  { %1568 = vmatpush1.bf16.msra.mxu0 %v3777_v32 }
0x18f5   :  { %1709 = vmatprep.subr.bf16.mxu0 %v3742_v45 }
0x19ba   :  { %v1447_v37 = vpop.f32.mrb[68].mxu0 }
0x19bb   :  { %v1454_v39 = vadd.f32 %v1447_v37, %v275_v63  ;;  %v1449_v49 = vpop.f32.mrb[69].mxu0  ;;  %v283_v63 = vadd.f32 %v3644_v60, %v3413_v24 }
0x19bc   :  { %v1455_v33 = vadd.f32 %v1449_v49, %v277_v34  ;;  %v1451_v52 = vpop.f32.mrb[70].mxu0 }
0x19bd   :  { %v2778_v42 = vmul.f32 -1.442695, %v1454_v39  ;;  %v1452_v44 = vpop.f32.mrb[71].mxu0 }
0x19be   :  { %v2779_v57 = vmul.f32 -1.442695, %v1455_v33 }
0x19bf   :  { %3044 = vpow2.f32 %v2778_v42 }
0x19c0   :  { %3046 = vtanh.f32 %v1455_v33 }
0x19c9   :  { %v3045_v46 = vpop.eup %3044 }
0x19ca   :  { %v1459_v53 = vadd.f32 1.0, %v3045_v46  ;;  %v3047_v54 = vpop.eup %3046 }
0x19cc   :  { %3048 = vrcp.f32 %v1459_v53 }
0x19cd   :  { %3050 = vpow2.f32 %v2779_v57 }
0x19d6   :  { %v3049_v47 = vpop.eup %3048 }
0x19d7   :  { %v1470_v55 = vmul.f32 %v3049_v47, %v3047_v54  ;;  %v3051_v58 = vpop.eup %3050  ;;  %v1469_v48 = vmul.f32 %v3049_v47, %v1401_v36  ;;  %v281_v36 = vadd.f32 %v3642_v59, %v3411_v22 }
0x19d8   :  { %v1466_v56 = vadd.f32 1.0, %v3051_v58 }
0x19d9   :  { %1472 = vrot.lane.b32.xlu0 %v1470_v55, %s3247_s3 }
0x19da   :  { %3052 = vrcp.f32 %v1466_v56 }
0x19e4   :  { %v3053_v10 = vpop.eup %3052 }
0x1a4b   :  { %v1473_v9 = vpop.permute.xlu0 %1472 }
0x1a4c   :  { %v1475_v15 = vadd.f32 %v1473_v9, %v1469_v48 }
0x1a4e   :  { %3054 = vtanh.f32 %v1475_v15 }
0x1a58   :  { %v3055_v41 = vpop.eup %3054 }
0x1a59   :  { %v1477_v50 = vmul.f32 %v3055_v41, %v3053_v10 }
0x1a5b   :  { %v1480_v30 = vpack.c.bf16 %v1477_v50, %v1477_v50 }
0x1a5d   :  { %1482 = vrot.lane.b32.xlu1 %v1480_v30, %s3247_s3  ;;  %v287_v30 = vadd.f32 %v3648_v62, %v3413_v24 }
0x1acf   :  { %v1483_v51 = vpop.permute.xlu1 %1482 }
0x1ad0   :  { %2780 = vmatmul.mubr.msk.bf16.vlgmr.msra.gmra.mrb[40].mxu1 %vm447_vm2, %v1483_v51 }
0x1ad1   :  { %1636 = vmatpush1.bf16.msra.mxu1 %v3719_v1  ;;  %1667 = vmatprep.mubr.bf16.mxu1 %v4160_v43 }
0x1ad2   :  { %1637 = vmatprep.subr.bf16.mxu1 %v3726_v31 }
0x1ad5   :  { %1638 = vmatpush1.bf16.msra.mxu1 %v3732_v38 }
0x1ad6   :  { %1639 = vmatprep.subr.bf16.mxu1 %v3759_v35 }
0x1ad9   :  { %1640 = vmatpush1.bf16.msra.mxu1 %v3765_v40 }
0x1ada   :  { %1641 = vmatprep.subr.bf16.mxu1 %v3771_v16 }
0x1add   :  { %1642 = vmatpush1.bf16.msra.mxu1 %v3777_v32 }
0x1ade   :  { %1783 = vmatprep.subr.bf16.mxu1 %v3742_v45 }
0x1ba3   :  { %v1521_v34 = vpop.f32.mrb[40].mxu1 }
0x1ba4   :  { %v1528_v37 = vadd.f32 %v1521_v34, %v281_v36  ;;  %v1523_v39 = vpop.f32.mrb[41].mxu1 }
0x1ba5   :  { %v1529_v49 = vadd.f32 %v1523_v39, %v283_v63  ;;  %v1525_v33 = vpop.f32.mrb[42].mxu1 }
0x1ba6   :  { %v2781_v52 = vmul.f32 -1.442695, %v1528_v37  ;;  %v1526_v42 = vpop.f32.mrb[43].mxu1 }
0x1ba7   :  { %v2782_v59 = vmul.f32 -1.442695, %v1529_v49 }
0x1ba8   :  { %3056 = vpow2.f32 %v2781_v52 }
0x1ba9   :  { %3058 = vtanh.f32 %v1529_v49 }
0x1bb2   :  { %v3057_v44 = vpop.eup %3056 }
0x1bb3   :  { %v1533_v46 = vadd.f32 1.0, %v3057_v44  ;;  %v3059_v53 = vpop.eup %3058 }
0x1bb5   :  { %3060 = vrcp.f32 %v1533_v46 }
0x1bb6   :  { %3062 = vpow2.f32 %v2782_v59 }
0x1bbf   :  { %v3061_v54 = vpop.eup %3060 }
0x1bc0   :  { %v1544_v47 = vmul.f32 %v3061_v54, %v3059_v53  ;;  %v3063_v60 = vpop.eup %3062  ;;  %v1543_v57 = vmul.f32 %v3061_v54, %v1475_v15  ;;  %v285_v15 = vadd.f32 %v3646_v61, %v3411_v22 }
0x1bc1   :  { %v1540_v55 = vadd.f32 1.0, %v3063_v60 }
0x1bc2   :  { %1546 = vrot.lane.b32.xlu0 %v1544_v47, %s3247_s3 }
0x1bc3   :  { %3064 = vrcp.f32 %v1540_v55 }
0x1bcd   :  { %v3065_v48 = vpop.eup %3064 }
0x1c34   :  { %v1547_v58 = vpop.permute.xlu0 %1546 }
0x1c35   :  { %v1549_v56 = vadd.f32 %v1547_v58, %v1543_v57 }
0x1c37   :  { %3066 = vtanh.f32 %v1549_v56 }
0x1c41   :  { %v3067_v9 = vpop.eup %3066 }
0x1c42   :  { %v1551_v10 = vmul.f32 %v3067_v9, %v3065_v48  ;;  %v293_v9 = vadd.f32 %v3656_v4, %v3413_v24 }
0x1c44   :  { %v1554_v41 = vpack.c.bf16 %v1551_v10, %v1551_v10 }
0x1c46   :  { %1556 = vrot.lane.b32.xlu1 %v1554_v41, %s3247_s3 }
0x1cb8   :  { %v1557_v50 = vpop.permute.xlu1 %1556 }
0x1cb9   :  { %2783 = vmatmul.mubr.msk.bf16.vlgmr.msra.gmra.mrb[72].mxu0 %vm447_vm2, %v1557_v50 }
0x1cba   :  { %1710 = vmatpush1.bf16.msra.mxu0 %v3719_v1  ;;  %1741 = vmatprep.mubr.bf16.mxu0 %v4160_v43 }
0x1cbb   :  { %1711 = vmatprep.subr.bf16.mxu0 %v3726_v31 }
0x1cbe   :  { %1712 = vmatpush1.bf16.msra.mxu0 %v3732_v38 }
0x1cbf   :  { %1713 = vmatprep.subr.bf16.mxu0 %v3759_v35 }
0x1cc2   :  { %1714 = vmatpush1.bf16.msra.mxu0 %v3765_v40 }
0x1cc3   :  { %1715 = vmatprep.subr.bf16.mxu0 %v3771_v16 }
0x1cc6   :  { %1716 = vmatpush1.bf16.msra.mxu0 %v3777_v32 }
0x1cc7   :  { %1857 = vmatprep.subr.bf16.mxu0 %v3742_v45 }
0x1d8c   :  { %v1595_v51 = vpop.f32.mrb[72].mxu0 }
0x1d8d   :  { %v1602_v36 = vadd.f32 %v1595_v51, %v285_v15  ;;  %v1597_v63 = vpop.f32.mrb[73].mxu0 }
0x1d8e   :  { %v1603_v34 = vadd.f32 %v1597_v63, %v287_v30  ;;  %v1599_v37 = vpop.f32.mrb[74].mxu0 }
0x1d8f   :  { %v2784_v39 = vmul.f32 -1.442695, %v1602_v36  ;;  %v1600_v49 = vpop.f32.mrb[75].mxu0 }
0x1d90   :  { %v2785_v61 = vmul.f32 -1.442695, %v1603_v34 }
0x1d91   :  { %3068 = vpow2.f32 %v2784_v39 }
0x1d92   :  { %3070 = vtanh.f32 %v1603_v34 }
0x1d9b   :  { %v3069_v33 = vpop.eup %3068 }
0x1d9c   :  { %v1607_v52 = vadd.f32 1.0, %v3069_v33  ;;  %v3071_v42 = vpop.eup %3070 }
0x1d9e   :  { %3072 = vrcp.f32 %v1607_v52 }
0x1d9f   :  { %3074 = vpow2.f32 %v2785_v61 }
0x1da8   :  { %v3073_v44 = vpop.eup %3072 }
0x1da9   :  { %v1618_v46 = vmul.f32 %v3073_v44, %v3071_v42  ;;  %v3075_v62 = vpop.eup %3074  ;;  %v1617_v54 = vmul.f32 %v3073_v44, %v1549_v56  ;;  %v291_v56 = vadd.f32 %v3654_v3, %v3411_v22 }
0x1daa   :  { %v1614_v53 = vadd.f32 1.0, %v3075_v62 }
0x1dab   :  { %1620 = vrot.lane.b32.xlu0 %v1618_v46, %s3247_s3 }
0x1dac   :  { %3076 = vrcp.f32 %v1614_v53 }
0x1db6   :  { %v3077_v60 = vpop.eup %3076 }
0x1e1d   :  { %v1621_v47 = vpop.permute.xlu0 %1620 }
0x1e1e   :  { %v1623_v59 = vadd.f32 %v1621_v47, %v1617_v54  ;;  %v295_v47 = vadd.f32 %v3658_v7, %v3411_v22 }
0x1e20   :  { %3078 = vtanh.f32 %v1623_v59 }
0x1e2a   :  { %v3079_v55 = vpop.eup %3078 }
0x1e2b   :  { %v1625_v57 = vmul.f32 %v3079_v55, %v3077_v60 }
0x1e2d   :  { %v1628_v58 = vpack.c.bf16 %v1625_v57, %v1625_v57 }
0x1e2f   :  { %1630 = vrot.lane.b32.xlu1 %v1628_v58, %s3247_s3 }
0x1ea1   :  { %v1631_v48 = vpop.permute.xlu1 %1630 }
0x1ea2   :  { %2786 = vmatmul.mubr.msk.bf16.vlgmr.msra.gmra.mrb[44].mxu1 %vm447_vm2, %v1631_v48 }
0x1ea3   :  { %1784 = vmatpush1.bf16.msra.mxu1 %v3719_v1  ;;  %1815 = vmatprep.mubr.bf16.mxu1 %v4160_v43 }
0x1ea4   :  { %1785 = vmatprep.subr.bf16.mxu1 %v3726_v31 }
0x1ea7   :  { %1786 = vmatpush1.bf16.msra.mxu1 %v3732_v38 }
0x1ea8   :  { %1787 = vmatprep.subr.bf16.mxu1 %v3759_v35 }
0x1eab   :  { %1788 = vmatpush1.bf16.msra.mxu1 %v3765_v40 }
0x1eac   :  { %1789 = vmatprep.subr.bf16.mxu1 %v3771_v16 }
0x1eaf   :  { %1790 = vmatpush1.bf16.msra.mxu1 %v3777_v32 }
0x1eb0   :  { %1931 = vmatprep.subr.bf16.mxu1 %v3742_v45 }
0x1f75   :  { %v1669_v10 = vpop.f32.mrb[44].mxu1 }
0x1f76   :  { %v1676_v41 = vadd.f32 %v1669_v10, %v291_v56  ;;  %v1671_v50 = vpop.f32.mrb[45].mxu1 }
0x1f77   :  { %v1677_v15 = vadd.f32 %v1671_v50, %v293_v9  ;;  %v1673_v30 = vpop.f32.mrb[46].mxu1 }
0x1f78   :  { %v2787_v51 = vmul.f32 -1.442695, %v1676_v41  ;;  %v1674_v36 = vpop.f32.mrb[47].mxu1 }
0x1f79   :  { %v2788_v3 = vmul.f32 -1.442695, %v1677_v15 }
0x1f7a   :  { %3080 = vpow2.f32 %v2787_v51 }
0x1f7b   :  { %3082 = vtanh.f32 %v1677_v15 }
0x1f84   :  { %v3081_v63 = vpop.eup %3080 }
0x1f85   :  { %v1681_v34 = vadd.f32 1.0, %v3081_v63  ;;  %v3083_v37 = vpop.eup %3082 }
0x1f87   :  { %3084 = vrcp.f32 %v1681_v34 }
0x1f88   :  { %3086 = vpow2.f32 %v2788_v3 }
0x1f91   :  { %v3085_v39 = vpop.eup %3084 }
0x1f92   :  { %v1692_v49 = vmul.f32 %v3085_v39, %v3083_v37  ;;  %v3087_v4 = vpop.eup %3086  ;;  %v1691_v52 = vmul.f32 %v3085_v39, %v1623_v59  ;;  %v297_v59 = vadd.f32 %v3661_v8, %v3413_v24 }
0x1f93   :  { %v1688_v33 = vadd.f32 1.0, %v3087_v4 }
0x1f94   :  { %1694 = vrot.lane.b32.xlu0 %v1692_v49, %s3247_s3 }
0x1f95   :  { %3088 = vrcp.f32 %v1688_v33  ;;  %v301_v33 = vadd.f32 %v3666_v2, %v3411_v22 }
0x1f9f   :  { %v3089_v46 = vpop.eup %3088 }
0x2006   :  { %v1695_v42 = vpop.permute.xlu0 %1694 }
0x2007   :  { %v1697_v44 = vadd.f32 %v1695_v42, %v1691_v52  ;;  %v303_v52 = vadd.f32 %v3668_v11, %v3413_v24 }
0x2009   :  { %3090 = vtanh.f32 %v1697_v44 }
0x2013   :  { %v3091_v61 = vpop.eup %3090 }
0x2014   :  { %v1699_v62 = vmul.f32 %v3091_v61, %v3089_v46 }
0x2016   :  { %v1702_v53 = vpack.c.bf16 %v1699_v62, %v1699_v62 }
0x2018   :  { %1704 = vrot.lane.b32.xlu1 %v1702_v53, %s3247_s3 }
0x208a   :  { %v1705_v54 = vpop.permute.xlu1 %1704 }
0x208b   :  { %2789 = vmatmul.mubr.msk.bf16.vlgmr.msra.gmra.mrb[76].mxu0 %vm447_vm2, %v1705_v54 }
0x208c   :  { %1858 = vmatpush1.bf16.msra.mxu0 %v3719_v1  ;;  %1889 = vmatprep.mubr.bf16.mxu0 %v4160_v43 }
0x208d   :  { %1859 = vmatprep.subr.bf16.mxu0 %v3726_v31 }
0x2090   :  { %1860 = vmatpush1.bf16.msra.mxu0 %v3732_v38 }
0x2091   :  { %1861 = vmatprep.subr.bf16.mxu0 %v3759_v35 }
0x2094   :  { %1862 = vmatpush1.bf16.msra.mxu0 %v3765_v40 }
0x2095   :  { %1863 = vmatprep.subr.bf16.mxu0 %v3771_v16 }
0x2098   :  { %1864 = vmatpush1.bf16.msra.mxu0 %v3777_v32 }
0x2099   :  { %2005 = vmatprep.subr.bf16.mxu0 %v3742_v45 }
0x215e   :  { %v1743_v60 = vpop.f32.mrb[76].mxu0 }
0x215f   :  { %v1750_v55 = vadd.f32 %v1743_v60, %v295_v47  ;;  %v1745_v57 = vpop.f32.mrb[77].mxu0 }
0x2160   :  { %v1751_v58 = vadd.f32 %v1745_v57, %v297_v59  ;;  %v1747_v48 = vpop.f32.mrb[78].mxu0 }
0x2161   :  { %v2790_v56 = vmul.f32 -1.442695, %v1750_v55  ;;  %v1748_v9 = vpop.f32.mrb[79].mxu0 }
0x2162   :  { %v2791_v7 = vmul.f32 -1.442695, %v1751_v58 }
0x2163   :  { %3092 = vpow2.f32 %v2790_v56 }
0x2164   :  { %3094 = vtanh.f32 %v1751_v58 }
0x216d   :  { %v3093_v10 = vpop.eup %3092 }
0x216e   :  { %v1755_v41 = vadd.f32 1.0, %v3093_v10  ;;  %v3095_v50 = vpop.eup %3094 }
0x2170   :  { %3096 = vrcp.f32 %v1755_v41 }
0x2171   :  { %3098 = vpow2.f32 %v2791_v7  ;;  %v305_v7 = vadd.f32 %v3670_v5, %v3411_v22 }
0x217a   :  { %v3097_v15 = vpop.eup %3096 }
0x217b   :  { %v1766_v30 = vmul.f32 %v3097_v15, %v3095_v50  ;;  %v3099_v8 = vpop.eup %3098  ;;  %v1765_v36 = vmul.f32 %v3097_v15, %v1697_v44 }
0x217c   :  { %v1762_v51 = vadd.f32 1.0, %v3099_v8 }
0x217d   :  { %1768 = vrot.lane.b32.xlu0 %v1766_v30, %s3247_s3 }
0x217e   :  { %3100 = vrcp.f32 %v1762_v51 }
0x2188   :  { %v3101_v37 = vpop.eup %3100 }
0x21ef   :  { %v1769_v63 = vpop.permute.xlu0 %1768 }
0x21f0   :  { %v1771_v34 = vadd.f32 %v1769_v63, %v1765_v36 }
0x21f2   :  { %3102 = vtanh.f32 %v1771_v34 }
0x21fc   :  { %v3103_v39 = vpop.eup %3102 }
0x21fd   :  { %v1773_v49 = vmul.f32 %v3103_v39, %v3101_v37 }
0x21ff   :  { %v1776_v3 = vpack.c.bf16 %v1773_v49, %v1773_v49 }
0x2201   :  { %1778 = vrot.lane.b32.xlu1 %v1776_v3, %s3247_s3 }
0x2273   :  { %v1779_v4 = vpop.permute.xlu1 %1778 }
0x2274   :  { %2792 = vmatmul.mubr.msk.bf16.vlgmr.msra.gmra.mrb[48].mxu1 %vm447_vm2, %v1779_v4 }
0x2275   :  { %1932 = vmatpush1.bf16.msra.mxu1 %v3719_v1  ;;  %1963 = vmatprep.mubr.bf16.mxu1 %v4160_v43 }
0x2276   :  { %1933 = vmatprep.subr.bf16.mxu1 %v3726_v31 }
0x2279   :  { %1934 = vmatpush1.bf16.msra.mxu1 %v3732_v38 }
0x227a   :  { %1935 = vmatprep.subr.bf16.mxu1 %v3759_v35 }
0x227d   :  { %1936 = vmatpush1.bf16.msra.mxu1 %v3765_v40 }
0x227e   :  { %1937 = vmatprep.subr.bf16.mxu1 %v3771_v16 }
0x2281   :  { %1938 = vmatpush1.bf16.msra.mxu1 %v3777_v32 }
0x2282   :  { %2079 = vmatprep.subr.bf16.mxu1 %v3742_v45 }
0x2347   :  { %v1817_v42 = vpop.f32.mrb[48].mxu1 }
0x2348   :  { %v1824_v44 = vadd.f32 %v1817_v42, %v301_v33  ;;  %v1819_v46 = vpop.f32.mrb[49].mxu1 }
0x2349   :  { %v1825_v61 = vadd.f32 %v1819_v46, %v303_v52  ;;  %v1821_v62 = vpop.f32.mrb[50].mxu1 }
0x234a   :  { %v2793_v53 = vmul.f32 -1.442695, %v1824_v44  ;;  %v1822_v54 = vpop.f32.mrb[51].mxu1 }
0x234b   :  { %v2794_v2 = vmul.f32 -1.442695, %v1825_v61  ;;  %v3951_v54 = vld [vmem:[%s4143_s2] ss:$8 sps:$4 sm:$0xff]  }
0x234c   :  { %3104 = vpow2.f32 %v2793_v53 }
0x234d   :  { %3106 = vtanh.f32 %v1825_v61 }
0x2356   :  { %v3105_v47 = vpop.eup %3104 }
0x2357   :  { %v1829_v59 = vadd.f32 1.0, %v3105_v47  ;;  %v3107_v60 = vpop.eup %3106  ;;  %v3958_v47 = vld [vmem:[%s4143_s2 + $0x14] ss:$8 sps:$4 sm:$0xff]  }
0x2359   :  { %3108 = vrcp.f32 %v1829_v59  ;;  %v3964_v59 = vld [vmem:[%s4143_s2 + $0x10] ss:$8 sps:$4 sm:$0xff]  }
0x235a   :  { %3110 = vpow2.f32 %v2794_v2 }
0x2363   :  { %v3109_v55 = vpop.eup %3108 }
0x2364   :  { %v1840_v57 = vmul.f32 %v3109_v55, %v3107_v60  ;;  %v3111_v11 = vpop.eup %3110  ;;  %v1839_v48 = vmul.f32 %v3109_v55, %v1771_v34  ;;  %v3974_v60 = vld [vmem:[%s4143_s2 + $0x4] ss:$8 sps:$4 sm:$0xff]   ;;  %v311_v55 = vadd.f32 %v3676_v6, %v3411_v22 }
0x2365   :  { %v1836_v58 = vadd.f32 1.0, %v3111_v11 }
0x2366   :  { %1842 = vrot.lane.b32.xlu0 %v1840_v57, %s3247_s3  ;;  %v313_v57 = vadd.f32 %v3678_v13, %v3413_v24 }
0x2367   :  { %3112 = vrcp.f32 %v1836_v58 }
0x2371   :  { %v3113_v10 = vpop.eup %3112 }
0x23d8   :  { %v1843_v56 = vpop.permute.xlu0 %1842 }
0x23d9   :  { %v1845_v9 = vadd.f32 %v1843_v56, %v1839_v48 }
0x23db   :  { %3114 = vtanh.f32 %v1845_v9 }
0x23e5   :  { %v3115_v41 = vpop.eup %3114 }
0x23e6   :  { %v1847_v50 = vmul.f32 %v3115_v41, %v3113_v10 }
0x23e8   :  { %v1850_v15 = vpack.c.bf16 %v1847_v50, %v1847_v50 }
0x23ea   :  { %1852 = vrot.lane.b32.xlu1 %v1850_v15, %s3247_s3 }
0x245c   :  { %v1853_v30 = vpop.permute.xlu1 %1852 }
0x245d   :  { %2795 = vmatmul.mubr.msk.bf16.vlgmr.msra.gmra.mrb[80].mxu0 %vm447_vm2, %v1853_v30 }
0x245e   :  { %2006 = vmatpush1.bf16.msra.mxu0 %v3719_v1  ;;  %2037 = vmatprep.mubr.bf16.mxu0 %v4160_v43  ;;  %v307_v1 = vadd.f32 %v3673_v12, %v3413_v24 }
0x245f   :  { %2007 = vmatprep.subr.bf16.mxu0 %v3726_v31 }
0x2462   :  { %2008 = vmatpush1.bf16.msra.mxu0 %v3732_v38 }
0x2463   :  { %2009 = vmatprep.subr.bf16.mxu0 %v3759_v35 }
0x2466   :  { %2010 = vmatpush1.bf16.msra.mxu0 %v3765_v40 }
0x2467   :  { %2011 = vmatprep.subr.bf16.mxu0 %v3771_v16 }
0x246a   :  { %2012 = vmatpush1.bf16.msra.mxu0 %v3777_v32 }
0x246b   :  { %2153 = vmatprep.subr.bf16.mxu0 %v3742_v45 }
0x2530   :  { %v1891_v8 = vpop.f32.mrb[80].mxu0 }
0x2531   :  { %v1898_v31 = vadd.f32 %v1891_v8, %v305_v7  ;;  %v1893_v51 = vpop.f32.mrb[81].mxu0 }
0x2532   :  { %v1899_v38 = vadd.f32 %v1893_v51, %v307_v1  ;;  %v1895_v36 = vpop.f32.mrb[82].mxu0 }
0x2533   :  { %v2796_v63 = vmul.f32 -1.442695, %v1898_v31  ;;  %v1896_v34 = vpop.f32.mrb[83].mxu0  ;;  %v3991_v36 = vld [vmem:[%s4143_s2 + $0x24] ss:$8 sps:$4 sm:$0xff]  }
0x2534   :  { %v2797_v5 = vmul.f32 -1.442695, %v1899_v38  ;;  %v4003_v34 = vld [vmem:[%s4143_s2 + $0x34] ss:$8 sps:$4 sm:$0xff]  }
0x2535   :  { %3116 = vpow2.f32 %v2796_v63  ;;  %v3997_v63 = vld [vmem:[%s4143_s2 + $0x20] ss:$8 sps:$4 sm:$0xff]  }
0x2536   :  { %3118 = vtanh.f32 %v1899_v38 }
0x253f   :  { %v3117_v37 = vpop.eup %3116 }
0x2540   :  { %v1903_v39 = vadd.f32 1.0, %v3117_v37  ;;  %v3119_v49 = vpop.eup %3118  ;;  %v4009_v37 = vld [vmem:[%s4143_s2 + $0x30] ss:$8 sps:$4 sm:$0xff]  }
0x2542   :  { %3120 = vrcp.f32 %v1903_v39  ;;  %v315_v39 = vadd.f32 %v3680_v14, %v3411_v22 }
0x2543   :  { %3122 = vpow2.f32 %v2797_v5 }
0x254c   :  { %v3121_v45 = vpop.eup %3120 }
0x254d   :  { %v1914_v3 = vmul.f32 %v3121_v45, %v3119_v49  ;;  %v3123_v12 = vpop.eup %3122  ;;  %v1913_v33 = vmul.f32 %v3121_v45, %v1845_v9  ;;  %v317_v49 = vadd.f32 %v3682_v17, %v3413_v24 }
0x254e   :  { %v1910_v4 = vadd.f32 1.0, %v3123_v12 }
0x254f   :  { %1916 = vrot.lane.b32.xlu0 %v1914_v3, %s3247_s3 }
0x2550   :  { %3124 = vrcp.f32 %v1910_v4 }
0x255a   :  { %v3125_v44 = vpop.eup %3124 }
0x25c1   :  { %v1917_v52 = vpop.permute.xlu0 %1916 }
0x25c2   :  { %v1919_v42 = vadd.f32 %v1917_v52, %v1913_v33 }
0x25c4   :  { %3126 = vtanh.f32 %v1919_v42 }
0x25ce   :  { %v3127_v46 = vpop.eup %3126 }
0x25cf   :  { %v1921_v61 = vmul.f32 %v3127_v46, %v3125_v44 }
0x25d1   :  { %v1924_v62 = vpack.c.bf16 %v1921_v61, %v1921_v61 }
0x25d3   :  { %1926 = vrot.lane.b32.xlu1 %v1924_v62, %s3247_s3 }
0x2645   :  { %v1927_v53 = vpop.permute.xlu1 %1926 }
0x2646   :  { %2798 = vmatmul.mubr.msk.bf16.vlgmr.msra.gmra.mrb[52].mxu1 %vm447_vm2, %v1927_v53 }
0x2647   :  { %2080 = vmatpush1.bf16.msra.mxu1 %v3951_v54  ;;  %2111 = vmatprep.mubr.bf16.mxu1 %v4160_v43 }
0x2648   :  { %2081 = vmatprep.subr.bf16.mxu1 %v3958_v47 }
0x264b   :  { %2082 = vmatpush1.bf16.msra.mxu1 %v3964_v59 }
0x264c   :  { %2083 = vmatprep.subr.bf16.mxu1 %v3759_v35 }
0x264f   :  { %2084 = vmatpush1.bf16.msra.mxu1 %v3765_v40 }
0x2650   :  { %2085 = vmatprep.subr.bf16.mxu1 %v3771_v16 }
0x2653   :  { %2086 = vmatpush1.bf16.msra.mxu1 %v3777_v32 }
0x2654   :  { %2227 = vmatprep.subr.bf16.mxu1 %v3974_v60 }
0x2719   :  { %v1965_v35 = vpop.f32.mrb[52].mxu1 }
0x271a   :  { %v1972_v2 = vadd.f32 %v1965_v35, %v311_v55  ;;  %v1967_v40 = vpop.f32.mrb[53].mxu1 }
0x271b   :  { %v1973_v11 = vadd.f32 %v1967_v40, %v313_v57  ;;  %v1969_v16 = vpop.f32.mrb[54].mxu1 }
0x271c   :  { %v2799_v58 = vmul.f32 -1.442695, %v1972_v2  ;;  %v1970_v32 = vpop.f32.mrb[55].mxu1 }
0x271d   :  { %v2800_v6 = vmul.f32 -1.442695, %v1973_v11  ;;  %v321_v32 = vadd.f32 %v3684_v18, %v3411_v22 }
0x271e   :  { %3128 = vpow2.f32 %v2799_v58 }
0x271f   :  { %3130 = vtanh.f32 %v1973_v11 }
0x2728   :  { %v3129_v48 = vpop.eup %3128 }
0x2729   :  { %v1977_v56 = vadd.f32 1.0, %v3129_v48  ;;  %v3131_v9 = vpop.eup %3130  ;;  %v323_v48 = vadd.f32 %v3686_v20, %v3413_v24 }
0x272b   :  { %3132 = vrcp.f32 %v1977_v56 }
0x272c   :  { %3134 = vpow2.f32 %v2800_v6 }
0x2735   :  { %v3133_v10 = vpop.eup %3132 }
0x2736   :  { %v1988_v41 = vmul.f32 %v3133_v10, %v3131_v9  ;;  %v3135_v13 = vpop.eup %3134  ;;  %v1987_v15 = vmul.f32 %v3133_v10, %v1919_v42 }
0x2737   :  { %v1984_v50 = vadd.f32 1.0, %v3135_v13 }
0x2738   :  { %1990 = vrot.lane.b32.xlu0 %v1988_v41, %s3247_s3 }
0x2739   :  { %3136 = vrcp.f32 %v1984_v50 }
0x2743   :  { %v3137_v1 = vpop.eup %3136 }
0x27aa   :  { %v1991_v30 = vpop.permute.xlu0 %1990 }
0x27ab   :  { %v1993_v7 = vadd.f32 %v1991_v30, %v1987_v15 }
0x27ad   :  { %3138 = vtanh.f32 %v1993_v7 }
0x27b7   :  { %v3139_v8 = vpop.eup %3138 }
0x27b8   :  { %v1995_v31 = vmul.f32 %v3139_v8, %v3137_v1 }
0x27ba   :  { %v1998_v51 = vpack.c.bf16 %v1995_v31, %v1995_v31 }
0x27bc   :  { %2000 = vrot.lane.b32.xlu1 %v1998_v51, %s3247_s3 }
0x282e   :  { %v2001_v38 = vpop.permute.xlu1 %2000 }
0x282f   :  { %2801 = vmatmul.mubr.msk.bf16.vlgmr.msra.gmra.mrb[84].mxu0 %vm447_vm2, %v2001_v38 }
0x2830   :  { %2154 = vmatpush1.bf16.msra.mxu0 %v3951_v54  ;;  %2185 = vmatprep.mubr.bf16.mxu0 %v4160_v43 }
0x2831   :  { %2155 = vmatprep.subr.bf16.mxu0 %v3958_v47 }
0x2834   :  { %2156 = vmatpush1.bf16.msra.mxu0 %v3964_v59 }
0x2835   :  { %2157 = vmatprep.subr.bf16.mxu0 %v3991_v36 }
0x2838   :  { %2158 = vmatpush1.bf16.msra.mxu0 %v3997_v63 }
0x2839   :  { %2159 = vmatprep.subr.bf16.mxu0 %v4003_v34 }
0x283c   :  { %2160 = vmatpush1.bf16.msra.mxu0 %v4009_v37 }
0x283d   :  { %2301 = vmatprep.subr.bf16.mxu0 %v3974_v60 }
0x2902   :  { %v2039_v45 = vpop.f32.mrb[84].mxu0 }
0x2903   :  { %v2046_v3 = vadd.f32 %v2039_v45, %v315_v39  ;;  %v2041_v5 = vpop.f32.mrb[85].mxu0 }
0x2904   :  { %v2047_v12 = vadd.f32 %v2041_v5, %v317_v49  ;;  %v2043_v4 = vpop.f32.mrb[86].mxu0 }
0x2905   :  { %v2802_v33 = vmul.f32 -1.442695, %v2046_v3  ;;  %v2044_v52 = vpop.f32.mrb[87].mxu0  ;;  %v325_v4 = vadd.f32 %v3688_v21, %v3411_v22 }
0x2906   :  { %v2803_v14 = vmul.f32 -1.442695, %v2047_v12 }
0x2907   :  { %3140 = vpow2.f32 %v2802_v33  ;;  %v327_v33 = vadd.f32 %v3690_v23, %v3413_v24 }
0x2908   :  { %3142 = vtanh.f32 %v2047_v12 }
0x2911   :  { %v3141_v42 = vpop.eup %3140 }
0x2912   :  { %v2051_v44 = vadd.f32 1.0, %v3141_v42  ;;  %v3143_v46 = vpop.eup %3142 }
0x2914   :  { %3144 = vrcp.f32 %v2051_v44 }
0x2915   :  { %3146 = vpow2.f32 %v2803_v14 }
0x291e   :  { %v3145_v61 = vpop.eup %3144 }
0x291f   :  { %v2062_v62 = vmul.f32 %v3145_v61, %v3143_v46  ;;  %v3147_v17 = vpop.eup %3146  ;;  %v2061_v55 = vmul.f32 %v3145_v61, %v1993_v7 }
0x2920   :  { %v2058_v53 = vadd.f32 1.0, %v3147_v17 }
0x2921   :  { %2064 = vrot.lane.b32.xlu0 %v2062_v62, %s3247_s3 }
0x2922   :  { %3148 = vrcp.f32 %v2058_v53 }
0x292c   :  { %v3149_v2 = vpop.eup %3148 }
0x2993   :  { %v2065_v57 = vpop.permute.xlu0 %2064 }
0x2994   :  { %v2067_v35 = vadd.f32 %v2065_v57, %v2061_v55 }
0x2996   :  { %3150 = vtanh.f32 %v2067_v35 }
0x29a0   :  { %v3151_v40 = vpop.eup %3150 }
0x29a1   :  { %v2069_v11 = vmul.f32 %v3151_v40, %v3149_v2 }
0x29a3   :  { %v2072_v16 = vpack.c.bf16 %v2069_v11, %v2069_v11 }
0x29a5   :  { %2074 = vrot.lane.b32.xlu1 %v2072_v16, %s3247_s3 }
0x2a17   :  { %v2075_v58 = vpop.permute.xlu1 %2074 }
0x2a18   :  { %2804 = vmatmul.mubr.msk.bf16.vlgmr.msra.gmra.mrb[56].mxu1 %vm447_vm2, %v2075_v58 }
0x2a19   :  { %2228 = vmatpush1.bf16.msra.mxu1 %v3951_v54  ;;  %2259 = vmatprep.mubr.bf16.mxu1 %v4160_v43 }
0x2a1a   :  { %2229 = vmatprep.subr.bf16.mxu1 %v3958_v47 }
0x2a1d   :  { %2230 = vmatpush1.bf16.msra.mxu1 %v3964_v59 }
0x2a1e   :  { %2231 = vmatprep.subr.bf16.mxu1 %v3991_v36 }
0x2a21   :  { %2232 = vmatpush1.bf16.msra.mxu1 %v3997_v63 }
0x2a22   :  { %2233 = vmatprep.subr.bf16.mxu1 %v4003_v34 }
0x2a25   :  { %2234 = vmatpush1.bf16.msra.mxu1 %v4009_v37 }
0x2a26   :  { %2375 = vmatprep.subr.bf16.mxu1 %v3974_v60 }
0x2aeb   :  { %v2113_v56 = vpop.f32.mrb[56].mxu1 }
0x2aec   :  { %v2120_v9 = vadd.f32 %v2113_v56, %v321_v32  ;;  %v2115_v10 = vpop.f32.mrb[57].mxu1 }
0x2aed   :  { %v2121_v41 = vadd.f32 %v2115_v10, %v323_v48  ;;  %v2117_v6 = vpop.f32.mrb[58].mxu1  ;;  %v333_v10 = vadd.f32 %v3694_v26, %v3413_v24 }
0x2aee   :  { %v2805_v13 = vmul.f32 -1.442695, %v2120_v9  ;;  %v2118_v50 = vpop.f32.mrb[59].mxu1  ;;  %v331_v9 = vadd.f32 %v3692_v25, %v3411_v22 }
0x2aef   :  { %v2806_v18 = vmul.f32 -1.442695, %v2121_v41 }
0x2af0   :  { %3152 = vpow2.f32 %v2805_v13 }
0x2af1   :  { %3154 = vtanh.f32 %v2121_v41 }
0x2afa   :  { %v3153_v15 = vpop.eup %3152 }
0x2afb   :  { %v2125_v30 = vadd.f32 1.0, %v3153_v15  ;;  %v3155_v7 = vpop.eup %3154 }
0x2afd   :  { %3156 = vrcp.f32 %v2125_v30 }
0x2afe   :  { %3158 = vpow2.f32 %v2806_v18 }
0x2b07   :  { %v3157_v1 = vpop.eup %3156 }
0x2b08   :  { %v2136_v8 = vmul.f32 %v3157_v1, %v3155_v7  ;;  %v3159_v20 = vpop.eup %3158  ;;  %v2135_v51 = vmul.f32 %v3157_v1, %v2067_v35 }
0x2b09   :  { %v2132_v31 = vadd.f32 1.0, %v3159_v20 }
0x2b0a   :  { %2138 = vrot.lane.b32.xlu0 %v2136_v8, %s3247_s3 }
0x2b0b   :  { %3160 = vrcp.f32 %v2132_v31 }
0x2b15   :  { %v3161_v49 = vpop.eup %3160 }
0x2b7c   :  { %v2139_v38 = vpop.permute.xlu0 %2138 }
0x2b7d   :  { %v2141_v39 = vadd.f32 %v2139_v38, %v2135_v51 }
0x2b7f   :  { %3162 = vtanh.f32 %v2141_v39 }
0x2b89   :  { %v3163_v45 = vpop.eup %3162 }
0x2b8a   :  { %v2143_v3 = vmul.f32 %v3163_v45, %v3161_v49 }
0x2b8c   :  { %v2146_v5 = vpack.c.bf16 %v2143_v3, %v2143_v3 }
0x2b8e   :  { %2148 = vrot.lane.b32.xlu1 %v2146_v5, %s3247_s3 }
0x2c00   :  { %v2149_v12 = vpop.permute.xlu1 %2148 }
0x2c01   :  { %2807 = vmatmul.mubr.msk.bf16.vlgmr.msra.gmra.mrb[88].mxu0 %vm447_vm2, %v2149_v12 }
0x2c02   :  { %2302 = vmatpush1.bf16.msra.mxu0 %v3951_v54  ;;  %2333 = vmatprep.mubr.bf16.mxu0 %v4160_v43 }
0x2c03   :  { %2303 = vmatprep.subr.bf16.mxu0 %v3958_v47 }
0x2c06   :  { %2304 = vmatpush1.bf16.msra.mxu0 %v3964_v59 }
0x2c07   :  { %2305 = vmatprep.subr.bf16.mxu0 %v3991_v36 }
0x2c0a   :  { %2306 = vmatpush1.bf16.msra.mxu0 %v3997_v63 }
0x2c0b   :  { %2307 = vmatprep.subr.bf16.mxu0 %v4003_v34 }
0x2c0e   :  { %2308 = vmatpush1.bf16.msra.mxu0 %v4009_v37 }
0x2c0f   :  { %2449 = vmatprep.subr.bf16.mxu0 %v3974_v60 }
0x2cd4   :  { %v2187_v52 = vpop.f32.mrb[88].mxu0 }
0x2cd5   :  { %v2194_v42 = vadd.f32 %v2187_v52, %v325_v4  ;;  %v2189_v44 = vpop.f32.mrb[89].mxu0 }
0x2cd6   :  { %v2195_v46 = vadd.f32 %v2189_v44, %v327_v33  ;;  %v2191_v61 = vpop.f32.mrb[90].mxu0  ;;  %v335_v33 = vadd.f32 %v3696_v0, %v3411_v22 }
0x2cd7   :  { %v2808_v62 = vmul.f32 -1.442695, %v2194_v42  ;;  %v2192_v14 = vpop.f32.mrb[91].mxu0 }
0x2cd8   :  { %v2809_v21 = vmul.f32 -1.442695, %v2195_v46 }
0x2cd9   :  { %3164 = vpow2.f32 %v2808_v62 }
0x2cda   :  { %3166 = vtanh.f32 %v2195_v46 }
0x2ce3   :  { %v3165_v17 = vpop.eup %3164 }
0x2ce4   :  { %v2199_v53 = vadd.f32 1.0, %v3165_v17  ;;  %v3167_v55 = vpop.eup %3166 }
0x2ce6   :  { %3168 = vrcp.f32 %v2199_v53 }
0x2ce7   :  { %3170 = vpow2.f32 %v2809_v21 }
0x2cf0   :  { %v3169_v60 = vpop.eup %3168 }
0x2cf1   :  { %v2210_v57 = vmul.f32 %v3169_v60, %v3167_v55  ;;  %v3171_v23 = vpop.eup %3170  ;;  %v2209_v2 = vmul.f32 %v3169_v60, %v2141_v39 }
0x2cf2   :  { %v2206_v35 = vadd.f32 1.0, %v3171_v23 }
0x2cf3   :  { %2212 = vrot.lane.b32.xlu0 %v2210_v57, %s3247_s3 }
0x2cf4   :  { %3172 = vrcp.f32 %v2206_v35  ;;  %v341_v35 = vadd.f32 %v3700_v28, %v3411_v22 }
0x2cfe   :  { %v3173_v16 = vpop.eup %3172 }
0x2d65   :  { %v2213_v40 = vpop.permute.xlu0 %2212 }
0x2d66   :  { %v2215_v11 = vadd.f32 %v2213_v40, %v2209_v2  ;;  %v343_v2 = vadd.f32 %v3702_v29, %v3413_v24 }
0x2d68   :  { %3174 = vtanh.f32 %v2215_v11 }
0x2d72   :  { %v3175_v58 = vpop.eup %3174 }
0x2d73   :  { %v2217_v32 = vmul.f32 %v3175_v58, %v3173_v16 }
0x2d75   :  { %v2220_v48 = vpack.c.bf16 %v2217_v32, %v2217_v32 }
0x2d77   :  { %2222 = vrot.lane.b32.xlu1 %v2220_v48, %s3247_s3 }
0x2de9   :  { %v2223_v56 = vpop.permute.xlu1 %2222 }
0x2dea   :  { %2810 = vmatmul.mubr.msk.bf16.vlgmr.msra.gmra.mrb[60].mxu1 %vm447_vm2, %v2223_v56 }
0x2deb   :  { %2376 = vmatpush1.bf16.msra.mxu1 %v3951_v54  ;;  %2407 = vmatprep.mubr.bf16.mxu1 %v4160_v43 }
0x2dec   :  { %2377 = vmatprep.subr.bf16.mxu1 %v3958_v47 }
0x2def   :  { %2378 = vmatpush1.bf16.msra.mxu1 %v3964_v59 }
0x2df0   :  { %2379 = vmatprep.subr.bf16.mxu1 %v3991_v36 }
0x2df3   :  { %2380 = vmatpush1.bf16.msra.mxu1 %v3997_v63 }
0x2df4   :  { %2381 = vmatprep.subr.bf16.mxu1 %v4003_v34 }
0x2df7   :  { %2382 = vmatpush1.bf16.msra.mxu1 %v4009_v37 }
0x2ebd   :  { %v2261_v41 = vpop.f32.mrb[60].mxu1 }
0x2ebe   :  { %v2268_v6 = vadd.f32 %v2261_v41, %v331_v9  ;;  %v2263_v13 = vpop.f32.mrb[61].mxu1 }
0x2ebf   :  { %v2269_v50 = vadd.f32 %v2263_v13, %v333_v10  ;;  %v2265_v15 = vpop.f32.mrb[62].mxu1 }
0x2ec0   :  { %v2811_v30 = vmul.f32 -1.442695, %v2268_v6  ;;  %v2266_v7 = vpop.f32.mrb[63].mxu1 }
0x2ec1   :  { %v2812_v25 = vmul.f32 -1.442695, %v2269_v50 }
0x2ec2   :  { %3176 = vpow2.f32 %v2811_v30 }
0x2ec3   :  { %3178 = vtanh.f32 %v2269_v50 }
0x2ecc   :  { %v3177_v1 = vpop.eup %3176 }
0x2ecd   :  { %v2273_v8 = vadd.f32 1.0, %v3177_v1  ;;  %v3179_v18 = vpop.eup %3178 }
0x2ecf   :  { %3180 = vrcp.f32 %v2273_v8 }
0x2ed0   :  { %3182 = vpow2.f32 %v2812_v25  ;;  %v2515_v25 = vld [vmem:[%s4147_s7] sm:$0x1] }
0x2ed9   :  { %v3181_v20 = vpop.eup %3180 }
0x2eda   :  { %v2284_v31 = vmul.f32 %v3181_v20, %v3179_v18  ;;  %v3183_v26 = vpop.eup %3182  ;;  %v2283_v38 = vmul.f32 %v3181_v20, %v2215_v11 }
0x2edb   :  { %v2280_v51 = vadd.f32 1.0, %v3183_v26  ;;  %v2516_v26 = vadd.f32 1e-05, %v2515_v25 }
0x2edc   :  { %2286 = vrot.lane.b32.xlu0 %v2284_v31, %s3247_s3 }
0x2edd   :  { %3184 = vrcp.f32 %v2280_v51  ;;  %v2514_v51 = vld [vmem:[%s4148_s4] sm:$0x1] }
0x2ee7   :  { %v3185_v45 = vpop.eup %3184 }
0x2f4e   :  { %v2287_v39 = vpop.permute.xlu0 %2286 }
0x2f4f   :  { %v2289_v49 = vadd.f32 %v2287_v39, %v2283_v38 }
0x2f51   :  { %3186 = vtanh.f32 %v2289_v49 }
0x2f5b   :  { %v3187_v3 = vpop.eup %3186 }
0x2f5c   :  { %v2291_v5 = vmul.f32 %v3187_v3, %v3185_v45  ;;  %v4161_v45 = vld [vmem:[#allocation3_spill] sm:$0xff] }
0x2f5d   :  { %v345_v3 = vadd.f32 %v4161_v45, %v3411_v22 }
0x2f5e   :  { %v2294_v12 = vpack.c.bf16 %v2291_v5, %v2291_v5  ;;  %v4162_v5 = vld [vmem:[#allocation4_spill] sm:$0xff] }
0x2f60   :  { %2296 = vrot.lane.b32.xlu1 %v2294_v12, %s3247_s3  ;;  %v347_v12 = vadd.f32 %v4162_v5, %v3413_v24 }
0x2fd2   :  { %v2297_v4 = vpop.permute.xlu1 %2296 }
0x2fd3   :  { %2813 = vmatmul.mubr.msk.bf16.vlgmr.msra.gmra.mrb[92].mxu0 %vm447_vm2, %v2297_v4 }
0x2fd4   :  { %2450 = vmatpush1.bf16.msra.mxu0 %v3951_v54  ;;  %2481 = vmatprep.mubr.bf16.mxu0 %v4160_v43  ;;  %v337_v54 = vadd.f32 %v3698_v27, %v3413_v24  ;;  %v2519_v24 = vld [vmem:[%s4150_s5] sm:$0x1] }
0x2fd5   :  { %2451 = vmatprep.subr.bf16.mxu0 %v3958_v47 }
0x2fd8   :  { %2452 = vmatpush1.bf16.msra.mxu0 %v3964_v59 }
0x2fd9   :  { %2453 = vmatprep.subr.bf16.mxu0 %v3991_v36 }
0x2fdc   :  { %2454 = vmatpush1.bf16.msra.mxu0 %v3997_v63 }
0x2fdd   :  { %2455 = vmatprep.subr.bf16.mxu0 %v4003_v34 }
0x2fe0   :  { %2456 = vmatpush1.bf16.msra.mxu0 %v4009_v37 }
0x30a6   :  { %v2335_v52 = vpop.f32.mrb[92].mxu0 }
0x30a7   :  { %v2342_v43 = vadd.f32 %v2335_v52, %v335_v33  ;;  %v2337_v42 = vpop.f32.mrb[93].mxu0 }
0x30a8   :  { %v2343_v47 = vadd.f32 %v2337_v42, %v337_v54  ;;  %v2339_v44 = vpop.f32.mrb[94].mxu0 }
0x30a9   :  { %v2814_v59 = vmul.f32 -1.442695, %v2342_v43  ;;  %v2340_v46 = vpop.f32.mrb[95].mxu0 }
0x30aa   :  { %v2815_v0 = vmul.f32 -1.442695, %v2343_v47  ;;  %v2520_v46 = vld [vmem:[%s4149_s6] sm:$0x1] }
0x30ab   :  { %3188 = vpow2.f32 %v2814_v59 }
0x30ac   :  { %3190 = vtanh.f32 %v2343_v47 }
0x30b5   :  { %v3189_v36 = vpop.eup %3188 }
0x30b6   :  { %v2347_v63 = vadd.f32 1.0, %v3189_v36  ;;  %v3191_v34 = vpop.eup %3190 }
0x30b8   :  { %3192 = vrcp.f32 %v2347_v63 }
0x30b9   :  { %3194 = vpow2.f32 %v2815_v0  ;;  %v3248_v0 = vmov 0.0  }
0x30ba   :  { %2840 = vmatprep.subr.bf16.mxu1 %v3248_v0  ;;  %2852 = vmatprep.subr.bf16.mxu0 %v3248_v0 }
0x30c2   :  { %v3193_v37 = vpop.eup %3192 }
0x30c3   :  { %v2358_v61 = vmul.f32 %v3193_v37, %v3191_v34  ;;  %v3195_v27 = vpop.eup %3194  ;;  %v2357_v14 = vmul.f32 %v3193_v37, %v2289_v49 }
0x30c4   :  { %v2354_v62 = vadd.f32 1.0, %v3195_v27  ;;  %v2882_v27 = vld [vmem:[%s4151_s8] sm:$0xff]  }
0x30c5   :  { %2360 = vrot.lane.b32.xlu0 %v2358_v61, %s3247_s3 }
0x30c6   :  { %3196 = vrcp.f32 %v2354_v62  ;;  %v2883_v62 = vld [vmem:[%s4151_s8 + $0x8] sm:$0xff]  }
0x30d0   :  { %v3197_v55 = vpop.eup %3196 }
0x3137   :  { %v2361_v17 = vpop.permute.xlu0 %2360 }
0x3138   :  { %v2363_v53 = vadd.f32 %v2361_v17, %v2357_v14  ;;  %v2885_v14 = vld [vmem:[%s4151_s8 + $0x18] sm:$0xff]  }
0x313a   :  { %3198 = vtanh.f32 %v2363_v53 }
0x3144   :  { %v3199_v60 = vpop.eup %3198 }
0x3145   :  { %v2365_v57 = vmul.f32 %v3199_v60, %v3197_v55 }
0x3147   :  { %v2368_v21 = vpack.c.bf16 %v2365_v57, %v2365_v57 }
0x3149   :  { %2370 = vrot.lane.b32.xlu1 %v2368_v21, %s3247_s3 }
0x31bb   :  { %v2371_v23 = vpop.permute.xlu1 %2370 }
0x31bc   :  { %2816 = vmatmul.mubr.msk.bf16.vlgmr.msra.gmra.mrb[64].mxu1 %vm447_vm2, %v2371_v23  ;;  %v2886_v23 = vld [vmem:[%s4152_s10] sm:$0xff]  }
0x31bd   :  { %2848 = vmatprep.mubr.msk.bf16.mxu1 %vm3249_vm3, %v3248_v0  ;;  %2841 = vmatpush3.bf16.msra.mxu1 %v2882_v27 }
0x31be   :  { %2842 = vmatprep.subr.bf16.mxu1 %v3248_v0 }
0x31c1   :  { %2843 = vmatpush3.bf16.msra.mxu1 %v2883_v62 }
0x31c2   :  { %2844 = vmatprep.subr.bf16.mxu1 %v3248_v0 }
0x328f   :  { %v2409_v40 = vpop.f32.mrb[64].mxu1 }
0x3290   :  { %v2416_v11 = vadd.f32 %v2409_v40, %v341_v35  ;;  %v2411_v16 = vpop.f32.mrb[65].mxu1 }
0x3291   :  { %v2417_v58 = vadd.f32 %v2411_v16, %v343_v2  ;;  %v2413_v32 = vpop.f32.mrb[66].mxu1 }
0x3292   :  { %v2817_v48 = vmul.f32 -1.442695, %v2416_v11  ;;  %v2414_v56 = vpop.f32.mrb[67].mxu1 }
0x3293   :  { %v2818_v28 = vmul.f32 -1.442695, %v2417_v58 }
0x3294   :  { %3200 = vpow2.f32 %v2817_v48 }
0x3295   :  { %3202 = vtanh.f32 %v2417_v58 }
0x329e   :  { %v3201_v9 = vpop.eup %3200 }
0x329f   :  { %v2421_v10 = vadd.f32 1.0, %v3201_v9  ;;  %v3203_v41 = vpop.eup %3202  ;;  %v2887_v9 = vld [vmem:[%s4152_s10 + $0x8] sm:$0xff]  }
0x32a1   :  { %3204 = vrcp.f32 %v2421_v10  ;;  %v2822_v10 = vld [vmem:[%s4153_s9] ss:$0 sm:$0xff] }
0x32a2   :  { %3206 = vpow2.f32 %v2818_v28 }
0x32ab   :  { %v3205_v6 = vpop.eup %3204 }
0x32ac   :  { %v2432_v13 = vmul.f32 %v3205_v6, %v3203_v41  ;;  %v3207_v29 = vpop.eup %3206  ;;  %v2431_v15 = vmul.f32 %v3205_v6, %v2363_v53 }
0x32ad   :  { %v2428_v50 = vadd.f32 1.0, %v3207_v29 }
0x32ae   :  { %2434 = vrot.lane.b32.xlu0 %v2432_v13, %s3247_s3 }
0x32af   :  { %3208 = vrcp.f32 %v2428_v50 }
0x32b9   :  { %v3209_v1 = vpop.eup %3208 }
0x3320   :  { %v2435_v30 = vpop.permute.xlu0 %2434 }
0x3321   :  { %v4087_v7 = vadd.f32 %v2435_v30, %v2431_v15  ;;  %v2828_v30 = vld [vmem:[%s4154_s11] ss:$0 sm:$0xff] }
0x3323   :  { %3210 = vtanh.f32 %v4087_v7 }
0x3324   :  { %3212 = vrsqrt.f32 %v2516_v26 }
0x332d   :  { %v3211_v8 = vpop.eup %3210 }
0x332e   :  { %v2439_v18 = vmul.f32 %v3211_v8, %v3209_v1  ;;  %v3213_v38 = vpop.eup %3212 }
0x332f   :  { %v2518_v39 = vmul.f32 %v3213_v38, %v2514_v51 }
0x3330   :  { %v2442_v20 = vpack.c.bf16 %v2439_v18, %v2439_v18 }
0x3331   :  { %v2527_v49 = vrot.slane %v2518_v39, %v3405_v19  ;;  %v2521_v22 = vmul.f32 %v2520_v46, %v2518_v39 }
0x3332   :  { %2444 = vrot.lane.b32.xlu1 %v2442_v20, %s3247_s3 }
0x3333   :  { %v2522_v63 = vsub.f32 %v2519_v24, %v2521_v22 }
0x3335   :  { %v2536_v61 = vrot.slane %v2522_v63, %v3405_v19  ;;  %v2884_v19 = vld [vmem:[%s4151_s8 + $0x10] sm:$0xff]  }
0x3336   :  { %2528 = vrot.lane.b32.xlu1 %v2527_v49, %s3247_s3  ;;  %2845 = vmatpush3.bf16.msra.mxu1 %v2884_v19 }
0x3337   :  { %2846 = vmatprep.subr.bf16.mxu1 %v3248_v0 }
0x333a   :  { %2847 = vmatpush3.bf16.msra.mxu1 %v2885_v14 }
0x33a4   :  { %v2445_v31 = vpop.permute.xlu1 %2444 }
0x33a5   :  { %2819 = vmatmul.mubr.msk.bf16.vlgmr.msra.gmra.mrb[96].mxu0 %vm447_vm2, %v2445_v31 }
0x33a6   :  { %2856 = vmatprep.mubr.msk.bf16.mxu0 %vm3249_vm3, %v3248_v0  ;;  %2853 = vmatpush3.bf16.msra.mxu0 %v2886_v23 }
0x33a7   :  { %2854 = vmatprep.subr.bf16.mxu0 %v3248_v0 }
0x33a8   :  { %v2529_v40 = vpop.permute.xlu1 %2528 }
0x33aa   :  { %2855 = vmatpush3.bf16.msra.mxu0 %v2887_v9 }
0x3478   :  { %v2483_v4 = vpop.f32.mrb[96].mxu0 }
0x3479   :  { %v2490_v33 = vadd.f32 %v2483_v4, %v345_v3  ;;  %v2485_v54 = vpop.f32.mrb[97].mxu0 }
0x347a   :  { %v2491_v52 = vadd.f32 %v2485_v54, %v347_v12  ;;  %v2487_v43 = vpop.f32.mrb[98].mxu0 }
0x347b   :  { %v2820_v42 = vmul.f32 -1.442695, %v2490_v33  ;;  %v2488_v47 = vpop.f32.mrb[99].mxu0 }
0x347c   :  { %v2821_v17 = vmul.f32 -1.442695, %v2491_v52 }
0x347d   :  { %3214 = vpow2.f32 %v2820_v42 }
0x347e   :  { %3216 = vtanh.f32 %v2491_v52 }
0x3487   :  { %v3215_v44 = vpop.eup %3214 }
0x3488   :  { %v2495_v59 = vadd.f32 1.0, %v3215_v44  ;;  %v3217_v36 = vpop.eup %3216 }
0x348a   :  { %3218 = vrcp.f32 %v2495_v59 }
0x348b   :  { %3220 = vpow2.f32 %v2821_v17 }
0x3494   :  { %v3219_v34 = vpop.eup %3218 }
0x3495   :  { %v2506_v37 = vmul.f32 %v3219_v34, %v3217_v36  ;;  %v3221_v53 = vpop.eup %3220  ;;  %v2505_v60 = vmul.f32 %v3219_v34, %v4087_v7 }
0x3496   :  { %v2502_v55 = vadd.f32 1.0, %v3221_v53 }
0x3497   :  { %2508 = vrot.lane.b32.xlu0 %v2506_v37, %s3247_s3 }
0x3498   :  { %3222 = vrcp.f32 %v2502_v55 }
0x349b   :  { %2537 = vrot.lane.b32.xlu0 %v2536_v61, %s3247_s3 }
0x34a2   :  { %v3223_v35 = vpop.eup %3222 }
0x3509   :  { %v2509_v57 = vpop.permute.xlu0 %2508 }
0x350a   :  { %v2511_v21 = vadd.f32 %v2509_v57, %v2505_v60 }
0x350c   :  { %3224 = vtanh.f32 %v2511_v21 }
0x350d   :  { %v2538_v16 = vpop.permute.xlu0 %2537 }
0x3516   :  { %v3225_v2 = vpop.eup %3224 }
0x3517   :  { %v2513_v11 = vmul.f32 %v3225_v2, %v3223_v35 }
0x3519   :  { %v2531_v58 = vmul.f32 %v2529_v40, %v2513_v11 }
0x351b   :  { %v2540_v32 = vadd.f32 %v2538_v16, %v2531_v58 }
0x351d   :  { %v2541_v48 = vpack.c.bf16 %v2540_v32, %v2540_v32 }
0x351f   :  { %2558 = vrot.lane.b32.xlu1 %v2541_v48, %s3247_s3 }
0x3591   :  { %v2559_v56 = vpop.permute.xlu1 %2558 }
0x3592   :  { %2849 = vmatmul.mubr.msk.bf16.vlgmr.msra.gmra.mrb[68].mxu1 %vm447_vm2, %v2559_v56 }
0x3665   :  { %v2621_v41 = vpop.f32.mrb[68].mxu1 }
0x3666   :  { %v2622_v6 = vadd.f32 %v2822_v10, %v2621_v41  ;;  %v2850_v13 = vpop.f32.mrb[69].mxu1 }
0x3667   :  { %v2624_v28 = vpop.f32.mrb[70].mxu1 }
0x3668   :  { %v2627_v29 = vmax.f32 %v2622_v6, 0.0  ;;  %v2851_v50 = vpop.f32.mrb[71].mxu1 }
0x366a   :  { %v2628_v15 = vpack.c.bf16 %v2627_v29, %v2627_v29 }
0x366c   :  { %2857 = vmatmul.mubr.msk.bf16.vlgmr.msra.gmra.mrb[100].mxu0 %vm2652_vm4, %v2628_v15 }
0x373f   :  { %v2690_v7 = vpop.f32.mrb[100].mxu0 }
0x3740   :  { %v2691_v1 = vadd.f32 %v2828_v30, %v2690_v7  ;;  %v2858_v8 = vpop.f32.mrb[101].mxu0 }
0x3741   :  { %v2693_v18 = vpop.f32.mrb[102].mxu0 }
0x3742   :  { %2696 = vmax.xlane.f32.xlu0 %v2691_v1  ;;  %v2859_v20 = vpop.f32.mrb[103].mxu0 }
0x37cf   :  { %v2697_v31 = vpop.xlane.xlu0 %2696 }
0x37d0   :  { %v2698_v25 = vsub.f32 %v2691_v1, %v2697_v31 }
0x37d2   :  { %v2699_v26 = vmul.f32 1.442695, %v2698_v25 }
0x37d4   :  { %3226 = vpow2.f32 %v2699_v26 }
0x37de   :  { %v3227_v51 = vpop.eup %3226 }
0x37df   :  { %2701 = vadd.xlane.f32.xlu1 %v3227_v51 }
0x386c   :  { %v2702_v38 = vpop.xlane.xlu1 %2701 }
0x386d   :  { %3228 = vlog2.f32 %v2702_v38 }
0x3877   :  { %v3229_v39 = vpop.eup %3228 }
0x3878   :  { %v2704_v49 = vmul.f32 0.6931472, %v3229_v39 }
0x387a   :  { %v2705_v45 = vadd.f32 %v2704_v49, %v2697_v31 }
0x387c   :  { %v2706_v3 = vsub.f32 %v2691_v1, %v2705_v45 }
0x387e   :  { %2707 = vst [vmem:[%s4155_s12] sm:$0xff] %v2706_v3 }

</bundles_post_ra>
